<compile_context>
chip_gen: v7x
topology: tpu7x:2x2x1
jax: 0.10.0
libtpu: 0.0.40
codegen_flags: <defaults>
</compile_context>

<pallas_src>
import functools

import jax
import jax.numpy as jnp
from jax.experimental import pallas as pl
from jax.experimental.pallas import tpu as pltpu


# ---------------------------------------------------------------------------
# small math helpers
# ---------------------------------------------------------------------------
def _tanh_clamped(x, clamp=15.0):
    return jnp.tanh(jnp.clip(x, -clamp, clamp))


def _artanh_fast(x):
    # same clamp as torch Artanh.forward; single log instead of two
    x = jnp.clip(x, -1.0 + 1e-5, 1.0 - 1e-5)
    return 0.5 * jnp.log((1.0 + x) / (1.0 - x))


def _artanh_ref(x):
    # literal translation of torch Artanh.forward (for the pure-JAX reference)
    x = jnp.clip(x, -1.0 + 1e-5, 1.0 - 1e-5)
    return 0.5 * (jnp.log(1.0 + x) - jnp.log(1.0 - x))


def _row_sumsq(x):
    return jnp.sum(x * x, axis=-1, keepdims=True)


# ---------------------------------------------------------------------------
# fused per-tile math (expmap0 -> mobius matvec -> project -> logmap0)
# works for a 2-D (rows, H) tile or a 3-D (3, rows, H) batched block
# ---------------------------------------------------------------------------
def _adapter_body(x, w, out_dtype, curvature):
    c = curvature
    sqrt_c = c ** 0.5
    inv_sqrt_c = 1.0 / sqrt_c
    maxnorm = (1.0 - 1e-3) / sqrt_c
    inv_maxnorm = sqrt_c / (1.0 - 1e-3)

    # ---- expmap0 (poincare exponential map at the origin) ----
    x_ss = _row_sumsq(x)                                   # reduction #1 (unclamped)
    u_ss = jnp.maximum(x_ss, 1e-10)                        # clamp_min(norm,1e-5)^2
    inv_u = jax.lax.rsqrt(u_ss)
    u_norm = u_ss * inv_u                                  # == max(||x||, 1e-5)
    s = _tanh_clamped(sqrt_c * u_norm) * (inv_u * inv_sqrt_c)   # per-row scalar
    g = (s * x).astype(jnp.bfloat16)                       # bf16 operand for the MXU

    # analytic ||g||^2 = s^2 * ||x||^2  (clamp applied after the analytic product)
    g_ss = jnp.maximum(s * s * x_ss, 1e-10)
    inv_xn = jax.lax.rsqrt(g_ss)
    x_norm = g_ss * inv_xn                                 # == max(||g||, 1e-5)

    # ---- mobius_matvec: mx = g @ W^T  (W^T pre-materialized bf16, f32 accumulate) ----
    if x.ndim == 2:
        mx = jnp.dot(g, w, preferred_element_type=jnp.float32)
    else:
        mx = jnp.einsum("cmd,cde->cme", g, w, preferred_element_type=jnp.float32)

    mx_ss = _row_sumsq(mx)                                 # reduction #2 (last one)
    inv_mxn = jax.lax.rsqrt(jnp.maximum(mx_ss, 1e-30))     # clamped: no NaN/Inf ever
    mx_norm = mx_ss * inv_mxn

    res_scale = (_tanh_clamped(mx_norm * inv_xn * _artanh_fast(sqrt_c * x_norm))
                 * inv_mxn * inv_sqrt_c)

    # ---- _project + logmap0, fused; ||res||^2 = res_scale^2 * ||mx||^2 (analytic) ----
    r_ss = jnp.maximum(res_scale * res_scale * mx_ss, 1e-10)
    inv_n = jax.lax.rsqrt(r_ss)
    n = r_ss * inv_n                                       # == max(||res||, 1e-5)
    over = n > maxnorm
    yn = jnp.where(over, maxnorm, n)                       # norm after projection
    inv_yn = jnp.where(over, inv_maxnorm, inv_n)
    proj = jnp.where(over, maxnorm * inv_n, 1.0)           # projection factor
    out_scale = proj * inv_yn * inv_sqrt_c * _artanh_fast(sqrt_c * yn)

    # single fused per-row factor; `res` is never materialized
    f = jnp.where(mx_ss > 0.0, res_scale * out_scale, 0.0)
    return (f * mx).astype(out_dtype)


def _adapter_kernel(x_ref, w_ref, o_ref, *, curvature):
    o_ref[...] = _adapter_body(x_ref[...].astype(jnp.float32), w_ref[...],
                               o_ref.dtype, curvature)


# ---------------------------------------------------------------------------
# VMEM budgeting (generation-aware: v7x has 64 MiB/TC, v5e/v6e have 128 MiB)
# ---------------------------------------------------------------------------
def _vmem_budget_bytes():
    try:
        cap = int(pltpu.get_tpu_info().vmem_capacity_bytes)
    except Exception:
        cap = 64 << 20  # conservative (v7x per-TensorCore)
    return int(min(cap - (8 << 20), int(0.85 * cap)))


def _tiled_footprint(row_tile, H, w_buffers):
    io = 2 * 2 * row_tile * H * 4        # double-buffered f32 in + out row tiles
    wt = w_buffers * H * H * 2           # bf16 weight block buffer(s)
    tmp = 4 * row_tile * H * 4           # live f32 temporaries (x, g, mx, f*mx)
    return io + wt + tmp + (2 << 20)     # + compiler scratch headroom


def _single_step_footprint(H):
    # whole (3,H,H) f32 in + out, bf16 weights, ~4 live f32 temporaries
    return 3 * H * H * (4 + 4 + 2 + 16) + (2 << 20)


# ---------------------------------------------------------------------------
# wrapper
# ---------------------------------------------------------------------------
def adapter_init_text(attn, weights, curvature=1.0, row_tile=None, force_tiled=False):
    """attn: (3*H, H); weights: (3, H, H) block-diagonal adapter weights (q, k, v)."""
    three_h, H = attn.shape
    assert three_h == 3 * H, "attn must be the stacked (3*H, H) qkv weight"
    assert weights.shape == (3, H, H)

    # One-time XLA layout ops: W^T (kernel contracts the leading axis directly on the
    # MXU, no in-kernel transpose) + bf16 pre-cast (half the weight DMA/VMEM bytes).
    weights_t = jnp.swapaxes(weights, 1, 2).astype(jnp.bfloat16)

    budget = _vmem_budget_bytes()
    kernel = functools.partial(_adapter_kernel, curvature=float(curvature))

    # ---- path 1: small problem -> single grid step, batched over the 3 chunks ----
    if (not force_tiled) and row_tile is None and _single_step_footprint(H) <= budget:
        x3 = attn.reshape(3, H, H)
        out = pl.pallas_call(
            kernel,
            out_shape=jax.ShapeDtypeStruct((3, H, H), attn.dtype),
            grid_spec=pltpu.PrefetchScalarGridSpec(
                num_scalar_prefetch=0,
                grid=(1,),
                in_specs=[
                    pl.BlockSpec((3, H, H), lambda i: (0, 0, 0)),
                    pl.BlockSpec((3, H, H), lambda i: (0, 0, 0)),
                ],
                out_specs=pl.BlockSpec((3, H, H), lambda i: (0, 0, 0)),
            ),
            compiler_params=pltpu.CompilerParams(
                dimension_semantics=("arbitrary",),
                vmem_limit_bytes=budget,
            ),
        )(x3, weights_t)
        return out.reshape(3 * H, H)

    # ---- path 2: tiled over (chunk, row-tile) grid ----
    # Single-buffer the weight block only when double-buffering it would be costly
    # (its block index changes just 3 times across the whole grid).
    w_buffers = 1 if (H * H * 2) > (4 << 20) else 2

    if row_tile is None:
        row_tile = None
        for cand in (1024, 512, 256, 128):
            if H % cand == 0 and _tiled_footprint(cand, H, w_buffers) <= budget:
                row_tile = cand
                break
        if row_tile is None:
            row_tile = 128 if H % 128 == 0 else H
    assert H % row_tile == 0
    n_row = H // row_tile

    w_spec_kwargs = {}
    if w_buffers == 1:
        w_spec_kwargs = dict(pipeline_mode=pl.Buffered(1))

    vmem_bytes = int(min(budget, max(_tiled_footprint(row_tile, H, w_buffers), 16 << 20)))

    return pl.pallas_call(
        kernel,
        out_shape=jax.ShapeDtypeStruct((3 * H, H), attn.dtype),
        grid_spec=pltpu.PrefetchScalarGridSpec(
            num_scalar_prefetch=0,
            grid=(3, n_row),
            in_specs=[
                # row tile of the attn matrix (lane-dense, (8,128)-aligned)
                pl.BlockSpec((row_tile, H), lambda i, j: (i * n_row + j, 0)),
                # per-chunk adapter weight; leading dim squeezed, row-invariant
                # (block index only changes with i -> resident across the j axis)
                pl.BlockSpec((None, H, H), lambda i, j: (i, 0, 0), **w_spec_kwargs),
            ],
            out_specs=pl.BlockSpec((row_tile, H), lambda i, j: (i * n_row + j, 0)),
        ),
        compiler_params=pltpu.CompilerParams(
            dimension_semantics=("parallel", "parallel"),
            vmem_limit_bytes=vmem_bytes,
        ),
    )(attn, weights_t)


# ---------------------------------------------------------------------------
# block-diagonal adapter weight (module init is identity blocks; perturb the blocks
# to emulate a trained adapter so the matmul / transpose path is exercised)
# ---------------------------------------------------------------------------
def make_block_diag_weight(key, hidden_size, dim):
    r = hidden_size // dim
    blocks = (jnp.eye(dim, dtype=jnp.float32)[None]
              + 0.2 * jax.random.normal(key, (r, dim, dim), dtype=jnp.float32))
    return jax.scipy.linalg.block_diag(*[blocks[i] for i in range(r)])  # (H, H)


# ---------------------------------------------------------------------------
# plain-JAX reference (direct translation of the PyTorch math; same bf16 MXU dot)
# ---------------------------------------------------------------------------
def _ref_block(x, w, c):
    sqrt_c = c ** 0.5
    u_norm = jnp.maximum(jnp.sqrt(_row_sumsq(x)), 1e-5)
    g = _tanh_clamped(sqrt_c * u_norm) * x / (sqrt_c * u_norm)
    x_norm = jnp.maximum(jnp.sqrt(_row_sumsq(g)), 1e-5)
    mx = jnp.dot(g.astype(jnp.bfloat16), w.T.astype(jnp.bfloat16),
                 preferred_element_type=jnp.float32)
    mx_norm = jnp.sqrt(_row_sumsq(mx))
    res_c = (_tanh_clamped(mx_norm / x_norm * _artanh_ref(sqrt_c * x_norm))
             * mx / (mx_norm * sqrt_c))
    cond = jnp.all(mx == 0.0, axis=-1, keepdims=True)
    res = jnp.where(cond, jnp.zeros_like(res_c), res_c)
    n = jnp.maximum(jnp.sqrt(_row_sumsq(res)), 1e-5)
    maxnorm = (1.0 - 1e-3) / sqrt_c
    res = jnp.where(n > maxnorm, res / n * maxnorm, res)
    yn = jnp.maximum(jnp.sqrt(_row_sumsq(res)), 1e-5)
    return res / yn / sqrt_c * _artanh_ref(sqrt_c * yn)


def reference(attn, weights, c):
    H = attn.shape[1]
    outs = [_ref_block(attn[i * H:(i + 1) * H], weights[i], c) for i in range(3)]
    return jnp.concatenate(outs, axis=0).astype(attn.dtype)


def _make_inputs(key, hidden_size, dim):
    k_attn, k_q, k_k, k_v = jax.random.split(key, 4)
    attn = jax.random.normal(k_attn, (3 * hidden_size, hidden_size), dtype=jnp.float32)
    # per-row scales exercise the unsaturated / saturated / projected branches
    row_scale = jnp.logspace(-2.0, 0.5, 3 * hidden_size, dtype=jnp.float32)[:, None]
    attn = attn * row_scale
    w_q = make_block_diag_weight(k_q, hidden_size, dim)
    w_k = make_block_diag_weight(k_k, hidden_size, dim)
    w_v = make_block_diag_weight(k_v, hidden_size, dim)
    return attn, jnp.stack([w_q, w_k, w_v], axis=0)


# ---------------------------------------------------------------------------
if __name__ == "__main__":
    curvature_ratio = 1.0
    key = jax.random.PRNGKey(0)
    k0, k1 = jax.random.split(key)

    # --- test 1: H=128, dim=32 -> single-step batched path ---
    attn1, weights1 = _make_inputs(k0, 128, 32)
    out1 = jax.block_until_ready(
        adapter_init_text(attn1, weights1, curvature=curvature_ratio))
    ref1 = jax.block_until_ready(reference(attn1, weights1, curvature_ratio))
    assert out1.shape == attn1.shape and out1.dtype == attn1.dtype
    err1 = float(jnp.max(jnp.abs(out1 - ref1)))
    assert jnp.allclose(out1, ref1, atol=2e-3, rtol=2e-3), f"mismatch (path 1), max abs err {err1}"

    # --- test 2: H=256, dim=64 -> forced tiled path, grid=(3, 2) ---
    attn2, weights2 = _make_inputs(k1, 256, 64)
    out2 = jax.block_until_ready(
        adapter_init_text(attn2, weights2, curvature=curvature_ratio,
                          row_tile=128, force_tiled=True))
    ref2 = jax.block_until_ready(reference(attn2, weights2, curvature_ratio))
    assert out2.shape == attn2.shape and out2.dtype == attn2.dtype
    err2 = float(jnp.max(jnp.abs(out2 - ref2)))
    assert jnp.allclose(out2, ref2, atol=2e-3, rtol=2e-3), f"mismatch (path 2), max abs err {err2}"

    print("KERNEL_OK")
</pallas_src>

<mosaic_0001>
module attributes {stable_mosaic.version = 11 : i64} {
  func.func @_adapter_kernel(%arg0: i32, %arg1: memref<3x128x128xf32, #tpu.memory_space<vmem>>, %arg2: memref<3x128x128xbf16, #tpu.memory_space<vmem>>, %arg3: memref<3x128x128xf32, #tpu.memory_space<vmem>>) attributes {dimension_semantics = [#tpu.dimension_semantics<arbitrary>], iteration_bounds = array<i64: 1>, scalar_prefetch = 0 : i64, scratch_operands = 0 : i64, tpu.core_type = #tpu.core_type<tc>, window_params = [{pipeline_mode = #tpu.pipeline_mode<synchronous>, transform_indices = @transform_0, window_bounds = array<i64: 3, 128, 128>}, {pipeline_mode = #tpu.pipeline_mode<synchronous>, transform_indices = @transform_1, window_bounds = array<i64: 3, 128, 128>}, {pipeline_mode = #tpu.pipeline_mode<synchronous>, transform_indices = @transform_2, window_bounds = array<i64: 3, 128, 128>}]} {
    %c0 = arith.constant 0 : index
    %c0_0 = arith.constant 0 : index
    %c0_1 = arith.constant 0 : index
    %0 = vector.load %arg1[%c0, %c0_0, %c0_1] : memref<3x128x128xf32, #tpu.memory_space<vmem>>, vector<3x128x128xf32>
    %c0_2 = arith.constant 0 : index
    %c0_3 = arith.constant 0 : index
    %c0_4 = arith.constant 0 : index
    %1 = vector.load %arg2[%c0_2, %c0_3, %c0_4] : memref<3x128x128xbf16, #tpu.memory_space<vmem>>, vector<3x128x128xbf16>
    %2 = arith.mulf %0, %0 : vector<3x128x128xf32>
    %cst = arith.constant dense<0.000000e+00> : vector<3x128xf32>
    %3 = vector.multi_reduction <add>, %2, %cst [2] : vector<3x128x128xf32> to vector<3x128xf32>
    %4 = vector.shape_cast %3 : vector<3x128xf32> to vector<3x128x1xf32>
    %cst_5 = arith.constant 1.000000e-10 : f32
    %5 = vector.broadcast %cst_5 : f32 to vector<3x128x1xf32>
    %6 = arith.maximumf %4, %5 : vector<3x128x1xf32>
    %7 = math.rsqrt %6 : vector<3x128x1xf32>
    %8 = arith.mulf %6, %7 : vector<3x128x1xf32>
    %cst_6 = arith.constant 1.000000e+00 : f32
    %9 = vector.broadcast %cst_6 : f32 to vector<3x128x1xf32>
    %10 = arith.mulf %9, %8 : vector<3x128x1xf32>
    %cst_7 = arith.constant -1.500000e+01 : f32
    %cst_8 = arith.constant 1.500000e+01 : f32
    %11 = vector.broadcast %cst_7 : f32 to vector<3x128x1xf32>
    %12 = arith.maximumf %11, %10 : vector<3x128x1xf32>
    %13 = vector.broadcast %cst_8 : f32 to vector<3x128x1xf32>
    %14 = arith.minimumf %13, %12 : vector<3x128x1xf32>
    %15 = math.tanh %14 : vector<3x128x1xf32>
    %cst_9 = arith.constant 1.000000e+00 : f32
    %16 = vector.broadcast %cst_9 : f32 to vector<3x128x1xf32>
    %17 = arith.mulf %7, %16 : vector<3x128x1xf32>
    %18 = arith.mulf %15, %17 : vector<3x128x1xf32>
    %19 = vector.broadcast %18 : vector<3x128x1xf32> to vector<3x128x128xf32>
    %20 = arith.mulf %19, %0 : vector<3x128x128xf32>
    %21 = arith.truncf %20 : vector<3x128x128xf32> to vector<3x128x128xbf16>
    %22 = arith.mulf %18, %18 : vector<3x128x1xf32>
    %23 = arith.mulf %22, %4 : vector<3x128x1xf32>
    %cst_10 = arith.constant 1.000000e-10 : f32
    %24 = vector.broadcast %cst_10 : f32 to vector<3x128x1xf32>
    %25 = arith.maximumf %23, %24 : vector<3x128x1xf32>
    %26 = math.rsqrt %25 : vector<3x128x1xf32>
    %27 = arith.mulf %25, %26 : vector<3x128x1xf32>
    "tpu.trace_start"() <{level = 10 : i32, message = "cmd,cde->cme"}> : () -> ()
    %cst_11 = arith.constant dense<0.000000e+00> : vector<3x128x128xf32>
    %28 = tpu.matmul %21, %1, %cst_11 {dimension_numbers = #tpu.dot_dimension_numbers<[2], [1], [1], [2], [0, 0, 0, 1, 1, 2], [0], [0]>} : vector<3x128x128xbf16>, vector<3x128x128xbf16>, vector<3x128x128xf32> -> vector<3x128x128xf32>
    "tpu.trace_stop"() : () -> ()
    %29 = arith.mulf %28, %28 : vector<3x128x128xf32>
    %cst_12 = arith.constant dense<0.000000e+00> : vector<3x128xf32>
    %30 = vector.multi_reduction <add>, %29, %cst_12 [2] : vector<3x128x128xf32> to vector<3x128xf32>
    %31 = vector.shape_cast %30 : vector<3x128xf32> to vector<3x128x1xf32>
    %cst_13 = arith.constant 1.000000e-30 : f32
    %32 = vector.broadcast %cst_13 : f32 to vector<3x128x1xf32>
    %33 = arith.maximumf %31, %32 : vector<3x128x1xf32>
    %34 = math.rsqrt %33 : vector<3x128x1xf32>
    %35 = arith.mulf %31, %34 : vector<3x128x1xf32>
    %36 = arith.mulf %35, %26 : vector<3x128x1xf32>
    %cst_14 = arith.constant 1.000000e+00 : f32
    %37 = vector.broadcast %cst_14 : f32 to vector<3x128x1xf32>
    %38 = arith.mulf %37, %27 : vector<3x128x1xf32>
    %cst_15 = arith.constant -0.999989986 : f32
    %cst_16 = arith.constant 0.999989986 : f32
    %39 = vector.broadcast %cst_15 : f32 to vector<3x128x1xf32>
    %40 = arith.maximumf %39, %38 : vector<3x128x1xf32>
    %41 = vector.broadcast %cst_16 : f32 to vector<3x128x1xf32>
    %42 = arith.minimumf %41, %40 : vector<3x128x1xf32>
    %cst_17 = arith.constant 1.000000e+00 : f32
    %43 = vector.broadcast %cst_17 : f32 to vector<3x128x1xf32>
    %44 = arith.addf %43, %42 : vector<3x128x1xf32>
    %cst_18 = arith.constant 1.000000e+00 : f32
    %45 = vector.broadcast %cst_18 : f32 to vector<3x128x1xf32>
    %46 = arith.subf %45, %42 : vector<3x128x1xf32>
    %47 = arith.divf %44, %46 : vector<3x128x1xf32>
    %48 = math.log %47 : vector<3x128x1xf32>
    %cst_19 = arith.constant 5.000000e-01 : f32
    %49 = vector.broadcast %cst_19 : f32 to vector<3x128x1xf32>
    %50 = arith.mulf %49, %48 : vector<3x128x1xf32>
    %51 = arith.mulf %36, %50 : vector<3x128x1xf32>
    %cst_20 = arith.constant -1.500000e+01 : f32
    %cst_21 = arith.constant 1.500000e+01 : f32
    %52 = vector.broadcast %cst_20 : f32 to vector<3x128x1xf32>
    %53 = arith.maximumf %52, %51 : vector<3x128x1xf32>
    %54 = vector.broadcast %cst_21 : f32 to vector<3x128x1xf32>
    %55 = arith.minimumf %54, %53 : vector<3x128x1xf32>
    %56 = math.tanh %55 : vector<3x128x1xf32>
    %57 = arith.mulf %56, %34 : vector<3x128x1xf32>
    %cst_22 = arith.constant 1.000000e+00 : f32
    %58 = vector.broadcast %cst_22 : f32 to vector<3x128x1xf32>
    %59 = arith.mulf %57, %58 : vector<3x128x1xf32>
    %60 = arith.mulf %59, %59 : vector<3x128x1xf32>
    %61 = arith.mulf %60, %31 : vector<3x128x1xf32>
    %cst_23 = arith.constant 1.000000e-10 : f32
    %62 = vector.broadcast %cst_23 : f32 to vector<3x128x1xf32>
    %63 = arith.maximumf %61, %62 : vector<3x128x1xf32>
    %64 = math.rsqrt %63 : vector<3x128x1xf32>
    %65 = arith.mulf %63, %64 : vector<3x128x1xf32>
    %cst_24 = arith.constant 9.990000e-01 : f32
    %66 = vector.broadcast %cst_24 : f32 to vector<3x128x1xf32>
    %67 = arith.cmpf ogt, %65, %66 : vector<3x128x1xf32>
    %cst_25 = arith.constant 9.990000e-01 : f32
    %68 = vector.broadcast %cst_25 : f32 to vector<3x128x1xf32>
    %69 = arith.select %67, %68, %65 : vector<3x128x1xi1>, vector<3x128x1xf32>
    %cst_26 = arith.constant 1.001001 : f32
    %70 = vector.broadcast %cst_26 : f32 to vector<3x128x1xf32>
    %71 = arith.select %67, %70, %64 : vector<3x128x1xi1>, vector<3x128x1xf32>
    %cst_27 = arith.constant 9.990000e-01 : f32
    %72 = vector.broadcast %cst_27 : f32 to vector<3x128x1xf32>
    %73 = arith.mulf %72, %64 : vector<3x128x1xf32>
    %cst_28 = arith.constant 1.000000e+00 : f32
    %74 = vector.broadcast %cst_28 : f32 to vector<3x128x1xf32>
    %75 = arith.select %67, %73, %74 : vector<3x128x1xi1>, vector<3x128x1xf32>
    %76 = arith.mulf %75, %71 : vector<3x128x1xf32>
    %cst_29 = arith.constant 1.000000e+00 : f32
    %77 = vector.broadcast %cst_29 : f32 to vector<3x128x1xf32>
    %78 = arith.mulf %76, %77 : vector<3x128x1xf32>
    %cst_30 = arith.constant 1.000000e+00 : f32
    %79 = vector.broadcast %cst_30 : f32 to vector<3x128x1xf32>
    %80 = arith.mulf %79, %69 : vector<3x128x1xf32>
    %cst_31 = arith.constant -0.999989986 : f32
    %cst_32 = arith.constant 0.999989986 : f32
    %81 = vector.broadcast %cst_31 : f32 to vector<3x128x1xf32>
    %82 = arith.maximumf %81, %80 : vector<3x128x1xf32>
    %83 = vector.broadcast %cst_32 : f32 to vector<3x128x1xf32>
    %84 = arith.minimumf %83, %82 : vector<3x128x1xf32>
    %cst_33 = arith.constant 1.000000e+00 : f32
    %85 = vector.broadcast %cst_33 : f32 to vector<3x128x1xf32>
    %86 = arith.addf %85, %84 : vector<3x128x1xf32>
    %cst_34 = arith.constant 1.000000e+00 : f32
    %87 = vector.broadcast %cst_34 : f32 to vector<3x128x1xf32>
    %88 = arith.subf %87, %84 : vector<3x128x1xf32>
    %89 = arith.divf %86, %88 : vector<3x128x1xf32>
    %90 = math.log %89 : vector<3x128x1xf32>
    %cst_35 = arith.constant 5.000000e-01 : f32
    %91 = vector.broadcast %cst_35 : f32 to vector<3x128x1xf32>
    %92 = arith.mulf %91, %90 : vector<3x128x1xf32>
    %93 = arith.mulf %78, %92 : vector<3x128x1xf32>
    %cst_36 = arith.constant 0.000000e+00 : f32
    %94 = vector.broadcast %cst_36 : f32 to vector<3x128x1xf32>
    %95 = arith.cmpf ogt, %31, %94 : vector<3x128x1xf32>
    %96 = arith.mulf %59, %93 : vector<3x128x1xf32>
    %cst_37 = arith.constant 0.000000e+00 : f32
    %97 = vector.broadcast %cst_37 : f32 to vector<3x128x1xf32>
    %98 = arith.select %95, %96, %97 : vector<3x128x1xi1>, vector<3x128x1xf32>
    %99 = vector.broadcast %98 : vector<3x128x1xf32> to vector<3x128x128xf32>
    %100 = arith.mulf %99, %28 : vector<3x128x128xf32>
    %c0_38 = arith.constant 0 : index
    %c0_39 = arith.constant 0 : index
    %c0_40 = arith.constant 0 : index
    %101 = vector.load %arg3[%c0_38, %c0_39, %c0_40] : memref<3x128x128xf32, #tpu.memory_space<vmem>>, vector<3x128x128xf32>
    tpu.vector_store %arg3[%c0_38, %c0_39, %c0_40], %100 {strides = array<i32>} : memref<3x128x128xf32, #tpu.memory_space<vmem>>, vector<3x128x128xf32>,
    return
  }
  func.func @transform_0(%arg0: i32) -> (i32, i32, i32) {
    %c0_i32 = arith.constant 0 : i32
    %c0_i32_0 = arith.constant 0 : i32
    %c0_i32_1 = arith.constant 0 : i32
    %c0_i32_2 = arith.constant 0 : i32
    return %c0_i32, %c0_i32_0, %c0_i32_1 : i32, i32, i32
  }
  func.func @transform_1(%arg0: i32) -> (i32, i32, i32) {
    %c0_i32 = arith.constant 0 : i32
    %c0_i32_0 = arith.constant 0 : i32
    %c0_i32_1 = arith.constant 0 : i32
    %c0_i32_2 = arith.constant 0 : i32
    return %c0_i32, %c0_i32_0, %c0_i32_1 : i32, i32, i32
  }
  func.func @transform_2(%arg0: i32) -> (i32, i32, i32) {
    %c0_i32 = arith.constant 0 : i32
    %c0_i32_0 = arith.constant 0 : i32
    %c0_i32_1 = arith.constant 0 : i32
    %c0_i32_2 = arith.constant 0 : i32
    return %c0_i32, %c0_i32_0, %c0_i32_1 : i32, i32, i32
  }
}

</mosaic_0001>

<bundles_post_ra>
// kernel: tpu_custom_call.1
= control target key start
LH: loop header
LB: loop body
LE: loop exit
PB: predicated region body
PF: predicated region fallthrough
CT: control target
= control target key end

     0   :  { %7 = vsyncpa [#allocation3], 0  ;;  %s9213_s0 = inlined_call_operand.hbm [shape: f32[3,128,128], index: 0, kind: input, shape index: {}]   ;;  %s9214_s1 = inlined_call_operand.hbm [shape: bf16[3,128,128], index: 1, kind: input, shape index: {}]   ;;  %s9215_s2 = inlined_call_operand.hbm [shape: f32[3,128,128], index: 2, kind: output, shape index: {}]  }
   0x1   :  { %8 = vsyncpa [#allocation6], 0 }
   0x2   :  { %9 = vsyncpa [#allocation4], 0  ;;  %s5095_s9 = smov [#allocation2]   ;;  %s5023_s13 = scalar_lea.hbm %s9213_s0, 6144 }
   0x3   :  { %s15_s10 = sshll.u32 %s5095_s9, 4  ;;  %p5024_p0 = scmp.ne.s32.totalorder %s9213_s0, %s5023_s13  ;;  %s16_s10 = int_to_ptr.vmem [resolvable:$true] %s15_s10 }
   0x4   :  { %p5027_p1 = scmp.lt.u32.totalorder %s5023_s13, %s9213_s0 }
   0x6   :  { %p5029_p2 = pnand %p5027_p1, %p5024_p0 }
   0x8   :  { %5032 = shalt.err (!%p5029_p2)
}
   0x9   :  { %s5033_s18 = scalar_lea.vmem %s16_s10, 6144  ;;  %p5038_p4 = scmp.lt.s32.totalorder %s16_s10, %s16_s10 }
   0xa   :  { %p5034_p3 = scmp.ne.s32.totalorder %s16_s10, %s5033_s18  ;;  %p5039_p5 = scmp.lt.s32.totalorder %s5033_s18, %s5033_s18 }
   0xc   :  { %p5040_p6 = por %p5039_p5, %p5038_p4 }
   0xe   :  { %p5041_p7 = pnand %p5040_p6, %p5034_p3 }
  0x10   :  { %5044 = shalt.err (!%p5041_p7)
}
  0x11   :  { %s5096_s19 = smov 128   ;;  %s5097_s20 = smov 8  }
  0x12   :  { %21 = dma.hbm_to_vmem [thread:$0]  %s9213_s0, 6144, %s16_s10, [#allocation3], %s5096_s19, %s5096_s19, %s5097_s20  }
  0x13   :  { %s5098_s23 = smov [#allocation5]   ;;  %s5045_s27 = scalar_lea.hbm %s9214_s1, 3072 }
  0x14   :  { %s27_s24 = sshll.u32 %s5098_s23, 4  ;;  %p5046_p8 = scmp.ne.s32.totalorder %s9214_s1, %s5045_s27  ;;  %s28_s24 = int_to_ptr.vmem [resolvable:$true] %s27_s24 }
  0x15   :  { %p5049_p9 = scmp.lt.u32.totalorder %s5045_s27, %s9214_s1 }
  0x17   :  { %p5051_p10 = pnand %p5049_p9, %p5046_p8 }
  0x19   :  { %5054 = shalt.err (!%p5051_p10)
}
  0x1a   :  { %s5055_s4 = scalar_lea.vmem %s28_s24, 3072  ;;  %p5060_p12 = scmp.lt.s32.totalorder %s28_s24, %s28_s24 }
  0x1b   :  { %p5056_p11 = scmp.ne.s32.totalorder %s28_s24, %s5055_s4  ;;  %p5061_p13 = scmp.lt.s32.totalorder %s5055_s4, %s5055_s4 }
  0x1d   :  { %p5062_p0 = por %p5061_p13, %p5060_p12 }
  0x1f   :  { %p5063_p1 = pnand %p5062_p0, %p5056_p11 }
  0x21   :  { %5066 = shalt.err (!%p5063_p1)
}
  0x22   :  { %s5099_s0 = smov 64   ;;  %s5100_s5 = smov 4  }
  0x23   :  { %33 = dma.hbm_to_vmem [thread:$0]  %s9214_s1, 3072, %s28_s24, [#allocation6], %s5099_s0, %s5099_s0, %s5100_s5  }
  0x24   :  { %5089 = dma.done.wait [#allocation3], 6144  }
  0x25   :  { %5090 = vsyncadd [#allocation3], 4294961152 }
  0x26   :  { %5091 = dma.done.wait [#allocation6], 3072  }
  0x27   :  { %5092 = vsyncadd [#allocation6], 4294964224  ;;  %v5144_v0 = vld [vmem:[#allocation2 + $0x80] sm:$0xff]  ;;  %v5148_v2 = vld [vmem:[#allocation2 + $0x88] sm:$0xff]  ;;  %s5101_s1 = smov [#allocation7]  }
  0x28   :  { %v5146_v1 = vld [vmem:[#allocation2] sm:$0xff]  ;;  %v153_v3 = vmul.f32 %v5144_v0, %v5144_v0  ;;  %v5154_v5 = vld [vmem:[#allocation2 + $0x8] sm:$0xff]  ;;  %v154_v6 = vmul.f32 %v5148_v2, %v5148_v2  ;;  %v5160_v8 = vld [vmem:[#allocation2 + $0x18] sm:$0xff]  ;;  %s3625_s8 = sshll.u32 %s5101_s1, 4  ;;  %s3626_s8 = int_to_ptr.vmem [resolvable:$true] %s3625_s8 }
  0x29   :  { %v137_v4 = vmul.f32 %v5146_v1, %v5146_v1  ;;  %v138_v7 = vmul.f32 %v5154_v5, %v5154_v5  ;;  %v5162_v9 = vld [vmem:[#allocation2 + $0x10] sm:$0xff]  ;;  %v140_v10 = vmul.f32 %v5160_v8, %v5160_v8  ;;  %v5168_v12 = vld [vmem:[#allocation2 + $0x98] sm:$0xff]  ;;  %v5176_v16 = vld [vmem:[#allocation2 + $0x28] sm:$0xff]  ;;  %s5067_s9 = scalar_lea.vmem %s3626_s8, 6144  ;;  %p5072_p3 = scmp.lt.s32.totalorder %s3626_s8, %s3626_s8 }
  0x2a   :  { %217 = vadd.xlane.f32.xlu1 %v153_v3  ;;  %v139_v11 = vmul.f32 %v5162_v9, %v5162_v9  ;;  %v5170_v13 = vld [vmem:[#allocation2 + $0x90] sm:$0xff]  ;;  %v156_v14 = vmul.f32 %v5168_v12, %v5168_v12  ;;  %v5178_v17 = vld [vmem:[#allocation2 + $0x20] sm:$0xff]  ;;  %v142_v18 = vmul.f32 %v5176_v16, %v5176_v16  ;;  %v5184_v20 = vld [vmem:[#allocation2 + $0xa8] sm:$0xff]  ;;  %p5068_p2 = scmp.ne.s32.totalorder %s3626_s8, %s5067_s9  ;;  %p5073_p4 = scmp.lt.s32.totalorder %s5067_s9, %s5067_s9 }
  0x2b   :  { %185 = vadd.xlane.f32.xlu0 %v137_v4  ;;  %v155_v15 = vmul.f32 %v5170_v13, %v5170_v13  ;;  %v141_v19 = vmul.f32 %v5178_v17, %v5178_v17  ;;  %v5186_v21 = vld [vmem:[#allocation2 + $0xa0] sm:$0xff]  ;;  %v5188_v22 = vld [vmem:[#allocation2 + $0x38] sm:$0xff]  ;;  %v5190_v23 = vld [vmem:[#allocation2 + $0x30] sm:$0xff]  ;;  %v158_v24 = vmul.f32 %v5184_v20, %v5184_v20 }
  0x2c   :  { %v157_v25 = vmul.f32 %v5186_v21, %v5186_v21  ;;  %v5196_v26 = vld [vmem:[#allocation2 + $0xb8] sm:$0xff]  ;;  %v5198_v27 = vld [vmem:[#allocation2 + $0xb0] sm:$0xff]  ;;  %v144_v28 = vmul.f32 %v5188_v22, %v5188_v22  ;;  %v143_v29 = vmul.f32 %v5190_v23, %v5190_v23  ;;  %v5204_v30 = vld [vmem:[#allocation2 + $0x48] sm:$0xff]  ;;  %p5074_p5 = por %p5073_p4, %p5072_p3 }
  0x2d   :  { %9441 = vst [vmem:[#allocation11_spill] sm:$0xff] %v5196_v26  ;;  %9442 = vst [vmem:[#allocation12_spill] sm:$0xff] %v5204_v30  ;;  %v5206_v31 = vld [vmem:[#allocation2 + $0x40] sm:$0xff]  ;;  %v160_v33 = vmul.f32 %v5196_v26, %v5196_v26  ;;  %v159_v34 = vmul.f32 %v5198_v27, %v5198_v27  ;;  %v5212_v35 = vld [vmem:[#allocation2 + $0xc8] sm:$0xff]  ;;  %v146_v37 = vmul.f32 %v5204_v30, %v5204_v30 }
  0x2e   :  { %219 = vadd.xlane.f32.xlu1 %v154_v6  ;;  %9443 = vst [vmem:[#allocation13_spill] sm:$0xff] %v5206_v31  ;;  %v4021_v32 = vld [vmem:[#allocation5] sm:$0xff]   ;;  %9444 = vst [vmem:[#allocation14_spill] sm:$0xff] %v5212_v35  ;;  %v145_v38 = vmul.f32 %v5206_v31, %v5206_v31  ;;  %v4022_v39 = vld [vmem:[#allocation5 + $0x8] sm:$0xff]   ;;  %v162_v41 = vmul.f32 %v5212_v35, %v5212_v35  ;;  %p5075_p6 = pnand %p5074_p5, %p5068_p2 }
  0x2f   :  { %187 = vadd.xlane.f32.xlu0 %v138_v7  ;;  %3902 = vmatprep.subr.bf16.mxu0 %v4021_v32  ;;  %v5214_v36 = vld [vmem:[#allocation2 + $0xc0] sm:$0xff]  ;;  %v5224_v43 = vld [vmem:[#allocation2 + $0x58] sm:$0xff]  ;;  %v5226_v44 = vld [vmem:[#allocation2 + $0x50] sm:$0xff] }
  0x30   :  { %3903 = vmatpush3.bf16.msra.mxu0 %v4021_v32  ;;  %9445 = vst [vmem:[#allocation15_spill] sm:$0xff] %v5214_v36  ;;  %v4023_v40 = vld [vmem:[#allocation5 + $0x40] sm:$0xff]   ;;  %v161_v42 = vmul.f32 %v5214_v36, %v5214_v36  ;;  %9446 = vst [vmem:[#allocation16_spill] sm:$0xff] %v5224_v43  ;;  %v4024_v45 = vld [vmem:[#allocation5 + $0x10] sm:$0xff]   ;;  %v148_v47 = vmul.f32 %v5224_v43, %v5224_v43  ;;  %v147_v48 = vmul.f32 %v5226_v44, %v5226_v44 }
  0x31   :  { %3904 = vmatprep.subr.bf16.mxu0 %v4022_v39  ;;  %3934 = vmatprep.subr.bf16.mxu1 %v4023_v40  ;;  %9447 = vst [vmem:[#allocation17_spill] sm:$0xff] %v5226_v44  ;;  %v4025_v46 = vld [vmem:[#allocation5 + $0x48] sm:$0xff]   ;;  %v5232_v49 = vld [vmem:[#allocation2 + $0xd8] sm:$0xff]  ;;  %v5234_v50 = vld [vmem:[#allocation2 + $0xd0] sm:$0xff] }
  0x32   :  { %191 = vadd.xlane.f32.xlu1 %v140_v10  ;;  %3935 = vmatpush3.bf16.msra.mxu1 %v4023_v40  ;;  %9448 = vst [vmem:[#allocation18_spill] sm:$0xff] %v5232_v49  ;;  %9449 = vst [vmem:[#allocation19_spill] sm:$0xff] %v5234_v50  ;;  %v164_v51 = vmul.f32 %v5232_v49, %v5232_v49  ;;  %v163_v52 = vmul.f32 %v5234_v50, %v5234_v50  ;;  %v5240_v53 = vld [vmem:[#allocation2 + $0x68] sm:$0xff]  ;;  %v5242_v54 = vld [vmem:[#allocation2 + $0x60] sm:$0xff] }
  0x33   :  { %189 = vadd.xlane.f32.xlu0 %v139_v11  ;;  %3936 = vmatprep.subr.bf16.mxu1 %v4025_v46  ;;  %9450 = vst [vmem:[#allocation20_spill] sm:$0xff] %v5240_v53  ;;  %9451 = vst [vmem:[#allocation21_spill] sm:$0xff] %v5242_v54  ;;  %v4026_v55 = vld [vmem:[#allocation5 + $0x18] sm:$0xff]   ;;  %v4027_v56 = vld [vmem:[#allocation5 + $0x50] sm:$0xff]   ;;  %v150_v57 = vmul.f32 %v5240_v53, %v5240_v53  ;;  %v149_v58 = vmul.f32 %v5242_v54, %v5242_v54 }
  0x34   :  { %3905 = vmatpush3.bf16.msra.mxu0 %v4022_v39  ;;  %v5248_v59 = vld [vmem:[#allocation2 + $0xe8] sm:$0xff]  ;;  %v5250_v60 = vld [vmem:[#allocation2 + $0xe0] sm:$0xff]  ;;  %v5256_v63 = vld [vmem:[#allocation2 + $0x78] sm:$0xff] }
  0x35   :  { %3906 = vmatprep.subr.bf16.mxu0 %v4024_v45  ;;  %9452 = vst [vmem:[#allocation22_spill] sm:$0xff] %v5248_v59  ;;  %9453 = vst [vmem:[#allocation23_spill] sm:$0xff] %v5250_v60  ;;  %v166_v61 = vmul.f32 %v5248_v59, %v5248_v59  ;;  %v165_v62 = vmul.f32 %v5250_v60, %v5250_v60  ;;  %v5258_v3 = vld [vmem:[#allocation2 + $0x70] sm:$0xff]  ;;  %v152_v4 = vmul.f32 %v5256_v63, %v5256_v63  ;;  %v72_v7 = vld [vmem:[#allocation2 + $0xf8] sm:$0xff] }
  0x36   :  { %223 = vadd.xlane.f32.xlu1 %v156_v14  ;;  %3937 = vmatpush3.bf16.msra.mxu1 %v4025_v46  ;;  %9454 = vst [vmem:[#allocation24_spill] sm:$0xff] %v5256_v63  ;;  %9455 = vst [vmem:[#allocation25_spill] sm:$0xff] %v5258_v3  ;;  %v151_v6 = vmul.f32 %v5258_v3, %v5258_v3  ;;  %v71_v10 = vld [vmem:[#allocation2 + $0xf0] sm:$0xff]  ;;  %v4028_v11 = vld [vmem:[#allocation5 + $0x20] sm:$0xff]  }
  0x37   :  { %221 = vadd.xlane.f32.xlu0 %v155_v15  ;;  %3938 = vmatprep.subr.bf16.mxu1 %v4027_v56  ;;  %v4029_v14 = vld [vmem:[#allocation5 + $0x58] sm:$0xff]   ;;  %v168_v15 = vmul.f32 %v72_v7, %v72_v7  ;;  %v75_v40 = vld [vmem:[#allocation2 + $0x110] sm:$0xff] }
  0x38   :  { %3907 = vmatpush3.bf16.msra.mxu0 %v4024_v45  ;;  %v76_v39 = vld [vmem:[#allocation2 + $0x118] sm:$0xff]  ;;  %v83_v46 = vld [vmem:[#allocation2 + $0x150] sm:$0xff] }
  0x39   :  { %3908 = vmatprep.subr.bf16.mxu0 %v4026_v55  ;;  %v84_v45 = vld [vmem:[#allocation2 + $0x158] sm:$0xff] }
  0x3a   :  { %195 = vadd.xlane.f32.xlu1 %v142_v18  ;;  %3939 = vmatpush3.bf16.msra.mxu1 %v4027_v56  ;;  %v167_v18 = vmul.f32 %v71_v10, %v71_v10 }
  0x3b   :  { %193 = vadd.xlane.f32.xlu0 %v141_v19  ;;  %v74_v19 = vld [vmem:[#allocation2 + $0x108] sm:$0xff]  ;;  %3940 = vmatprep.subr.bf16.mxu1 %v4029_v14 }
  0x3c   :  { %3909 = vmatpush3.bf16.msra.mxu0 %v4026_v55 }
  0x3d   :  { %3910 = vmatprep.subr.bf16.mxu0 %v4028_v11 }
  0x3e   :  { %227 = vadd.xlane.f32.xlu1 %v158_v24  ;;  %v73_v24 = vld [vmem:[#allocation2 + $0x100] sm:$0xff]  ;;  %3941 = vmatpush3.bf16.msra.mxu1 %v4029_v14  ;;  %v87_v14 = vld [vmem:[#allocation2 + $0x170] sm:$0xff] }
  0x3f   :  { %225 = vadd.xlane.f32.xlu0 %v157_v25  ;;  %v4030_v25 = vld [vmem:[#allocation5 + $0x28] sm:$0xff]   ;;  %v169_v32 = vmul.f32 %v73_v24, %v73_v24 }
  0x40   :  { %3911 = vmatpush3.bf16.msra.mxu0 %v4028_v11  ;;  %v88_v11 = vld [vmem:[#allocation2 + $0x178] sm:$0xff]  ;;  %v4033_v24 = vld [vmem:[#allocation5 + $0x68] sm:$0xff]  }
  0x41   :  { %3912 = vmatprep.subr.bf16.mxu0 %v4030_v25 }
  0x42   :  { %199 = vadd.xlane.f32.xlu1 %v144_v28  ;;  %v4031_v28 = vld [vmem:[#allocation5 + $0x60] sm:$0xff]  }
  0x43   :  { %197 = vadd.xlane.f32.xlu0 %v143_v29  ;;  %v170_v29 = vmul.f32 %v74_v19, %v74_v19  ;;  %3942 = vmatprep.subr.bf16.mxu1 %v4031_v28  ;;  %v4032_v19 = vld [vmem:[#allocation5 + $0x30] sm:$0xff]  }
  0x44   :  { %3913 = vmatpush3.bf16.msra.mxu0 %v4030_v25  ;;  %3943 = vmatpush3.bf16.msra.mxu1 %v4031_v28  ;;  %v4034_v25 = vld [vmem:[#allocation5 + $0x38] sm:$0xff]   ;;  %v4035_v28 = vld [vmem:[#allocation5 + $0x70] sm:$0xff]  }
  0x45   :  { %3914 = vmatprep.subr.bf16.mxu0 %v4032_v19  ;;  %3944 = vmatprep.subr.bf16.mxu1 %v4033_v24 }
  0x46   :  { %231 = vadd.xlane.f32.xlu1 %v160_v33  ;;  %v82_v33 = vld [vmem:[#allocation2 + $0x148] sm:$0xff] }
  0x47   :  { %229 = vadd.xlane.f32.xlu0 %v159_v34  ;;  %v81_v34 = vld [vmem:[#allocation2 + $0x140] sm:$0xff] }
  0x48   :  { %3915 = vmatpush3.bf16.msra.mxu0 %v4032_v19  ;;  %3945 = vmatpush3.bf16.msra.mxu1 %v4033_v24 }
  0x49   :  { %3916 = vmatprep.subr.bf16.mxu0 %v4034_v25  ;;  %3946 = vmatprep.subr.bf16.mxu1 %v4035_v28 }
  0x4a   :  { %203 = vadd.xlane.f32.xlu1 %v146_v37  ;;  %v178_v37 = vmul.f32 %v82_v33, %v82_v33 }
  0x4b   :  { %201 = vadd.xlane.f32.xlu0 %v145_v38  ;;  %v177_v38 = vmul.f32 %v81_v34, %v81_v34 }
  0x4c   :  { %3917 = vmatpush3.bf16.msra.mxu0 %v4034_v25  ;;  %3947 = vmatpush3.bf16.msra.mxu1 %v4035_v28 }
  0x4e   :  { %235 = vadd.xlane.f32.xlu1 %v162_v41  ;;  %v172_v41 = vmul.f32 %v76_v39, %v76_v39 }
  0x4f   :  { %233 = vadd.xlane.f32.xlu0 %v161_v42  ;;  %v171_v42 = vmul.f32 %v75_v40, %v75_v40 }
  0x52   :  { %207 = vadd.xlane.f32.xlu1 %v148_v47  ;;  %v180_v47 = vmul.f32 %v84_v45, %v84_v45 }
  0x53   :  { %205 = vadd.xlane.f32.xlu0 %v147_v48  ;;  %v179_v48 = vmul.f32 %v83_v46, %v83_v46 }
  0x56   :  { %239 = vadd.xlane.f32.xlu1 %v164_v51  ;;  %v78_v51 = vld [vmem:[#allocation2 + $0x128] sm:$0xff] }
  0x57   :  { %237 = vadd.xlane.f32.xlu0 %v163_v52  ;;  %v77_v52 = vld [vmem:[#allocation2 + $0x120] sm:$0xff]  ;;  %v174_v55 = vmul.f32 %v78_v51, %v78_v51 }
  0x58   :  { %v173_v56 = vmul.f32 %v77_v52, %v77_v52 }
  0x5a   :  { %211 = vadd.xlane.f32.xlu1 %v150_v57  ;;  %v86_v57 = vld [vmem:[#allocation2 + $0x168] sm:$0xff] }
  0x5b   :  { %209 = vadd.xlane.f32.xlu0 %v149_v58  ;;  %v85_v58 = vld [vmem:[#allocation2 + $0x160] sm:$0xff] }
  0x5e   :  { %243 = vadd.xlane.f32.xlu1 %v166_v61  ;;  %v182_v61 = vmul.f32 %v86_v57, %v86_v57 }
  0x5f   :  { %241 = vadd.xlane.f32.xlu0 %v165_v62  ;;  %v181_v62 = vmul.f32 %v85_v58, %v85_v58 }
  0x62   :  { %215 = vadd.xlane.f32.xlu1 %v152_v4  ;;  %v80_v4 = vld [vmem:[#allocation2 + $0x138] sm:$0xff] }
  0x63   :  { %213 = vadd.xlane.f32.xlu0 %v151_v6  ;;  %v79_v6 = vld [vmem:[#allocation2 + $0x130] sm:$0xff]  ;;  %v176_v7 = vmul.f32 %v80_v4, %v80_v4 }
  0x64   :  { %v175_v10 = vmul.f32 %v79_v6, %v79_v6 }
  0x66   :  { %247 = vadd.xlane.f32.xlu1 %v168_v15  ;;  %v184_v15 = vmul.f32 %v88_v11, %v88_v11 }
  0x67   :  { %245 = vadd.xlane.f32.xlu0 %v167_v18  ;;  %v183_v18 = vmul.f32 %v87_v14, %v87_v14 }
  0x6a   :  { %251 = vadd.xlane.f32.xlu1 %v170_v29  ;;  %v4036_v29 = vld [vmem:[#allocation5 + $0x78] sm:$0xff]  }
  0x6b   :  { %249 = vadd.xlane.f32.xlu0 %v169_v32  ;;  %3948 = vmatprep.subr.bf16.mxu1 %v4036_v29 }
  0x6c   :  { %3949 = vmatpush3.bf16.msra.mxu1 %v4036_v29 }
  0x6e   :  { %267 = vadd.xlane.f32.xlu1 %v178_v37 }
  0x6f   :  { %265 = vadd.xlane.f32.xlu0 %v177_v38 }
  0x72   :  { %255 = vadd.xlane.f32.xlu1 %v172_v41 }
  0x73   :  { %253 = vadd.xlane.f32.xlu0 %v171_v42 }
  0x76   :  { %271 = vadd.xlane.f32.xlu1 %v180_v47 }
  0x77   :  { %269 = vadd.xlane.f32.xlu0 %v179_v48 }
  0x7a   :  { %259 = vadd.xlane.f32.xlu1 %v174_v55 }
  0x7b   :  { %257 = vadd.xlane.f32.xlu0 %v173_v56 }
  0x7e   :  { %275 = vadd.xlane.f32.xlu1 %v182_v61 }
  0x7f   :  { %273 = vadd.xlane.f32.xlu0 %v181_v62 }
  0x82   :  { %263 = vadd.xlane.f32.xlu1 %v176_v7 }
  0x83   :  { %261 = vadd.xlane.f32.xlu0 %v175_v10 }
  0x86   :  { %279 = vadd.xlane.f32.xlu1 %v184_v15 }
  0x87   :  { %277 = vadd.xlane.f32.xlu0 %v183_v18 }
  0xb7   :  { %v5264_v32 = vpop.xlane.xlu1 %217 }
  0xb8   :  { %v5266_v33 = vpop.xlane.xlu0 %185  ;;  %v297_v34 = vmax.f32 %v5264_v32, 1e-10 }
  0xb9   :  { %v281_v37 = vmax.f32 %v5266_v33, 1e-10 }
  0xba   :  { %4045 = vrsqrt.f32 %v297_v34 }
  0xbb   :  { %4047 = vrsqrt.f32 %v281_v37  ;;  %v5270_v38 = vpop.xlane.xlu1 %219 }
  0xbc   :  { %v5272_v39 = vpop.xlane.xlu0 %187  ;;  %v298_v40 = vmax.f32 %v5270_v38, 1e-10 }
  0xbd   :  { %v282_v41 = vmax.f32 %v5272_v39, 1e-10 }
  0xbe   :  { %4049 = vrsqrt.f32 %v298_v40 }
  0xbf   :  { %4051 = vrsqrt.f32 %v282_v41  ;;  %v5276_v42 = vpop.xlane.xlu1 %191 }
  0xc0   :  { %v5278_v45 = vpop.xlane.xlu0 %189  ;;  %v284_v46 = vmax.f32 %v5276_v42, 1e-10 }
  0xc1   :  { %v283_v47 = vmax.f32 %v5278_v45, 1e-10 }
  0xc2   :  { %4053 = vrsqrt.f32 %v284_v46 }
  0xc3   :  { %4055 = vrsqrt.f32 %v283_v47  ;;  %v5282_v48 = vpop.xlane.xlu1 %223 }
  0xc4   :  { %v5284_v51 = vpop.xlane.xlu0 %221  ;;  %v4046_v52 = vpop.eup %4045  ;;  %v300_v55 = vmax.f32 %v5282_v48, 1e-10 }
  0xc5   :  { %v299_v56 = vmax.f32 %v5284_v51, 1e-10  ;;  %v4048_v57 = vpop.eup %4047  ;;  %v393_v58 = vmul.f32 %v4046_v52, %v297_v34 }
  0xc6   :  { %v377_v61 = vmul.f32 %v4048_v57, %v281_v37  ;;  %4057 = vrsqrt.f32 %v300_v55 }
  0xc7   :  { %v3654_v62 = vclamps-f32 %v393_v58, 15.0  ;;  %4059 = vrsqrt.f32 %v299_v56  ;;  %v5288_v4 = vpop.xlane.xlu1 %195 }
  0xc8   :  { %v5290_v6 = vpop.xlane.xlu0 %193  ;;  %v4050_v7 = vpop.eup %4049  ;;  %v3638_v10 = vclamps-f32 %v377_v61, 15.0  ;;  %v286_v11 = vmax.f32 %v5288_v4, 1e-10 }
  0xc9   :  { %v285_v14 = vmax.f32 %v5290_v6, 1e-10  ;;  %v4052_v15 = vpop.eup %4051  ;;  %4061 = vtanh.f32 %v3654_v62  ;;  %v394_v18 = vmul.f32 %v4050_v7, %v298_v40 }
  0xca   :  { %4063 = vtanh.f32 %v3638_v10  ;;  %v378_v19 = vmul.f32 %v4052_v15, %v282_v41 }
  0xcb   :  { %v3655_v24 = vclamps-f32 %v394_v18, 15.0  ;;  %4065 = vrsqrt.f32 %v286_v11  ;;  %v5294_v25 = vpop.xlane.xlu1 %227 }
  0xcc   :  { %v5296_v28 = vpop.xlane.xlu0 %225  ;;  %v5298_v29 = vpop.eup %4053  ;;  %v3639_v34 = vclamps-f32 %v378_v19, 15.0  ;;  %4067 = vrsqrt.f32 %v285_v14  ;;  %v302_v37 = vmax.f32 %v5294_v25, 1e-10 }
  0xcd   :  { %v301_v58 = vmax.f32 %v5296_v28, 1e-10  ;;  %v5302_v61 = vpop.eup %4055  ;;  %4069 = vtanh.f32 %v3655_v24  ;;  %v380_v40 = vmul.f32 %v5298_v29, %v284_v46 }
  0xce   :  { %4071 = vtanh.f32 %v3639_v34  ;;  %v379_v41 = vmul.f32 %v5302_v61, %v283_v47 }
  0xcf   :  { %v3641_v62 = vclamps-f32 %v380_v40, 15.0  ;;  %4073 = vrsqrt.f32 %v302_v37  ;;  %v5306_v10 = vpop.xlane.xlu1 %199 }
  0xd0   :  { %v5308_v18 = vpop.xlane.xlu0 %197  ;;  %v5310_v19 = vpop.eup %4057  ;;  %v3640_v63 = vclamps-f32 %v379_v41, 15.0  ;;  %4075 = vrsqrt.f32 %v301_v58  ;;  %v288_v3 = vmax.f32 %v5306_v10, 1e-10 }
  0xd1   :  { %v287_v59 = vmax.f32 %v5308_v18, 1e-10  ;;  %v5314_v24 = vpop.eup %4059  ;;  %4077 = vtanh.f32 %v3641_v62  ;;  %v396_v46 = vmul.f32 %v5310_v19, %v300_v55 }
  0xd2   :  { %4079 = vtanh.f32 %v3640_v63  ;;  %v395_v47 = vmul.f32 %v5314_v24, %v299_v56 }
  0xd3   :  { %v4062_v34 = vpop.eup %4061  ;;  %v3657_v40 = vclamps-f32 %v396_v46, 15.0  ;;  %4081 = vrsqrt.f32 %v288_v3  ;;  %v5318_v60 = vpop.xlane.xlu1 %231 }
  0xd4   :  { %v5320_v53 = vpop.xlane.xlu0 %229  ;;  %v4064_v41 = vpop.eup %4063  ;;  %v5322_v54 = vmul.f32 %v4062_v34, %v4046_v52  ;;  %v3656_v50 = vclamps-f32 %v395_v47, 15.0  ;;  %4083 = vrsqrt.f32 %v287_v59  ;;  %v304_v49 = vmax.f32 %v5318_v60, 1e-10 }
  0xd5   :  { %v5325_v62 = vpop.eup %4065  ;;  %v5327_v55 = vmul.f32 %v4064_v41, %v4048_v57  ;;  %4085 = vtanh.f32 %v3657_v40  ;;  %v303_v63 = vmax.f32 %v5320_v53, 1e-10 }
  0xd6   :  { %v5330_v56 = vpop.eup %4067  ;;  %v705_v46 = vmul.f32 %v5322_v54, %v5322_v54  ;;  %4087 = vtanh.f32 %v3656_v50  ;;  %v382_v52 = vmul.f32 %v5325_v62, %v286_v11 }
  0xd7   :  { %v4070_v34 = vpop.eup %4069  ;;  %v689_v47 = vmul.f32 %v5327_v55, %v5327_v55  ;;  %v381_v43 = vmul.f32 %v5330_v56, %v285_v14  ;;  %4089 = vrsqrt.f32 %v304_v49 }
  0xd8   :  { %v4072_v57 = vpop.eup %4071  ;;  %v5339_v40 = vmul.f32 %v705_v46, %v5264_v32  ;;  %v5341_v41 = vmul.f32 %v4070_v34, %v4050_v7  ;;  %v3643_v44 = vclamps-f32 %v382_v52, 15.0  ;;  %4091 = vrsqrt.f32 %v303_v63 }
  0xd9   :  { %v4074_v35 = vpop.eup %4073  ;;  %v5344_v50 = vmul.f32 %v689_v47, %v5266_v33  ;;  %v5346_v11 = vmul.f32 %v4072_v57, %v4052_v15  ;;  %v3642_v36 = vclamps-f32 %v381_v43, 15.0 }
  0xda   :  { %v4076_v31 = vpop.eup %4075  ;;  %v706_v14 = vmul.f32 %v5341_v41, %v5341_v41  ;;  %4093 = vtanh.f32 %v3643_v44  ;;  %v398_v30 = vmul.f32 %v4074_v35, %v302_v37 }
  0xdb   :  { %v4078_v26 = vpop.eup %4077  ;;  %v690_v32 = vmul.f32 %v5346_v11, %v5346_v11  ;;  %4095 = vtanh.f32 %v3642_v36  ;;  %v397_v7 = vmul.f32 %v4076_v31, %v301_v58 }
  0xdc   :  { %v4080_v46 = vpop.eup %4079  ;;  %v5353_v52 = vmul.f32 %v706_v14, %v5270_v38  ;;  %v5356_v33 = vmul.f32 %v4078_v26, %v5298_v29  ;;  %v3659_v43 = vclamps-f32 %v398_v30, 15.0 }
  0xdd   :  { %v4082_v15 = vpop.eup %4081  ;;  %v5359_v34 = vmul.f32 %v690_v32, %v5272_v39  ;;  %v5362_v44 = vmul.f32 %v4080_v46, %v5302_v61  ;;  %v3658_v37 = vclamps-f32 %v397_v7, 15.0 }
  0xde   :  { %v4084_v47 = vpop.eup %4083  ;;  %v692_v36 = vmul.f32 %v5356_v33, %v5356_v33  ;;  %4097 = vtanh.f32 %v3659_v43  ;;  %v384_v58 = vmul.f32 %v4082_v15, %v288_v3 }
  0xdf   :  { %v4086_v38 = vpop.eup %4085  ;;  %v691_v26 = vmul.f32 %v5362_v44, %v5362_v44  ;;  %4099 = vtanh.f32 %v3658_v37  ;;  %v383_v30 = vmul.f32 %v4084_v47, %v287_v59 }
  0xe0   :  { %v4088_v29 = vpop.eup %4087  ;;  %v5369_v39 = vmul.f32 %v692_v36, %v5276_v42  ;;  %v5372_v61 = vmul.f32 %v4086_v38, %v5310_v19  ;;  %v3645_v57 = vclamps-f32 %v384_v58, 15.0 }
  0xe1   :  { %v4090_v14 = vpop.eup %4089  ;;  %v5375_v32 = vmul.f32 %v691_v26, %v5278_v45  ;;  %v5378_v3 = vmul.f32 %v4088_v29, %v5314_v24  ;;  %v3644_v7 = vclamps-f32 %v383_v30, 15.0 }
  0xe2   :  { %v4092_v46 = vpop.eup %4091  ;;  %v708_v59 = vmul.f32 %v5372_v61, %v5372_v61  ;;  %4101 = vtanh.f32 %v3645_v57  ;;  %v400_v43 = vmul.f32 %v4090_v14, %v304_v49 }
  0xe3   :  { %v707_v42 = vmul.f32 %v5378_v3, %v5378_v3  ;;  %4103 = vtanh.f32 %v3644_v7  ;;  %v399_v19 = vmul.f32 %v4092_v46, %v303_v63 }
  0xe4   :  { %v4094_v37 = vpop.eup %4093  ;;  %v5385_v36 = vmul.f32 %v708_v59, %v5282_v48  ;;  %v3661_v45 = vclamps-f32 %v400_v43, 15.0 }
  0xe5   :  { %v4096_v58 = vpop.eup %4095  ;;  %v5388_v24 = vmul.f32 %v707_v42, %v5284_v51  ;;  %v5391_v38 = vmul.f32 %v4094_v37, %v5325_v62  ;;  %v3660_v26 = vclamps-f32 %v399_v19, 15.0 }
  0xe6   :  { %v573_v49 = vmul.f32 %v4096_v58, %v5330_v56  ;;  %4105 = vtanh.f32 %v3661_v45 }
  0xe7   :  { %v694_v30 = vmul.f32 %v5391_v38, %v5391_v38  ;;  %4107 = vtanh.f32 %v3660_v26 }
  0xe8   :  { %v4098_v29 = vpop.eup %4097  ;;  %v693_v63 = vmul.f32 %v573_v49, %v573_v49 }
  0xe9   :  { %v4100_v57 = vpop.eup %4099  ;;  %v5397_v48 = vmul.f32 %v694_v30, %v5288_v4  ;;  %v5399_v7 = vmul.f32 %v4098_v29, %v4074_v35  ;;  %v4037_v35 = vld [vmem:[#allocation5 + $0x80] sm:$0xff]  }
  0xea   :  { %v5402_v51 = vmul.f32 %v693_v63, %v5290_v6  ;;  %v5404_v62 = vmul.f32 %v4100_v57, %v4076_v31  ;;  %3966 = vmatprep.subr.bf16.mxu0 %v4037_v35  ;;  %3998 = vmatprep.subr.bf16.mxu1 %v4037_v35  ;;  %v5438_v63 = vpop.xlane.xlu1 %203 }
  0xeb   :  { %v710_v43 = vmul.f32 %v5399_v7, %v5399_v7 }
  0xec   :  { %v4102_v59 = vpop.eup %4101  ;;  %v709_v42 = vmul.f32 %v5404_v62, %v5404_v62 }
  0xed   :  { %v4104_v56 = vpop.eup %4103  ;;  %v5410_v19 = vmul.f32 %v4102_v59, %v4082_v15  ;;  %v5415_v37 = vmul.f32 %v710_v43, %v5294_v25  ;;  %v5451_v59 = vpop.xlane.xlu0 %201  ;;  %v633_v43 = vmul.f32 %v5322_v54, %v5144_v0  ;;  %v636_v54 = vmul.f32 %v5372_v61, %v5168_v12 }
  0xee   :  { %v5412_v4 = vmul.f32 %v4104_v56, %v4084_v47  ;;  %v5418_v6 = vmul.f32 %v709_v42, %v5296_v28  ;;  %v4038_v42 = vld [vmem:[#allocation5 + $0x88] sm:$0xff]   ;;  %v289_v0 = vmax.f32 %v5451_v59, 1e-10 }
  0xef   :  { %v696_v45 = vmul.f32 %v5410_v19, %v5410_v19 }
  0xf0   :  { %v4106_v31 = vpop.eup %4105  ;;  %v695_v58 = vmul.f32 %v5412_v4, %v5412_v4 }
  0xf1   :  { %v4108_v15 = vpop.eup %4107  ;;  %v5425_v47 = vmul.f32 %v696_v45, %v5306_v10  ;;  %v5430_v25 = vmul.f32 %v4106_v31, %v4090_v14  ;;  %v290_v14 = vmax.f32 %v5438_v63, 1e-10  ;;  %v5463_v31 = vpop.xlane.xlu0 %233  ;;  %v622_v45 = vmul.f32 %v5391_v38, %v5176_v16 }
  0xf2   :  { %v5428_v26 = vmul.f32 %v695_v58, %v5308_v18  ;;  %v5432_v28 = vmul.f32 %v4108_v15, %v4092_v46  ;;  %v618_v18 = vmul.f32 %v5346_v11, %v5154_v5  ;;  %v617_v46 = vmul.f32 %v5327_v55, %v5146_v1  ;;  %v5461_v1 = vpop.xlane.xlu1 %235 }
  0xf3   :  { %v712_v30 = vmul.f32 %v5430_v25, %v5430_v25  ;;  %4109 = vrsqrt.f32 %v290_v14  ;;  %v619_v5 = vmul.f32 %v5362_v44, %v5162_v9  ;;  %v620_v11 = vmul.f32 %v5356_v33, %v5160_v8  ;;  %v4039_v9 = vld [vmem:[#allocation5 + $0x90] sm:$0xff]  }
  0xf4   :  { %v711_v29 = vmul.f32 %v5432_v28, %v5432_v28  ;;  %v665_v56 = vpack.c.bf16 %v618_v18, %v617_v46  ;;  %v621_v44 = vmul.f32 %v573_v49, %v5178_v17  ;;  %4111 = vrsqrt.f32 %v289_v0 }
  0xf5   :  { %v5441_v57 = vmul.f32 %v712_v30, %v5318_v60  ;;  %v634_v60 = vmul.f32 %v5341_v41, %v5148_v2  ;;  %v666_v55 = vpack.c.bf16 %v620_v11, %v619_v5  ;;  %v635_v2 = vmul.f32 %v5378_v3, %v5170_v13  ;;  %v5478_v13 = vpop.xlane.xlu0 %205  ;;  %v4040_v3 = vld [vmem:[#allocation5 + $0x98] sm:$0xff]  }
  0xf6   :  { %v5444_v10 = vmul.f32 %v711_v29, %v5320_v53  ;;  %3918 = vmatprep.mubr.bf16.mxu0 %v665_v56  ;;  %v5472_v33 = vpop.xlane.xlu1 %207  ;;  %v306_v58 = vmax.f32 %v5461_v1, 1e-10  ;;  %v305_v12 = vmax.f32 %v5463_v31, 1e-10  ;;  %v667_v61 = vpack.c.bf16 %v622_v45, %v621_v44 }
  0xf7   :  { %v673_v53 = vpack.c.bf16 %v634_v60, %v633_v43  ;;  %3919 = vmatmul.mubr.bf16.vlgmr.msra.gmra.mrb[0].mxu0 %v666_v55  ;;  %v674_v8 = vpack.c.bf16 %v636_v54, %v635_v2  ;;  %v292_v17 = vmax.f32 %v5472_v33, 1e-10  ;;  %v637_v16 = vmul.f32 %v5404_v62, %v5186_v21 }
  0xf8   :  { %3967 = vmatpush3.bf16.msra.mxu0 %v4037_v35  ;;  %v291_v38 = vmax.f32 %v5478_v13, 1e-10  ;;  %3922 = vmatprep.mubr.bf16.mxu0 %v667_v61  ;;  %v638_v49 = vmul.f32 %v5399_v7, %v5184_v20  ;;  %4113 = vrsqrt.f32 %v306_v58  ;;  %v623_v30 = vmul.f32 %v5412_v4, %v5190_v23 }
  0xf9   :  { %3950 = vmatprep.mubr.bf16.mxu1 %v673_v53  ;;  %3968 = vmatprep.subr.bf16.mxu0 %v4038_v42  ;;  %4115 = vrsqrt.f32 %v305_v12  ;;  %v624_v21 = vmul.f32 %v5410_v19, %v5188_v22  ;;  %v5495_v23 = vpop.xlane.xlu0 %237  ;;  %v639_v22 = vmul.f32 %v5432_v28, %v5198_v27  ;;  %v9456_v19 = vld [vmem:[#allocation11_spill] sm:$0xff] }
  0xfa   :  { %3951 = vmatmul.mubr.bf16.vlgmr.msra.gmra.mrb[0].mxu1 %v674_v8  ;;  %4117 = vrsqrt.f32 %v292_v17  ;;  %v5492_v62 = vpop.xlane.xlu1 %239  ;;  %v307_v56 = vmax.f32 %v5495_v23, 1e-10  ;;  %v4041_v53 = vld [vmem:[#allocation5 + $0xa0] sm:$0xff]  }
  0xfb   :  { %4006 = vmatpush3.bf16.msra.mxu1 %v4037_v35  ;;  %v675_v35 = vpack.c.bf16 %v638_v49, %v637_v16  ;;  %4119 = vrsqrt.f32 %v291_v38  ;;  %v668_v20 = vpack.c.bf16 %v624_v21, %v623_v30  ;;  %v308_v18 = vmax.f32 %v5492_v62, 1e-10  ;;  %v9460_v21 = vld [vmem:[#allocation12_spill] sm:$0xff] }
  0xfc   :  { %3969 = vmatpush3.bf16.msra.mxu0 %v4038_v42  ;;  %3999 = vmatprep.subr.bf16.mxu1 %v4038_v42 }
  0xfd   :  { %v5470_v41 = vpop.eup %4109  ;;  %3970 = vmatprep.subr.bf16.mxu0 %v4039_v9  ;;  %3954 = vmatprep.mubr.bf16.mxu1 %v675_v35  ;;  %v5502_v28 = vpop.xlane.xlu0 %209 }
  0xfe   :  { %v386_v15 = vmul.f32 %v5470_v41, %v290_v14  ;;  %v4112_v7 = vpop.eup %4111  ;;  %v640_v14 = vmul.f32 %v5430_v25, %v9456_v19  ;;  %9457 = vst [vmem:[#allocation11_spill] sm:$0xff] %v5502_v28 }
  0xff   :  { %4007 = vmatpush3.bf16.msra.mxu1 %v4038_v42  ;;  %v385_v4 = vmul.f32 %v4112_v7, %v289_v0  ;;  %3923 = vmatmul.mubr.bf16.gmra.mrb[4].mxu0 %v668_v20 }
 0x100   :  { %3971 = vmatpush3.bf16.msra.mxu0 %v4039_v9  ;;  %v3647_v29 = vclamps-f32 %v386_v15, 15.0  ;;  %4000 = vmatprep.subr.bf16.mxu1 %v4039_v9  ;;  %v676_v60 = vpack.c.bf16 %v640_v14, %v639_v22  ;;  %v9461_v22 = vld [vmem:[#allocation13_spill] sm:$0xff] }
 0x101   :  { %3972 = vmatprep.subr.bf16.mxu0 %v4040_v3  ;;  %v3646_v46 = vclamps-f32 %v385_v4, 15.0  ;;  %v5510_v61 = vpop.xlane.xlu0 %241 }
 0x102   :  { %4121 = vtanh.f32 %v3647_v29  ;;  %v4114_v43 = vpop.eup %4113  ;;  %3955 = vmatmul.mubr.bf16.gmra.mrb[4].mxu1 %v676_v60  ;;  %9458 = vst [vmem:[#allocation26_spill] sm:$0xff] %v5510_v61  ;;  %v309_v35 = vmax.f32 %v5510_v61, 1e-10 }
 0x103   :  { %4008 = vmatpush3.bf16.msra.mxu1 %v4039_v9  ;;  %4123 = vrsqrt.f32 %v308_v18  ;;  %v4116_v5 = vpop.eup %4115  ;;  %v402_v11 = vmul.f32 %v4114_v43, %v306_v58  ;;  %v5504_v9 = vpop.xlane.xlu1 %211 }
 0x104   :  { %3973 = vmatpush3.bf16.msra.mxu0 %v4040_v3  ;;  %4001 = vmatprep.subr.bf16.mxu1 %v4040_v3  ;;  %4125 = vtanh.f32 %v3646_v46  ;;  %v4118_v55 = vpop.eup %4117  ;;  %v401_v42 = vmul.f32 %v4116_v5, %v305_v12  ;;  %v293_v12 = vmax.f32 %v5502_v28, 1e-10  ;;  %v294_v15 = vmax.f32 %v5504_v9, 1e-10  ;;  %v5010_v28 = vld [vmem:[#allocation2 + $0x140] sm:$0xff] }
 0x105   :  { %3974 = vmatprep.subr.bf16.mxu0 %v4041_v53  ;;  %v4120_v0 = vpop.eup %4119  ;;  %v388_v27 = vmul.f32 %v4118_v55, %v292_v17  ;;  %4127 = vrsqrt.f32 %v307_v56  ;;  %v3663_v25 = vclamps-f32 %v402_v11, 15.0 }
 0x106   :  { %v3662_v2 = vclamps-f32 %v401_v42, 15.0  ;;  %v387_v54 = vmul.f32 %v4120_v0, %v291_v38 }
 0x107   :  { %4009 = vmatpush3.bf16.msra.mxu1 %v4040_v3  ;;  %v3649_v45 = vclamps-f32 %v388_v27, 15.0  ;;  %v5513_v17 = vpop.xlane.xlu1 %243 }
 0x108   :  { %3975 = vmatpush3.bf16.msra.mxu0 %v4041_v53  ;;  %4002 = vmatprep.subr.bf16.mxu1 %v4041_v53  ;;  %v3648_v44 = vclamps-f32 %v387_v54, 15.0  ;;  %4129 = vtanh.f32 %v3662_v2  ;;  %9459 = vst [vmem:[#allocation27_spill] sm:$0xff] %v5513_v17  ;;  %v310_v29 = vmax.f32 %v5513_v17, 1e-10 }
 0x109   :  { %4131 = vtanh.f32 %v3663_v25 }
 0x10a   :  { %4133 = vtanh.f32 %v3648_v44 }
 0x10b   :  { %4010 = vmatpush3.bf16.msra.mxu1 %v4041_v53  ;;  %4135 = vtanh.f32 %v3649_v45  ;;  %v5525_v53 = vpop.xlane.xlu0 %213 }
 0x10c   :  { %v4122_v8 = vpop.eup %4121  ;;  %4137 = vrsqrt.f32 %v293_v12  ;;  %9463 = vst [vmem:[#allocation13_spill] sm:$0xff] %v5525_v53  ;;  %v295_v2 = vmax.f32 %v5525_v53, 1e-10 }
 0x10d   :  { %v5507_v58 = vmul.f32 %v4122_v8, %v5470_v41  ;;  %v4124_v3 = vpop.eup %4123  ;;  %4139 = vrsqrt.f32 %v294_v15 }
 0x10e   :  { %v4126_v16 = vpop.eup %4125  ;;  %v404_v38 = vmul.f32 %v4124_v3, %v308_v18 }
 0x10f   :  { %v5515_v49 = vmul.f32 %v4126_v16, %v4112_v7  ;;  %v4128_v30 = vpop.eup %4127  ;;  %v626_v20 = vmul.f32 %v5507_v58, %v9460_v21  ;;  %v5523_v7 = vpop.xlane.xlu1 %215  ;;  %v9464_v16 = vld [vmem:[#allocation15_spill] sm:$0xff]  ;;  %v9465_v21 = vld [vmem:[#allocation14_spill] sm:$0xff] }
 0x110   :  { %v3665_v41 = vclamps-f32 %v404_v38, 15.0  ;;  %v403_v4 = vmul.f32 %v4128_v30, %v307_v56  ;;  %9462 = vst [vmem:[#allocation12_spill] sm:$0xff] %v5523_v7  ;;  %v296_v42 = vmax.f32 %v5523_v7, 1e-10  ;;  %v9469_v7 = vld [vmem:[#allocation18_spill] sm:$0xff] }
 0x111   :  { %v625_v19 = vmul.f32 %v5515_v49, %v9461_v22 }
 0x112   :  { %4141 = vtanh.f32 %v3665_v41  ;;  %v3664_v14 = vclamps-f32 %v403_v4, 15.0  ;;  %v4130_v18 = vpop.eup %4129  ;;  %v4042_v41 = vld [vmem:[#allocation5 + $0xa8] sm:$0xff]  }
 0x113   :  { %4143 = vrsqrt.f32 %v309_v35  ;;  %v669_v46 = vpack.c.bf16 %v626_v20, %v625_v19  ;;  %v4132_v60 = vpop.eup %4131  ;;  %v5528_v56 = vmul.f32 %v4130_v18, %v4116_v5  ;;  %v5550_v22 = vpop.xlane.xlu1 %247  ;;  %v9467_v19 = vld [vmem:[#allocation17_spill] sm:$0xff]  ;;  %3976 = vmatprep.subr.bf16.mxu0 %v4042_v41  ;;  %4003 = vmatprep.subr.bf16.mxu1 %v4042_v41 }
 0x114   :  { %4145 = vrsqrt.f32 %v310_v29  ;;  %v4134_v11 = vpop.eup %4133  ;;  %v5530_v25 = vmul.f32 %v4132_v60, %v4114_v43  ;;  %9466 = vst [vmem:[#allocation15_spill] sm:$0xff] %v5550_v22  ;;  %3977 = vmatpush3.bf16.msra.mxu0 %v4042_v41  ;;  %4011 = vmatpush3.bf16.msra.mxu1 %v4042_v41  ;;  %v9470_v41 = vld [vmem:[#allocation19_spill] sm:$0xff] }
 0x115   :  { %4147 = vtanh.f32 %v3664_v14  ;;  %3926 = vmatprep.mubr.bf16.mxu0 %v669_v46  ;;  %v4136_v27 = vpop.eup %4135  ;;  %v5533_v54 = vmul.f32 %v4134_v11, %v4120_v0  ;;  %v641_v38 = vmul.f32 %v5528_v56, %v9464_v16 }
 0x116   :  { %v5535_v8 = vpop.eup %4137  ;;  %4149 = vrsqrt.f32 %v296_v42  ;;  %v5539_v45 = vmul.f32 %v4136_v27, %v4118_v55  ;;  %v642_v43 = vmul.f32 %v5530_v25, %v9465_v21 }
 0x117   :  { %v5537_v44 = vpop.eup %4139  ;;  %4151 = vrsqrt.f32 %v295_v2  ;;  %v389_v4 = vmul.f32 %v5535_v8, %v293_v12  ;;  %v627_v55 = vmul.f32 %v5533_v54, %v9467_v19  ;;  %v4043_v12 = vld [vmem:[#allocation5 + $0xb0] sm:$0xff]  }
 0x118   :  { %v390_v18 = vmul.f32 %v5537_v44, %v294_v15  ;;  %v677_v46 = vpack.c.bf16 %v642_v43, %v641_v38  ;;  %3978 = vmatprep.subr.bf16.mxu0 %v4043_v12  ;;  %4004 = vmatprep.subr.bf16.mxu1 %v4043_v12 }
 0x119   :  { %v3650_v21 = vclamps-f32 %v389_v4, 15.0  ;;  %3979 = vmatpush3.bf16.msra.mxu0 %v4043_v12  ;;  %4012 = vmatpush3.bf16.msra.mxu1 %v4043_v12 }
 0x11a   :  { %3958 = vmatprep.mubr.bf16.mxu1 %v677_v46  ;;  %v3651_v38 = vclamps-f32 %v390_v18, 15.0 }
 0x11c   :  { %v4142_v5 = vpop.eup %4141 }
 0x11d   :  { %v5545_v20 = vpop.eup %4143  ;;  %v5547_v0 = vmul.f32 %v4142_v5, %v4124_v3  ;;  %v9468_v3 = vld [vmem:[#allocation16_spill] sm:$0xff]  ;;  %v312_v5 = vmax.f32 %v5550_v22, 1e-10 }
 0x11e   :  { %v4146_v14 = vpop.eup %4145  ;;  %v405_v11 = vmul.f32 %v5545_v20, %v309_v35  ;;  %v628_v27 = vmul.f32 %v5539_v45, %v9468_v3 }
 0x11f   :  { %v4148_v60 = vpop.eup %4147  ;;  %v406_v19 = vmul.f32 %v4146_v14, %v310_v29  ;;  %v644_v15 = vmul.f32 %v5547_v0, %v9469_v7  ;;  %4153 = vrsqrt.f32 %v312_v5 }
 0x120   :  { %v5558_v16 = vmul.f32 %v4148_v60, %v4128_v30  ;;  %v670_v53 = vpack.c.bf16 %v628_v27, %v627_v55  ;;  %v3666_v43 = vclamps-f32 %v405_v11, 15.0  ;;  %v5565_v30 = vpop.xlane.xlu0 %245  ;;  %v4044_v60 = vld [vmem:[#allocation5 + $0xb8] sm:$0xff]   ;;  %v4150_v46 = vpop.eup %4149  ;;  %4155 = vtanh.f32 %v3650_v21 }
 0x121   :  { %9471 = vst [vmem:[#allocation14_spill] sm:$0xff] %v5565_v30  ;;  %v3667_v29 = vclamps-f32 %v406_v19, 15.0  ;;  %3980 = vmatprep.subr.bf16.mxu0 %v4044_v60  ;;  %4005 = vmatprep.subr.bf16.mxu1 %v4044_v60  ;;  %v4152_v7 = vpop.eup %4151  ;;  %4157 = vtanh.f32 %v3651_v38  ;;  %v311_v55 = vmax.f32 %v5565_v30, 1e-10  ;;  %v392_v18 = vmul.f32 %v4150_v46, %v296_v42 }
 0x122   :  { %v643_v35 = vmul.f32 %v5558_v16, %v9470_v41  ;;  %3927 = vmatmul.mubr.bf16.gmra.mrb[8].mxu0 %v670_v53  ;;  %4013 = vmatpush3.bf16.msra.mxu1 %v4044_v60  ;;  %4159 = vtanh.f32 %v3666_v43  ;;  %v391_v11 = vmul.f32 %v4152_v7, %v295_v2 }
 0x123   :  { %3981 = vmatpush3.bf16.msra.mxu0 %v4044_v60  ;;  %4161 = vtanh.f32 %v3667_v29  ;;  %v3653_v53 = vclamps-f32 %v392_v18, 15.0  ;;  %v9474_v29 = vld [vmem:[#allocation21_spill] sm:$0xff] }
 0x124   :  { %v678_v4 = vpack.c.bf16 %v644_v15, %v643_v35  ;;  %4163 = vrsqrt.f32 %v311_v55  ;;  %v3652_v3 = vclamps-f32 %v391_v11, 15.0  ;;  %v9475_v11 = vld [vmem:[#allocation20_spill] sm:$0xff] }
 0x125   :  { %4165 = vtanh.f32 %v3653_v53 }
 0x126   :  { %3959 = vmatmul.mubr.bf16.gmra.mrb[8].mxu1 %v678_v4  ;;  %4167 = vtanh.f32 %v3652_v3 }
 0x129   :  { %v4154_v27 = vpop.eup %4153 }
 0x12a   :  { %v4156_v12 = vpop.eup %4155  ;;  %v408_v15 = vmul.f32 %v4154_v27, %v312_v5 }
 0x12b   :  { %v4158_v21 = vpop.eup %4157  ;;  %v5569_v38 = vmul.f32 %v4156_v12, %v5535_v8  ;;  %v9476_v8 = vld [vmem:[#allocation23_spill] sm:$0xff] }
 0x12c   :  { %v4160_v19 = vpop.eup %4159  ;;  %v5572_v35 = vmul.f32 %v4158_v21, %v5537_v44  ;;  %v3669_v43 = vclamps-f32 %v408_v15, 15.0  ;;  %v5585_v44 = vpop.xlane.xlu1 %251 }
 0x12d   :  { %v4162_v41 = vpop.eup %4161  ;;  %v5575_v2 = vmul.f32 %v4160_v19, %v5545_v20  ;;  %v629_v4 = vmul.f32 %v5569_v38, %v9474_v29  ;;  %9477 = vst [vmem:[#allocation18_spill] sm:$0xff] %v5585_v44  ;;  %v9478_v20 = vld [vmem:[#allocation22_spill] sm:$0xff] }
 0x12e   :  { %v4164_v42 = vpop.eup %4163  ;;  %v5577_v60 = vmul.f32 %v4162_v41, %v4146_v14  ;;  %v630_v5 = vmul.f32 %v5572_v35, %v9475_v11  ;;  %4169 = vtanh.f32 %v3669_v43  ;;  %v314_v41 = vmax.f32 %v5585_v44, 1e-10  ;;  %v5594_v43 = vpop.xlane.xlu0 %249  ;;  %v9482_v11 = vld [vmem:[#allocation25_spill] sm:$0xff] }
 0x12f   :  { %9472 = vst [vmem:[#allocation17_spill] sm:$0xff] %v5575_v2  ;;  %v407_v18 = vmul.f32 %v4164_v42, %v311_v55  ;;  %v645_v53 = vmul.f32 %v5575_v2, %v9476_v8  ;;  %v4166_v3 = vpop.eup %4165  ;;  %9481 = vst [vmem:[#allocation20_spill] sm:$0xff] %v5594_v43 }
 0x130   :  { %9473 = vst [vmem:[#allocation16_spill] sm:$0xff] %v5577_v60  ;;  %v671_v12 = vpack.c.bf16 %v630_v5, %v629_v4  ;;  %v646_v21 = vmul.f32 %v5577_v60, %v9478_v20  ;;  %v4168_v14 = vpop.eup %4167  ;;  %v5589_v15 = vmul.f32 %v4166_v3, %v4150_v46  ;;  %v9483_v5 = vld [vmem:[#allocation24_spill] sm:$0xff] }
 0x131   :  { %v3668_v19 = vclamps-f32 %v407_v18, 15.0  ;;  %v5591_v55 = vmul.f32 %v4168_v14, %v4152_v7  ;;  %v5600_v18 = vpop.xlane.xlu1 %267  ;;  %v313_v7 = vmax.f32 %v5594_v43, 1e-10 }
 0x132   :  { %3930 = vmatprep.mubr.bf16.mxu0 %v671_v12  ;;  %9479 = vst [vmem:[#allocation19_spill] sm:$0xff] %v5589_v15  ;;  %v679_v29 = vpack.c.bf16 %v646_v21, %v645_v53  ;;  %v632_v8 = vmul.f32 %v5589_v15, %v9483_v5  ;;  %9484 = vst [vmem:[#allocation23_spill] sm:$0xff] %v5600_v18  ;;  %v5605_v53 = vpop.xlane.xlu0 %265  ;;  %v322_v21 = vmax.f32 %v5600_v18, 1e-10  ;;  %v5005_v5 = vld [vmem:[#allocation2 + $0xf8] sm:$0xff] }
 0x133   :  { %9480 = vst [vmem:[#allocation21_spill] sm:$0xff] %v5591_v55  ;;  %4171 = vtanh.f32 %v3668_v19  ;;  %v631_v4 = vmul.f32 %v5591_v55, %v9482_v11  ;;  %9486 = vst [vmem:[#allocation25_spill] sm:$0xff] %v5605_v53  ;;  %v321_v19 = vmax.f32 %v5605_v53, 1e-10 }
 0x134   :  { %3962 = vmatprep.mubr.bf16.mxu1 %v679_v29  ;;  %4173 = vrsqrt.f32 %v314_v41 }
 0x135   :  { %v672_v3 = vpack.c.bf16 %v632_v8, %v631_v4  ;;  %v5607_v20 = vpop.xlane.xlu1 %255  ;;  %4175 = vrsqrt.f32 %v313_v7 }
 0x136   :  { %9487 = vst [vmem:[#allocation24_spill] sm:$0xff] %v5607_v20  ;;  %v316_v4 = vmax.f32 %v5607_v20, 1e-10  ;;  %4177 = vrsqrt.f32 %v322_v21  ;;  %v5616_v43 = vpop.xlane.xlu0 %253 }
 0x137   :  { %3931 = vmatmul.mubr.bf16.gmra.mrb[12].mxu0 %v672_v3  ;;  %4179 = vrsqrt.f32 %v321_v19  ;;  %9489 = vst [vmem:[#allocation29_spill] sm:$0xff] %v5616_v43 }
 0x138   :  { %v4170_v46 = vpop.eup %4169  ;;  %4181 = vrsqrt.f32 %v316_v4 }
 0x139   :  { %v5603_v12 = vmul.f32 %v4170_v46, %v4154_v27  ;;  %v5006_v46 = vld [vmem:[#allocation2 + $0xf0] sm:$0xff]  ;;  %v5619_v53 = vpop.xlane.xlu1 %271 }
 0x13a   :  { %9490 = vst [vmem:[#allocation30_spill] sm:$0xff] %v5619_v53  ;;  %v5621_v30 = vpop.xlane.xlu0 %269 }
 0x13b   :  { %9485 = vst [vmem:[#allocation22_spill] sm:$0xff] %v5603_v12  ;;  %v648_v27 = vmul.f32 %v5005_v5, %v5603_v12  ;;  %9491 = vst [vmem:[#allocation31_spill] sm:$0xff] %v5621_v30 }
 0x13d   :  { %v4172_v14 = vpop.eup %4171 }
 0x13e   :  { %v4174_v29 = vpop.eup %4173  ;;  %v5611_v11 = vmul.f32 %v4172_v14, %v4164_v42  ;;  %v315_v42 = vmax.f32 %v5616_v43, 1e-10  ;;  %v5627_v43 = vpop.xlane.xlu0 %257 }
 0x13f   :  { %v410_v8 = vmul.f32 %v4174_v29, %v314_v41  ;;  %v4176_v14 = vpop.eup %4175  ;;  %9493 = vst [vmem:[#allocation33_spill] sm:$0xff] %v5627_v43 }
 0x140   :  { %9488 = vst [vmem:[#allocation28_spill] sm:$0xff] %v5611_v11  ;;  %v647_v3 = vmul.f32 %v5006_v46, %v5611_v11  ;;  %v409_v20 = vmul.f32 %v4176_v14, %v313_v7  ;;  %v4178_v5 = vpop.eup %4177  ;;  %v323_v7 = vmax.f32 %v5621_v30, 1e-10 }
 0x141   :  { %v3671_v44 = vclamps-f32 %v410_v8, 15.0  ;;  %v4180_v46 = vpop.eup %4179  ;;  %v418_v22 = vmul.f32 %v4178_v5, %v322_v21  ;;  %v324_v8 = vmax.f32 %v5619_v53, 1e-10 }
 0x142   :  { %v680_v18 = vpack.c.bf16 %v648_v27, %v647_v3  ;;  %v3670_v41 = vclamps-f32 %v409_v20, 15.0  ;;  %v4182_v11 = vpop.eup %4181  ;;  %v417_v27 = vmul.f32 %v4180_v46, %v321_v19 }
 0x143   :  { %4183 = vtanh.f32 %v3671_v44  ;;  %v3679_v3 = vclamps-f32 %v418_v22, 15.0  ;;  %v412_v12 = vmul.f32 %v4182_v11, %v316_v4  ;;  %v5624_v44 = vpop.xlane.xlu1 %259  ;;  %v317_v22 = vmax.f32 %v5627_v43, 1e-10  ;;  %v5007_v43 = vld [vmem:[#allocation2 + $0x108] sm:$0xff] }
 0x144   :  { %3963 = vmatmul.mubr.bf16.gmra.mrb[12].mxu1 %v680_v18  ;;  %4185 = vrsqrt.f32 %v315_v42  ;;  %v3678_v18 = vclamps-f32 %v417_v27, 15.0  ;;  %9492 = vst [vmem:[#allocation32_spill] sm:$0xff] %v5624_v44  ;;  %v318_v21 = vmax.f32 %v5624_v44, 1e-10 }
 0x145   :  { %4187 = vtanh.f32 %v3670_v41  ;;  %v3673_v20 = vclamps-f32 %v412_v12, 15.0 }
 0x146   :  { %4189 = vtanh.f32 %v3679_v3  ;;  %v5635_v3 = vpop.xlane.xlu0 %273 }
 0x147   :  { %4191 = vtanh.f32 %v3678_v18  ;;  %v5633_v27 = vpop.xlane.xlu1 %275  ;;  %9496 = vst [vmem:[#allocation36_spill] sm:$0xff] %v5635_v3 }
 0x148   :  { %4193 = vrsqrt.f32 %v324_v8  ;;  %9495 = vst [vmem:[#allocation35_spill] sm:$0xff] %v5633_v27  ;;  %v326_v44 = vmax.f32 %v5633_v27, 1e-10 }
 0x149   :  { %4195 = vrsqrt.f32 %v323_v7 }
 0x14a   :  { %4197 = vtanh.f32 %v3673_v20  ;;  %v5008_v20 = vld [vmem:[#allocation2 + $0x100] sm:$0xff] }
 0x14b   :  { %4199 = vrsqrt.f32 %v318_v21 }
 0x14c   :  { %4201 = vrsqrt.f32 %v317_v22 }
 0x14d   :  { %v4184_v55 = vpop.eup %4183 }
 0x14e   :  { %v4186_v19 = vpop.eup %4185  ;;  %v5631_v4 = vmul.f32 %v4184_v55, %v4174_v29  ;;  %v325_v55 = vmax.f32 %v5635_v3, 1e-10 }
 0x14f   :  { %v411_v41 = vmul.f32 %v4186_v19, %v315_v42  ;;  %v4188_v18 = vpop.eup %4187 }
 0x150   :  { %9494 = vst [vmem:[#allocation34_spill] sm:$0xff] %v5631_v4  ;;  %v4190_v30 = vpop.eup %4189  ;;  %v5637_v53 = vmul.f32 %v4188_v18, %v4176_v14  ;;  %v650_v61 = vmul.f32 %v5007_v43, %v5631_v4  ;;  %v5009_v43 = vld [vmem:[#allocation2 + $0x148] sm:$0xff] }
 0x151   :  { %v3672_v12 = vclamps-f32 %v411_v41, 15.0  ;;  %v4192_v29 = vpop.eup %4191  ;;  %v5642_v42 = vmul.f32 %v4190_v30, %v4178_v5 }
 0x152   :  { %9497 = vst [vmem:[#allocation37_spill] sm:$0xff] %v5637_v53  ;;  %v649_v17 = vmul.f32 %v5008_v20, %v5637_v53  ;;  %v4194_v15 = vpop.eup %4193  ;;  %v5645_v2 = vmul.f32 %v4192_v29, %v4180_v46  ;;  %v5651_v29 = vpop.xlane.xlu1 %263 }
 0x153   :  { %9498 = vst [vmem:[#allocation38_spill] sm:$0xff] %v5642_v42  ;;  %4203 = vtanh.f32 %v3672_v12  ;;  %v4196_v41 = vpop.eup %4195  ;;  %v420_v18 = vmul.f32 %v4194_v15, %v324_v8  ;;  %v658_v3 = vmul.f32 %v5009_v43, %v5642_v42  ;;  %9499 = vst [vmem:[#allocation39_spill] sm:$0xff] %v5651_v29  ;;  %v5011_v43 = vld [vmem:[#allocation2 + $0x118] sm:$0xff] }
 0x154   :  { %4205 = vrsqrt.f32 %v326_v44  ;;  %v681_v14 = vpack.c.bf16 %v650_v61, %v649_v17  ;;  %v4198_v27 = vpop.eup %4197  ;;  %v419_v60 = vmul.f32 %v4196_v41, %v323_v7  ;;  %v657_v12 = vmul.f32 %v5010_v28, %v5645_v2 }
 0x155   :  { %4207 = vrsqrt.f32 %v325_v55  ;;  %v4200_v30 = vpop.eup %4199  ;;  %v3681_v5 = vclamps-f32 %v420_v18, 15.0  ;;  %v5649_v20 = vmul.f32 %v4198_v27, %v4182_v11 }
 0x156   :  { %3982 = vmatprep.mubr.bf16.mxu0 %v681_v14  ;;  %v4202_v4 = vpop.eup %4201  ;;  %v3680_v61 = vclamps-f32 %v419_v60, 15.0  ;;  %v414_v17 = vmul.f32 %v4200_v30, %v318_v21  ;;  %v685_v8 = vpack.c.bf16 %v658_v3, %v657_v12  ;;  %v5012_v60 = vld [vmem:[#allocation2 + $0x110] sm:$0xff]  ;;  %v5658_v12 = vpop.xlane.xlu0 %261 }
 0x157   :  { %v413_v46 = vmul.f32 %v4202_v4, %v317_v22  ;;  %4209 = vtanh.f32 %v3681_v5  ;;  %v652_v18 = vmul.f32 %v5011_v43, %v5649_v20  ;;  %v320_v22 = vmax.f32 %v5651_v29, 1e-10  ;;  %9500 = vst [vmem:[#allocation40_spill] sm:$0xff] %v5658_v12  ;;  %v5016_v29 = vld [vmem:[#allocation2 + $0x128] sm:$0xff] }
 0x158   :  { %3990 = vmatprep.mubr.bf16.mxu1 %v685_v8  ;;  %4211 = vtanh.f32 %v3680_v61  ;;  %v3675_v28 = vclamps-f32 %v414_v17, 15.0  ;;  %v319_v61 = vmax.f32 %v5658_v12, 1e-10 }
 0x159   :  { %v3674_v14 = vclamps-f32 %v413_v46, 15.0 }
 0x15b   :  { %4213 = vtanh.f32 %v3674_v14 }
 0x15c   :  { %4215 = vtanh.f32 %v3675_v28 }
 0x15d   :  { %v4204_v7 = vpop.eup %4203  ;;  %4217 = vrsqrt.f32 %v320_v22 }
 0x15e   :  { %v4206_v53 = vpop.eup %4205  ;;  %v5654_v42 = vmul.f32 %v4204_v7, %v4186_v19  ;;  %v5013_v7 = vld [vmem:[#allocation2 + $0x158] sm:$0xff] }
 0x15f   :  { %v4208_v11 = vpop.eup %4207  ;;  %v422_v27 = vmul.f32 %v4206_v53, %v326_v44 }
 0x160   :  { %v651_v21 = vmul.f32 %v5012_v60, %v5654_v42  ;;  %v421_v3 = vmul.f32 %v4208_v11, %v325_v55 }
 0x161   :  { %v3683_v5 = vclamps-f32 %v422_v27, 15.0  ;;  %v4210_v19 = vpop.eup %4209 }
 0x162   :  { %v682_v46 = vpack.c.bf16 %v652_v18, %v651_v21  ;;  %v3682_v8 = vclamps-f32 %v421_v3, 15.0  ;;  %v5661_v44 = vmul.f32 %v4210_v19, %v4194_v15  ;;  %v4212_v17 = vpop.eup %4211  ;;  %v5014_v18 = vld [vmem:[#allocation2 + $0x150] sm:$0xff] }
 0x163   :  { %4219 = vtanh.f32 %v3683_v5  ;;  %v5664_v14 = vmul.f32 %v4212_v17, %v4196_v41  ;;  %v5015_v17 = vld [vmem:[#allocation2 + $0x120] sm:$0xff] }
 0x164   :  { %3983 = vmatmul.mubr.bf16.vlgmr.msra.gmra.mrb[16].mxu0 %v682_v46  ;;  %4221 = vtanh.f32 %v3682_v8  ;;  %v660_v55 = vmul.f32 %v5013_v7, %v5661_v44 }
 0x165   :  { %4223 = vrsqrt.f32 %v319_v61  ;;  %v4214_v43 = vpop.eup %4213  ;;  %v659_v28 = vmul.f32 %v5014_v18, %v5664_v14 }
 0x166   :  { %v4216_v27 = vpop.eup %4215  ;;  %v5667_v5 = vmul.f32 %v4214_v43, %v4202_v4 }
 0x167   :  { %v4218_v60 = vpop.eup %4217  ;;  %v686_v21 = vpack.c.bf16 %v660_v55, %v659_v28  ;;  %v5669_v46 = vmul.f32 %v4216_v27, %v4200_v30  ;;  %v5017_v28 = vld [vmem:[#allocation2 + $0x160] sm:$0xff]  ;;  %v5018_v30 = vld [vmem:[#allocation2 + $0x168] sm:$0xff] }
 0x168   :  { %v416_v8 = vmul.f32 %v4218_v60, %v320_v22  ;;  %v653_v12 = vmul.f32 %v5015_v17, %v5667_v5 }
 0x169   :  { %3991 = vmatmul.mubr.bf16.vlgmr.msra.gmra.mrb[16].mxu1 %v686_v21  ;;  %v654_v55 = vmul.f32 %v5016_v29, %v5669_v46  ;;  %v5682_v29 = vpop.xlane.xlu0 %277 }
 0x16a   :  { %v3677_v18 = vclamps-f32 %v416_v8, 15.0  ;;  %9502 = vst [vmem:[#allocation42_spill] sm:$0xff] %v5682_v29 }
 0x16b   :  { %v683_v21 = vpack.c.bf16 %v654_v55, %v653_v12  ;;  %v5019_v55 = vld [vmem:[#allocation2 + $0x138] sm:$0xff] }
 0x16c   :  { %4225 = vtanh.f32 %v3677_v18 }
 0x16d   :  { %v4220_v3 = vpop.eup %4219  ;;  %3986 = vmatprep.mubr.bf16.mxu0 %v683_v21 }
 0x16e   :  { %v4222_v15 = vpop.eup %4221  ;;  %v5673_v41 = vmul.f32 %v4220_v3, %v4206_v53 }
 0x16f   :  { %v5671_v19 = vmul.f32 %v4222_v15, %v4208_v11  ;;  %v4224_v7 = vpop.eup %4223  ;;  %v5679_v11 = vpop.xlane.xlu1 %279 }
 0x170   :  { %v415_v43 = vmul.f32 %v4224_v7, %v319_v61  ;;  %v662_v22 = vmul.f32 %v5018_v30, %v5673_v41  ;;  %9501 = vst [vmem:[#allocation41_spill] sm:$0xff] %v5679_v11  ;;  %v328_v3 = vmax.f32 %v5679_v11, 1e-10  ;;  %v327_v61 = vmax.f32 %v5682_v29, 1e-10  ;;  %v5021_v11 = vld [vmem:[#allocation2 + $0x178] sm:$0xff] }
 0x171   :  { %v661_v4 = vmul.f32 %v5017_v28, %v5671_v19 }
 0x172   :  { %v3676_v27 = vclamps-f32 %v415_v43, 15.0  ;;  %v5020_v43 = vld [vmem:[#allocation2 + $0x130] sm:$0xff] }
 0x173   :  { %v687_v53 = vpack.c.bf16 %v662_v22, %v661_v4 }
 0x174   :  { %4227 = vtanh.f32 %v3676_v27 }
 0x175   :  { %3994 = vmatprep.mubr.bf16.mxu1 %v687_v53  ;;  %4229 = vrsqrt.f32 %v328_v3 }
 0x176   :  { %v4226_v15 = vpop.eup %4225  ;;  %4231 = vrsqrt.f32 %v327_v61 }
 0x177   :  { %v5685_v12 = vmul.f32 %v4226_v15, %v4218_v60 }
 0x179   :  { %v656_v28 = vmul.f32 %v5019_v55, %v5685_v12  ;;  %v5022_v55 = vld [vmem:[#allocation2 + $0x170] sm:$0xff] }
 0x17e   :  { %v4228_v8 = vpop.eup %4227 }
 0x17f   :  { %v5687_v17 = vmul.f32 %v4228_v8, %v4224_v7  ;;  %v4230_v18 = vpop.eup %4229 }
 0x180   :  { %v424_v4 = vmul.f32 %v4230_v18, %v328_v3  ;;  %v4232_v53 = vpop.eup %4231 }
 0x181   :  { %v655_v21 = vmul.f32 %v5020_v43, %v5687_v17  ;;  %v423_v27 = vmul.f32 %v4232_v53, %v327_v61  ;;  %v785_v61 = vmax.f32 %v5344_v50, 1e-10 }
 0x182   :  { %v3685_v30 = vclamps-f32 %v424_v4, 15.0 }
 0x183   :  { %v684_v22 = vpack.c.bf16 %v656_v28, %v655_v21  ;;  %v3684_v60 = vclamps-f32 %v423_v27, 15.0  ;;  %v801_v28 = vmax.f32 %v5339_v40, 1e-10  ;;  %v802_v21 = vmax.f32 %v5353_v52, 1e-10 }
 0x184   :  { %4233 = vtanh.f32 %v3685_v30  ;;  %v786_v30 = vmax.f32 %v5359_v34, 1e-10  ;;  %v787_v40 = vmax.f32 %v5375_v32, 1e-10  ;;  %v804_v34 = vmax.f32 %v5385_v36, 1e-10 }
 0x185   :  { %3987 = vmatmul.mubr.bf16.gmra.mrb[20].mxu0 %v684_v22  ;;  %4235 = vtanh.f32 %v3684_v60  ;;  %v803_v60 = vmax.f32 %v5388_v24, 1e-10 }
 0x186   :  { %4237 = vrsqrt.f32 %v801_v28 }
 0x187   :  { %4239 = vrsqrt.f32 %v785_v61 }
 0x188   :  { %4241 = vrsqrt.f32 %v802_v21 }
 0x189   :  { %4243 = vrsqrt.f32 %v786_v30 }
 0x18e   :  { %v4234_v15 = vpop.eup %4233 }
 0x18f   :  { %v5691_v7 = vmul.f32 %v4234_v15, %v4230_v18  ;;  %v4236_v8 = vpop.eup %4235 }
 0x190   :  { %v5693_v29 = vmul.f32 %v4236_v8, %v4232_v53  ;;  %v788_v53 = vmax.f32 %v5369_v39, 1e-10  ;;  %v790_v8 = vmax.f32 %v5397_v48, 1e-10  ;;  %v9268_v48 = vmax.f32 %v5402_v51, 1e-10 }
 0x191   :  { %9503 = vst [vmem:[#allocation43_spill] sm:$0xff] %v5691_v7  ;;  %v664_v3 = vmul.f32 %v5021_v11, %v5691_v7 }
 0x192   :  { %9504 = vst [vmem:[#allocation44_spill] sm:$0xff] %v5693_v29  ;;  %v663_v43 = vmul.f32 %v5022_v55, %v5693_v29  ;;  %4245 = vrsqrt.f32 %v788_v53  ;;  %v5730_v55 = vpop.eup %4237 }
 0x193   :  { %4247 = vrsqrt.f32 %v787_v40  ;;  %9513 = vst [vmem:[#allocation53_spill] sm:$0xff] %v5730_v55 }
 0x194   :  { %v688_v4 = vpack.c.bf16 %v664_v3, %v663_v43  ;;  %4249 = vrsqrt.f32 %v804_v34 }
 0x195   :  { %4251 = vrsqrt.f32 %v803_v60 }
 0x196   :  { %3995 = vmatmul.mubr.bf16.gmra.mrb[20].mxu1 %v688_v4  ;;  %v5734_v4 = vpop.eup %4239  ;;  %4253 = vrsqrt.f32 %v790_v8 }
 0x197   :  { %9514 = vst [vmem:[#allocation54_spill] sm:$0xff] %v5734_v4  ;;  %4255 = vrsqrt.f32 %v9268_v48 }
 0x1ca   :  { %v5700_v18 = vpop.f32.mrb[0].mxu0 }
 0x1cb   :  { %9505 = vst [vmem:[#allocation45_spill] sm:$0xff] %v5700_v18  ;;  %v5703_v22 = vpop.f32.mrb[1].mxu0  ;;  %v1366_v11 = vmul.f32 %v5700_v18, %v5700_v18 }
 0x1cc   :  { %9506 = vst [vmem:[#allocation46_spill] sm:$0xff] %v5703_v22  ;;  %v5708_v27 = vpop.f32.mrb[2].mxu0  ;;  %v1364_v43 = vmul.f32 %v5703_v22, %v5703_v22 }
 0x1cd   :  { %9507 = vst [vmem:[#allocation47_spill] sm:$0xff] %v5708_v27  ;;  %1416 = vadd.xlane.f32.xlu0 %v1366_v11  ;;  %v5711_v50 = vpop.f32.mrb[3].mxu0  ;;  %v1367_v52 = vmul.f32 %v5708_v27, %v5708_v27  ;;  %v5717_v15 = vpop.f32.mrb[0].mxu1  ;;  %v5738_v11 = vmul.f32 %v5730_v55, %v801_v28 }
 0x1ce   :  { %9508 = vst [vmem:[#allocation48_spill] sm:$0xff] %v5711_v50  ;;  %9509 = vst [vmem:[#allocation49_spill] sm:$0xff] %v5717_v15  ;;  %v5719_v39 = vpop.f32.mrb[1].mxu1  ;;  %v1382_v32 = vmul.f32 %v5717_v15, %v5717_v15 }
 0x1cf   :  { %1418 = vadd.xlane.f32.xlu1 %v1367_v52  ;;  %9510 = vst [vmem:[#allocation50_spill] sm:$0xff] %v5719_v39  ;;  %v5724_v3 = vpop.f32.mrb[2].mxu1  ;;  %v1365_v52 = vmul.f32 %v5711_v50, %v5711_v50  ;;  %v9525_v7 = vclamps-f32 %v5738_v11, 0.99999 }
 0x1d0   :  { %9511 = vst [vmem:[#allocation51_spill] sm:$0xff] %v5724_v3  ;;  %v5726_v36 = vpop.f32.mrb[3].mxu1  ;;  %v1383_v24 = vmul.f32 %v5724_v3, %v5724_v3  ;;  %v5745_v3 = vmul.f32 %v5734_v4, %v785_v61 }
 0x1d1   :  { %1448 = vadd.xlane.f32.xlu0 %v1382_v32  ;;  %9512 = vst [vmem:[#allocation52_spill] sm:$0xff] %v5726_v36  ;;  %v5742_v32 = vpop.eup %4241  ;;  %v1381_v61 = vmul.f32 %v5726_v36, %v5726_v36 }
 0x1d2   :  { %9515 = vst [vmem:[#allocation55_spill] sm:$0xff] %v5742_v32  ;;  %v5749_v22 = vpop.eup %4243  ;;  %v5756_v50 = vpop.f32.mrb[4].mxu0 }
 0x1d3   :  { %1450 = vadd.xlane.f32.xlu1 %v1383_v24  ;;  %v1380_v24 = vmul.f32 %v5719_v39, %v5719_v39  ;;  %9516 = vst [vmem:[#allocation56_spill] sm:$0xff] %v5749_v22  ;;  %v5753_v28 = vpop.eup %4245  ;;  %9518 = vst [vmem:[#allocation58_spill] sm:$0xff] %v5756_v50  ;;  %v5765_v39 = vpop.f32.mrb[5].mxu0  ;;  %v1370_v48 = vmul.f32 %v5756_v50, %v5756_v50 }
 0x1d4   :  { %9517 = vst [vmem:[#allocation57_spill] sm:$0xff] %v5753_v28  ;;  %v5760_v15 = vpop.eup %4247  ;;  %9520 = vst [vmem:[#allocation60_spill] sm:$0xff] %v5765_v39  ;;  %v5775_v18 = vpop.f32.mrb[6].mxu0 }
 0x1d5   :  { %1412 = vadd.xlane.f32.xlu0 %v1364_v43  ;;  %9519 = vst [vmem:[#allocation59_spill] sm:$0xff] %v5760_v15  ;;  %v5769_v27 = vpop.eup %4249  ;;  %9522 = vst [vmem:[#allocation62_spill] sm:$0xff] %v5775_v18  ;;  %v5782_v29 = vpop.f32.mrb[7].mxu0  ;;  %v1371_v50 = vmul.f32 %v5775_v18, %v5775_v18  ;;  %v5789_v43 = vmul.f32 %v5760_v15, %v787_v40  ;;  %v9528_v18 = vclamps-f32 %v5745_v3, 0.99999 }
 0x1d6   :  { %9521 = vst [vmem:[#allocation61_spill] sm:$0xff] %v5769_v27  ;;  %v5777_v36 = vpop.eup %4251  ;;  %9524 = vst [vmem:[#allocation64_spill] sm:$0xff] %v5782_v29  ;;  %v5795_v55 = vmul.f32 %v5769_v27, %v804_v34 }
 0x1d7   :  { %1414 = vadd.xlane.f32.xlu1 %v1365_v52  ;;  %v5763_v52 = vmul.f32 %v5742_v32, %v802_v21  ;;  %9523 = vst [vmem:[#allocation63_spill] sm:$0xff] %v5777_v36  ;;  %v5780_v21 = vmul.f32 %v5753_v28, %v788_v53  ;;  %v1860_v32 = vsub.f32 1.0, %v9525_v7  ;;  %v1844_v4 = vsub.f32 1.0, %v9528_v18 }
 0x1d8   :  { %v5804_v40 = vmul.f32 %v5777_v36, %v803_v60  ;;  %v9538_v53 = vclamps-f32 %v5789_v43, 0.99999 }
 0x1d9   :  { %1444 = vadd.xlane.f32.xlu0 %v1380_v24  ;;  %v5773_v24 = vmul.f32 %v5749_v22, %v786_v30  ;;  %v5791_v30 = vpop.eup %4253  ;;  %v5798_v22 = vpop.f32.mrb[4].mxu1  ;;  %4257 = vrcp.f32 %v1860_v32  ;;  %v9533_v34 = vclamps-f32 %v5763_v52, 0.99999  ;;  %v9534_v32 = vmax.f32 %v5415_v37, 1e-10 }
 0x1da   :  { %9526 = vst [vmem:[#allocation65_spill] sm:$0xff] %v5791_v30  ;;  %9527 = vst [vmem:[#allocation66_spill] sm:$0xff] %v5798_v22  ;;  %v5816_v7 = vmul.f32 %v5791_v30, %v790_v8  ;;  %v5822_v36 = vpop.eup %4255  ;;  %v9536_v30 = vclamps-f32 %v5780_v21, 0.99999  ;;  %v1846_v15 = vsub.f32 1.0, %v9538_v53 }
 0x1db   :  { %1446 = vadd.xlane.f32.xlu1 %v1381_v61  ;;  %v1386_v61 = vmul.f32 %v5798_v22, %v5798_v22  ;;  %9532 = vst [vmem:[#allocation70_spill] sm:$0xff] %v5822_v36  ;;  %v1861_v22 = vsub.f32 1.0, %v9533_v34  ;;  %4259 = vrsqrt.f32 %v9534_v32  ;;  %v9535_v8 = vclamps-f32 %v5773_v24, 0.99999 }
 0x1dc   :  { %4261 = vrcp.f32 %v1844_v4  ;;  %v1847_v28 = vsub.f32 1.0, %v9536_v30  ;;  %v9537_v34 = vmax.f32 %v5418_v6, 1e-10  ;;  %v9539_v32 = vmax.f32 %v5402_v51, 1e-10 }
 0x1dd   :  { %1424 = vadd.xlane.f32.xlu0 %v1370_v48  ;;  %v5806_v48 = vpop.f32.mrb[5].mxu1  ;;  %v1845_v18 = vsub.f32 1.0, %v9535_v8  ;;  %v9540_v30 = vclamps-f32 %v5795_v55, 0.99999  ;;  %v9541_v53 = vclamps-f32 %v5804_v40, 0.99999 }
 0x1de   :  { %9529 = vst [vmem:[#allocation67_spill] sm:$0xff] %v5806_v48  ;;  %v5812_v27 = vpop.f32.mrb[6].mxu1  ;;  %4263 = vrsqrt.f32 %v9537_v34  ;;  %v5844_v8 = vmul.f32 %v5822_v36, %v9539_v32  ;;  %v698_v34 = vmul.f32 %v5507_v58, %v5507_v58  ;;  %v1384_v51 = vmul.f32 %v5806_v48, %v5806_v48 }
 0x1df   :  { %1426 = vadd.xlane.f32.xlu1 %v1371_v50  ;;  %9530 = vst [vmem:[#allocation68_spill] sm:$0xff] %v5812_v27  ;;  %v5818_v60 = vpop.f32.mrb[7].mxu1  ;;  %v1387_v50 = vmul.f32 %v5812_v27, %v5812_v27  ;;  %v1368_v27 = vmul.f32 %v5765_v39, %v5765_v39  ;;  %4265 = vrcp.f32 %v1861_v22  ;;  %v1862_v4 = vsub.f32 1.0, %v9541_v53 }
 0x1e0   :  { %9531 = vst [vmem:[#allocation69_spill] sm:$0xff] %v5818_v60  ;;  %4267 = vrcp.f32 %v1845_v18  ;;  %v9542_v22 = vclamps-f32 %v5816_v7, 0.99999  ;;  %v1385_v58 = vmul.f32 %v5818_v60, %v5818_v60  ;;  %v9291_v18 = vmax.f32 %v5428_v26, 1e-10 }
 0x1e1   :  { %1456 = vadd.xlane.f32.xlu0 %v1386_v61  ;;  %v1863_v61 = vsub.f32 1.0, %v9540_v30  ;;  %4269 = vrcp.f32 %v1847_v28  ;;  %v9288_v30 = vclamps-f32 %v5844_v8, 0.99999  ;;  %v9549_v48 = vmax.f32 %v5444_v10, 1e-10 }
 0x1e2   :  { %4271 = vrcp.f32 %v1846_v15  ;;  %v1849_v32 = vsub.f32 1.0, %v9542_v22 }
 0x1e3   :  { %1458 = vadd.xlane.f32.xlu1 %v1387_v50  ;;  %v1369_v50 = vmul.f32 %v5782_v29, %v5782_v29  ;;  %4273 = vrcp.f32 %v1863_v61  ;;  %v4258_v53 = vpop.eup %4257  ;;  %v697_v61 = vmul.f32 %v5515_v49, %v5515_v49  ;;  %v9547_v49 = vmax.f32 %v5441_v57, 1e-10 }
 0x1e4   :  { %4275 = vrcp.f32 %v1862_v4 }
 0x1e5   :  { %1420 = vadd.xlane.f32.xlu0 %v1368_v27  ;;  %v9287_v27 = vmax.f32 %v5425_v47, 1e-10  ;;  %v5867_v15 = vpop.eup %4259 }
 0x1e6   :  { %9543 = vst [vmem:[#allocation71_spill] sm:$0xff] %v5867_v15  ;;  %v4262_v22 = vpop.eup %4261 }
 0x1e7   :  { %1422 = vadd.xlane.f32.xlu1 %v1369_v50  ;;  %v5864_v50 = vmul.f32 %v698_v34, %v5438_v63  ;;  %4277 = vrsqrt.f32 %v9287_v27  ;;  %v1848_v63 = vsub.f32 1.0, %v9288_v30  ;;  %v9548_v30 = vclamps-f32 %v5745_v3, 0.99999 }
 0x1e8   :  { %4279 = vrcp.f32 %v1849_v32  ;;  %v5876_v34 = vpop.eup %4263 }
 0x1e9   :  { %1452 = vadd.xlane.f32.xlu0 %v1384_v51  ;;  %9544 = vst [vmem:[#allocation72_spill] sm:$0xff] %v5876_v34  ;;  %4281 = vrsqrt.f32 %v9291_v18  ;;  %v9546_v51 = vmax.f32 %v5415_v37, 1e-10  ;;  %v4266_v32 = vpop.eup %4265  ;;  %v1796_v60 = vadd.f32 1.0, %v9548_v30  ;;  %v5895_v18 = vmul.f32 %v697_v61, %v5451_v59 }
 0x1ea   :  { %4283 = vrsqrt.f32 %v9547_v49  ;;  %v4268_v37 = vpop.eup %4267  ;;  %v9551_v49 = vmax.f32 %v5418_v6, 1e-10 }
 0x1eb   :  { %1454 = vadd.xlane.f32.xlu1 %v1385_v58  ;;  %v9545_v58 = vclamps-f32 %v5738_v11, 0.99999  ;;  %v5886_v28 = vmul.f32 %v5867_v15, %v9546_v51  ;;  %4285 = vrsqrt.f32 %v9549_v48  ;;  %v714_v11 = vmul.f32 %v5530_v25, %v5530_v25  ;;  %v4270_v30 = vpop.eup %4269 }
 0x1ec   :  { %v9550_v51 = vclamps-f32 %v5763_v52, 0.99999  ;;  %4287 = vrcp.f32 %v1848_v63  ;;  %v5904_v3 = vmul.f32 %v5876_v34, %v9551_v49  ;;  %v1893_v29 = vmul.f32 %v4262_v22, %v1796_v60  ;;  %v4272_v59 = vpop.eup %4271 }
 0x1ed   :  { %v1812_v27 = vadd.f32 1.0, %v9545_v58  ;;  %v9552_v48 = vmax.f32 %v5864_v50, 1e-10  ;;  %v9553_v25 = vclamps-f32 %v5773_v24, 0.99999  ;;  %v4274_v52 = vpop.eup %4273 }
 0x1ee   :  { %v1813_v4 = vadd.f32 1.0, %v9550_v51  ;;  %v9296_v6 = vmax.f32 %v5895_v18, 1e-10  ;;  %v5915_v51 = vmul.f32 %v714_v11, %v5461_v1  ;;  %v4276_v60 = vpop.eup %4275  ;;  %v9295_v49 = vclamps-f32 %v5904_v3, 0.99999 }
 0x1ef   :  { %v1925_v58 = vmul.f32 %v4258_v53, %v1812_v27  ;;  %4289 = vrsqrt.f32 %v9552_v48  ;;  %v1797_v39 = vadd.f32 1.0, %v9553_v25  ;;  %v9294_v27 = vclamps-f32 %v5886_v28, 0.99999 }
 0x1f0   :  { %v1927_v61 = vmul.f32 %v4266_v32, %v1813_v4  ;;  %v9554_v53 = vclamps-f32 %v5780_v21, 0.99999  ;;  %v9556_v48 = vclamps-f32 %v5789_v43, 0.99999  ;;  %v9558_v1 = vclamps-f32 %v5795_v55, 0.99999 }
 0x1f1   :  { %4291 = vlog2.f32 %v1925_v58  ;;  %v1895_v22 = vmul.f32 %v4268_v37, %v1797_v39  ;;  %v5918_v4 = vpop.eup %4277  ;;  %v1865_v25 = vsub.f32 1.0, %v9294_v27  ;;  %v9297_v39 = vmax.f32 %v5915_v51, 1e-10 }
 0x1f2   :  { %v1799_v63 = vadd.f32 1.0, %v9554_v53  ;;  %9555 = vst [vmem:[#allocation73_spill] sm:$0xff] %v5918_v4  ;;  %4293 = vlog2.f32 %v1893_v29  ;;  %v4280_v32 = vpop.eup %4279  ;;  %v1798_v21 = vadd.f32 1.0, %v9556_v48  ;;  %v1815_v11 = vadd.f32 1.0, %v9558_v1 }
 0x1f3   :  { %4295 = vlog2.f32 %v1927_v61  ;;  %v5924_v53 = vpop.eup %4281  ;;  %v713_v29 = vmul.f32 %v5528_v56, %v5528_v56  ;;  %v9560_v43 = vclamps-f32 %v5804_v40, 0.99999  ;;  %v700_v55 = vmul.f32 %v5539_v45, %v5539_v45 }
 0x1f4   :  { %v1899_v24 = vmul.f32 %v4270_v30, %v1799_v63  ;;  %9557 = vst [vmem:[#allocation74_spill] sm:$0xff] %v5924_v53  ;;  %4297 = vrsqrt.f32 %v9296_v6  ;;  %v5933_v37 = vpop.eup %4283  ;;  %v1864_v30 = vsub.f32 1.0, %v9295_v49  ;;  %v1897_v63 = vmul.f32 %v4272_v59, %v1798_v21 }
 0x1f5   :  { %9559 = vst [vmem:[#allocation75_spill] sm:$0xff] %v5933_v37  ;;  %4299 = vlog2.f32 %v1895_v22  ;;  %v1814_v58 = vadd.f32 1.0, %v9560_v43  ;;  %v5941_v61 = vpop.eup %4285  ;;  %v9562_v48 = vclamps-f32 %v5816_v7, 0.99999  ;;  %v9563_v56 = vmax.f32 %v5425_v47, 1e-10 }
 0x1f6   :  { %9561 = vst [vmem:[#allocation76_spill] sm:$0xff] %v5941_v61  ;;  %4301 = vlog2.f32 %v1899_v24  ;;  %v4288_v40 = vpop.eup %4287  ;;  %v1931_v43 = vmul.f32 %v4274_v52, %v1815_v11  ;;  %v9564_v27 = vclamps-f32 %v5844_v8, 0.99999  ;;  %v9565_v45 = vmax.f32 %v5428_v26, 1e-10 }
 0x1f7   :  { %v1801_v1 = vadd.f32 1.0, %v9562_v48  ;;  %v5948_v22 = vmul.f32 %v5918_v4, %v9563_v56  ;;  %4303 = vrcp.f32 %v1865_v25  ;;  %v1929_v7 = vmul.f32 %v4276_v60, %v1814_v58 }
 0x1f8   :  { %v1800_v49 = vadd.f32 1.0, %v9564_v27  ;;  %v5955_v6 = vmul.f32 %v5924_v53, %v9565_v45  ;;  %v9567_v24 = vmax.f32 %v5441_v57, 1e-10  ;;  %4305 = vrsqrt.f32 %v9297_v39  ;;  %v5969_v27 = vpop.f32.mrb[8].mxu0 }
 0x1f9   :  { %v5957_v59 = vpop.eup %4289  ;;  %v5967_v8 = vmul.f32 %v713_v29, %v5463_v31  ;;  %9568 = vst [vmem:[#allocation78_spill] sm:$0xff] %v5969_v27  ;;  %4307 = vrcp.f32 %v1864_v30  ;;  %v9569_v26 = vmax.f32 %v5444_v10, 1e-10  ;;  %v5977_v60 = vmul.f32 %v700_v55, %v5472_v33  ;;  %v5979_v57 = vpop.f32.mrb[9].mxu0 }
 0x1fa   :  { %9566 = vst [vmem:[#allocation77_spill] sm:$0xff] %v5957_v59  ;;  %v5962_v47 = vmul.f32 %v5933_v37, %v9567_v24  ;;  %9570 = vst [vmem:[#allocation79_spill] sm:$0xff] %v5979_v57  ;;  %v1374_v21 = vmul.f32 %v5969_v27, %v5969_v27  ;;  %4309 = vlog2.f32 %v1897_v63  ;;  %v1903_v25 = vmul.f32 %v4280_v32, %v1801_v1  ;;  %v5986_v29 = vpop.f32.mrb[10].mxu0 }
 0x1fb   :  { %v5974_v52 = vmul.f32 %v5941_v61, %v9569_v26  ;;  %v9298_v31 = vclamps-f32 %v5948_v22, 0.99999  ;;  %v699_v11 = vmul.f32 %v5533_v54, %v5533_v54  ;;  %9571 = vst [vmem:[#allocation80_spill] sm:$0xff] %v5986_v29  ;;  %v5988_v10 = vpop.eup %4291  ;;  %v1901_v58 = vmul.f32 %v4288_v40, %v1800_v49  ;;  %v5996_v63 = vpop.f32.mrb[11].mxu0 }
 0x1fc   :  { %v9299_v33 = vclamps-f32 %v5955_v6, 0.99999  ;;  %v9572_v30 = vmax.f32 %v5864_v50, 1e-10  ;;  %1432 = vadd.xlane.f32.xlu0 %v1374_v21  ;;  %9573 = vst [vmem:[#allocation81_spill] sm:$0xff] %v5996_v63  ;;  %v1375_v32 = vmul.f32 %v5986_v29, %v5986_v29  ;;  %v6000_v48 = vpop.eup %4293  ;;  %4311 = vlog2.f32 %v1931_v43  ;;  %v6006_v50 = vpop.f32.mrb[8].mxu1 }
 0x1fd   :  { %v9301_v54 = vclamps-f32 %v5962_v47, 0.99999  ;;  %v9302_v49 = vmax.f32 %v5967_v8, 1e-10  ;;  %v716_v1 = vmul.f32 %v5547_v0, %v5547_v0  ;;  %9574 = vst [vmem:[#allocation82_spill] sm:$0xff] %v6006_v50  ;;  %v6008_v56 = vpop.eup %4295  ;;  %4313 = vlog2.f32 %v1929_v7  ;;  %v6012_v24 = vpop.f32.mrb[9].mxu1 }
 0x1fe   :  { %v5994_v55 = vmul.f32 %v5957_v59, %v9572_v30  ;;  %v9303_v40 = vclamps-f32 %v5974_v52, 0.99999  ;;  %1434 = vadd.xlane.f32.xlu1 %v1375_v32  ;;  %9575 = vst [vmem:[#allocation83_spill] sm:$0xff] %v6012_v24  ;;  %v1390_v43 = vmul.f32 %v6006_v50, %v6006_v50  ;;  %v6016_v26 = vpop.eup %4297  ;;  %4315 = vlog2.f32 %v1903_v25  ;;  %v6023_v7 = vpop.f32.mrb[10].mxu1 }
 0x1ff   :  { %9576 = vst [vmem:[#allocation84_spill] sm:$0xff] %v6016_v26  ;;  %v1851_v0 = vsub.f32 1.0, %v9298_v31  ;;  %v6021_v21 = vmul.f32 %v699_v11, %v5478_v13  ;;  %9577 = vst [vmem:[#allocation85_spill] sm:$0xff] %v6023_v7  ;;  %v6025_v30 = vpop.eup %4299  ;;  %4317 = vlog2.f32 %v1901_v58  ;;  %v1850_v32 = vsub.f32 1.0, %v9299_v33  ;;  %v6030_v45 = vpop.f32.mrb[11].mxu1 }
 0x200   :  { %1464 = vadd.xlane.f32.xlu0 %v1390_v43  ;;  %9578 = vst [vmem:[#allocation86_spill] sm:$0xff] %v6030_v45  ;;  %v1391_v25 = vmul.f32 %v6023_v7, %v6023_v7  ;;  %v4302_v31 = vpop.eup %4301  ;;  %v1867_v13 = vsub.f32 1.0, %v9301_v54  ;;  %4319 = vrsqrt.f32 %v9302_v49  ;;  %v6039_v11 = vmul.f32 %v716_v1, %v5492_v62 }
 0x201   :  { %v715_v58 = vmul.f32 %v5558_v16, %v5558_v16  ;;  %v4304_v33 = vpop.eup %4303  ;;  %v1866_v43 = vsub.f32 1.0, %v9303_v40  ;;  %v9579_v39 = vmax.f32 %v5895_v18, 1e-10  ;;  %v9580_v54 = vmax.f32 %v5977_v60, 1e-10 }
 0x202   :  { %1466 = vadd.xlane.f32.xlu1 %v1391_v25  ;;  %v1372_v62 = vmul.f32 %v5979_v57, %v5979_v57  ;;  %v6054_v1 = vpop.eup %4305  ;;  %v9582_v16 = vclamps-f32 %v5886_v28, 0.99999  ;;  %v702_v18 = vmul.f32 %v5572_v35, %v5572_v35  ;;  %v9583_v50 = vclamps-f32 %v5904_v3, 0.99999 }
 0x203   :  { %v6048_v7 = vmul.f32 %v6016_v26, %v9579_v39  ;;  %4321 = vrsqrt.f32 %v9580_v54  ;;  %9581 = vst [vmem:[#allocation87_spill] sm:$0xff] %v6054_v1  ;;  %v4308_v39 = vpop.eup %4307  ;;  %v9584_v54 = vclamps-f32 %v5994_v55, 0.99999  ;;  %v1373_v57 = vmul.f32 %v5996_v63, %v5996_v63 }
 0x204   :  { %v1817_v49 = vadd.f32 1.0, %v9582_v16  ;;  %4323 = vrcp.f32 %v1851_v0  ;;  %v1816_v29 = vadd.f32 1.0, %v9583_v50  ;;  %1428 = vadd.xlane.f32.xlu0 %v1372_v62  ;;  %v4310_v28 = vpop.eup %4309  ;;  %v9308_v0 = vmax.f32 %v6039_v11, 1e-10 }
 0x205   :  { %4325 = vrcp.f32 %v1850_v32  ;;  %v1853_v25 = vsub.f32 1.0, %v9584_v54  ;;  %v6069_v40 = vmul.f32 %v715_v58, %v5495_v23  ;;  %v9307_v35 = vclamps-f32 %v6048_v7, 0.99999  ;;  %v9588_v54 = vld [vmem:[#allocation11_spill] sm:$0xff] }
 0x206   :  { %v1935_v16 = vmul.f32 %v4304_v33, %v1817_v49  ;;  %4327 = vrcp.f32 %v1867_v13  ;;  %v9585_v3 = vmax.f32 %v5915_v51, 1e-10  ;;  %1430 = vadd.xlane.f32.xlu1 %v1373_v57  ;;  %v1388_v32 = vmul.f32 %v6012_v24, %v6012_v24  ;;  %v4312_v62 = vpop.eup %4311 }
 0x207   :  { %4329 = vrcp.f32 %v1866_v43  ;;  %v1933_v33 = vmul.f32 %v4308_v39, %v1816_v29  ;;  %v9586_v49 = vmax.f32 %v6021_v21, 1e-10  ;;  %v6082_v23 = vmul.f32 %v702_v18, %v5504_v9  ;;  %v4314_v58 = vpop.eup %4313 }
 0x208   :  { %v6075_v50 = vmul.f32 %v6054_v1, %v9585_v3  ;;  %v701_v13 = vmul.f32 %v5569_v38, %v5569_v38  ;;  %1460 = vadd.xlane.f32.xlu0 %v1388_v32  ;;  %v1389_v51 = vmul.f32 %v6030_v45, %v6030_v45  ;;  %v4316_v57 = vpop.eup %4315  ;;  %v9309_v29 = vmax.f32 %v6069_v40, 1e-10  ;;  %v9599_v1 = vld [vmem:[#allocation17_spill] sm:$0xff] }
 0x209   :  { %4331 = vrsqrt.f32 %v9586_v49  ;;  %v4318_v43 = vpop.eup %4317  ;;  %v1852_v9 = vsub.f32 1.0, %v9307_v35  ;;  %v6103_v32 = vmul.f32 0.6931472, %v5988_v10  ;;  %v6109_v35 = vmul.f32 0.6931472, %v6008_v56 }
 0x20a   :  { %4333 = vrcp.f32 %v1853_v25  ;;  %v9310_v18 = vclamps-f32 %v6075_v50, 0.99999  ;;  %1462 = vadd.xlane.f32.xlu1 %v1389_v51  ;;  %v6094_v38 = vpop.eup %4319  ;;  %v6098_v25 = vmul.f32 %v701_v13, %v9588_v54  ;;  %v6112_v51 = vmul.f32 0.6931472, %v6025_v30 }
 0x20b   :  { %4335 = vrsqrt.f32 %v9308_v0  ;;  %9587 = vst [vmem:[#allocation88_spill] sm:$0xff] %v6094_v38  ;;  %v6118_v54 = vmul.f32 0.6931472, %v4302_v31  ;;  %v6127_v39 = vmul.f32 0.6931472, %v4310_v28  ;;  %v9595_v28 = vld [vmem:[#allocation16_spill] sm:$0xff] }
 0x20c   :  { %4337 = vlog2.f32 %v1935_v16  ;;  %v6106_v16 = vmul.f32 0.6931472, %v6000_v48  ;;  %v1869_v10 = vsub.f32 1.0, %v9310_v18  ;;  %v9591_v48 = vmax.f32 %v5967_v8, 1e-10 }
 0x20d   :  { %4339 = vlog2.f32 %v1933_v33  ;;  %v6100_v3 = vpop.eup %4321  ;;  %v9590_v33 = vclamps-f32 %v5948_v22, 0.99999  ;;  %v9592_v22 = vmax.f32 %v5977_v60, 1e-10  ;;  %v9593_v31 = vmax.f32 %v6082_v23, 1e-10 }
 0x20e   :  { %9589 = vst [vmem:[#allocation11_spill] sm:$0xff] %v6100_v3  ;;  %v4324_v49 = vpop.eup %4323  ;;  %4341 = vrsqrt.f32 %v9309_v29  ;;  %v6125_v56 = vmul.f32 %v6094_v38, %v9591_v48  ;;  %v6137_v18 = vmul.f32 0.6931472, %v4312_v62  ;;  %v6139_v8 = vmul.f32 0.6931472, %v4314_v58 }
 0x20f   :  { %v1803_v0 = vadd.f32 1.0, %v9590_v33  ;;  %v4326_v13 = vpop.eup %4325  ;;  %4343 = vrcp.f32 %v1852_v9  ;;  %v6132_v33 = vmul.f32 %v6100_v3, %v9592_v22  ;;  %v9594_v48 = vclamps-f32 %v5955_v6, 0.99999 }
 0x210   :  { %v4328_v30 = vpop.eup %4327  ;;  %4345 = vrsqrt.f32 %v9593_v31  ;;  %v718_v24 = vmul.f32 %v9595_v28, %v9595_v28  ;;  %v9597_v63 = vclamps-f32 %v5962_v47, 0.99999  ;;  %v9598_v31 = vclamps-f32 %v5974_v52, 0.99999 }
 0x211   :  { %v4330_v29 = vpop.eup %4329  ;;  %v1802_v45 = vadd.f32 1.0, %v9594_v48  ;;  %v1907_v22 = vmul.f32 %v4324_v49, %v1803_v0  ;;  %v717_v62 = vmul.f32 %v9599_v1, %v9599_v1  ;;  %4347 = vrcp.f32 %v1869_v10  ;;  %v9600_v48 = vld [vmem:[#allocation19_spill] sm:$0xff] }
 0x212   :  { %v1819_v27 = vadd.f32 1.0, %v9597_v63  ;;  %v1818_v9 = vadd.f32 1.0, %v9598_v31  ;;  %v704_v28 = vmul.f32 %v9600_v48, %v9600_v48  ;;  %v9602_v47 = vclamps-f32 %v5994_v55, 0.99999  ;;  %v9605_v48 = vld [vmem:[#allocation27_spill] sm:$0xff] }
 0x213   :  { %v6145_v60 = vpop.eup %4331  ;;  %v1905_v38 = vmul.f32 %v4326_v13, %v1802_v45  ;;  %v9603_v49 = vmax.f32 %v6098_v25, 1e-10  ;;  %v6163_v31 = vmul.f32 0.6931472, %v4316_v57  ;;  %v9604_v13 = vmax.f32 %v6021_v21, 1e-10 }
 0x214   :  { %9596 = vst [vmem:[#allocation16_spill] sm:$0xff] %v6145_v60  ;;  %v4334_v58 = vpop.eup %4333  ;;  %v1939_v0 = vmul.f32 %v4328_v30, %v1819_v27  ;;  %v1805_v63 = vadd.f32 1.0, %v9602_v47  ;;  %v1937_v45 = vmul.f32 %v4330_v29, %v1818_v9  ;;  %v6171_v6 = vmul.f32 %v718_v24, %v9605_v48  ;;  %v9606_v47 = vld [vmem:[#allocation26_spill] sm:$0xff] }
 0x215   :  { %v6156_v59 = vpop.eup %4335  ;;  %4349 = vrsqrt.f32 %v9603_v49  ;;  %v6168_v10 = vmul.f32 %v6145_v60, %v9604_v13  ;;  %v6173_v55 = vmul.f32 0.6931472, %v4318_v43  ;;  %v6176_v52 = vmul.f32 %v717_v62, %v9606_v47  ;;  %v9609_v49 = vld [vmem:[#allocation12_spill] sm:$0xff] }
 0x216   :  { %9601 = vst [vmem:[#allocation17_spill] sm:$0xff] %v6156_v59  ;;  %v4338_v1 = vpop.eup %4337  ;;  %4351 = vlog2.f32 %v1907_v22  ;;  %v1911_v30 = vmul.f32 %v4334_v58, %v1805_v63  ;;  %v9607_v57 = vclamps-f32 %v6125_v56, 0.99999  ;;  %v9608_v21 = vmax.f32 %v6039_v11, 1e-10 }
 0x217   :  { %v4340_v27 = vpop.eup %4339  ;;  %4353 = vlog2.f32 %v1905_v38  ;;  %v6186_v24 = vmul.f32 %v704_v28, %v9609_v49  ;;  %v6190_v43 = vmul.f32 0.6931472, %v4338_v1  ;;  %v9611_v22 = vclamps-f32 %v6132_v33, 0.99999  ;;  %v9612_v38 = vld [vmem:[#allocation21_spill] sm:$0xff] }
 0x218   :  { %v1868_v29 = vsub.f32 1.0, %v9607_v57  ;;  %v6183_v9 = vmul.f32 %v6156_v59, %v9608_v21  ;;  %v6188_v13 = vpop.eup %4341  ;;  %4355 = vlog2.f32 %v1939_v0  ;;  %v703_v58 = vmul.f32 %v9612_v38, %v9612_v38  ;;  %v9615_v21 = vld [vmem:[#allocation22_spill] sm:$0xff]  ;;  %v9619_v57 = vld [vmem:[#allocation28_spill] sm:$0xff] }
 0x219   :  { %9610 = vst [vmem:[#allocation19_spill] sm:$0xff] %v6188_v13  ;;  %v1855_v62 = vsub.f32 1.0, %v9611_v22  ;;  %v4344_v63 = vpop.eup %4343  ;;  %v6196_v48 = vmul.f32 0.6931472, %v4340_v27  ;;  %4357 = vlog2.f32 %v1937_v45  ;;  %v9614_v1 = vclamps-f32 %v6048_v7, 0.99999 }
 0x21a   :  { %v6200_v47 = vpop.eup %4345  ;;  %4359 = vlog2.f32 %v1911_v30  ;;  %v720_v49 = vmul.f32 %v9615_v21, %v9615_v21  ;;  %v9616_v45 = vmax.f32 %v6069_v40, 1e-10  ;;  %v9617_v30 = vclamps-f32 %v6075_v50, 0.99999  ;;  %v9618_v7 = vld [vmem:[#allocation13_spill] sm:$0xff] }
 0x21b   :  { %9613 = vst [vmem:[#allocation27_spill] sm:$0xff] %v6200_v47  ;;  %v1804_v0 = vadd.f32 1.0, %v9614_v1  ;;  %4361 = vrcp.f32 %v1868_v29  ;;  %v6217_v1 = vmul.f32 %v703_v58, %v9618_v7  ;;  %v719_v21 = vmul.f32 %v9619_v57, %v9619_v57  ;;  %v4348_v29 = vpop.eup %4347  ;;  %v9626_v57 = vld [vmem:[#allocation15_spill] sm:$0xff] }
 0x21c   :  { %v6211_v22 = vmul.f32 %v6188_v13, %v9616_v45  ;;  %v1821_v28 = vadd.f32 1.0, %v9617_v30  ;;  %4363 = vrcp.f32 %v1855_v62  ;;  %v9620_v27 = vclamps-f32 %v6168_v10, 0.99999  ;;  %v6230_v62 = vpop.f32.mrb[12].mxu0  ;;  %v9633_v13 = vld [vmem:[#allocation14_spill] sm:$0xff] }
 0x21d   :  { %v1909_v11 = vmul.f32 %v4344_v63, %v1804_v0  ;;  %v9621_v45 = vmax.f32 %v6082_v23, 1e-10  ;;  %v9622_v50 = vmax.f32 %v6171_v6, 1e-10  ;;  %9623 = vst [vmem:[#allocation26_spill] sm:$0xff] %v6230_v62  ;;  %v6237_v63 = vmul.f32 %v720_v49, %v9626_v57  ;;  %v9627_v0 = vld [vmem:[#allocation34_spill] sm:$0xff] }
 0x21e   :  { %v1854_v40 = vsub.f32 1.0, %v9620_v27  ;;  %v9625_v30 = vmax.f32 %v6176_v52, 1e-10  ;;  %v722_v27 = vmul.f32 %v9627_v0, %v9627_v0  ;;  %v6241_v23 = vpop.f32.mrb[13].mxu0  ;;  %v1378_v7 = vmul.f32 %v6230_v62, %v6230_v62  ;;  %v9634_v62 = vld [vmem:[#allocation38_spill] sm:$0xff] }
 0x21f   :  { %v6226_v26 = vmul.f32 %v6200_v47, %v9621_v45  ;;  %4365 = vrsqrt.f32 %v9622_v50  ;;  %v6232_v58 = vpop.eup %4349  ;;  %9628 = vst [vmem:[#allocation21_spill] sm:$0xff] %v6241_v23  ;;  %v9629_v45 = vclamps-f32 %v6183_v9, 0.99999  ;;  %v9630_v47 = vmax.f32 %v6186_v24, 1e-10  ;;  %v6252_v57 = vpop.f32.mrb[14].mxu0 }
 0x220   :  { %9624 = vst [vmem:[#allocation12_spill] sm:$0xff] %v6232_v58  ;;  %4367 = vrsqrt.f32 %v9625_v30  ;;  %v9631_v30 = vld [vmem:[#allocation37_spill] sm:$0xff]  ;;  %9632 = vst [vmem:[#allocation22_spill] sm:$0xff] %v6252_v57  ;;  %v4352_v59 = vpop.eup %4351  ;;  %v6256_v3 = vmul.f32 %v719_v21, %v9633_v13  ;;  %v730_v60 = vmul.f32 %v9634_v62, %v9634_v62  ;;  %1440 = vadd.xlane.f32.xlu0 %v1378_v7  ;;  %v9636_v0 = vmax.f32 %v6098_v25, 1e-10  ;;  %v9637_v7 = vld [vmem:[#allocation18_spill] sm:$0xff] }
 0x221   :  { %v1871_v50 = vsub.f32 1.0, %v9629_v45  ;;  %4369 = vrsqrt.f32 %v9630_v47  ;;  %v721_v49 = vmul.f32 %v9631_v30, %v9631_v30  ;;  %v6260_v45 = vpop.f32.mrb[15].mxu0  ;;  %v1379_v47 = vmul.f32 %v6252_v57, %v6252_v57  ;;  %v6264_v38 = vpop.eup %4353 }
 0x222   :  { %9635 = vst [vmem:[#allocation13_spill] sm:$0xff] %v6260_v45  ;;  %v1943_v30 = vmul.f32 %v4348_v29, %v1821_v28  ;;  %4371 = vrcp.f32 %v1854_v40  ;;  %v6270_v13 = vmul.f32 %v6232_v58, %v9636_v0  ;;  %v6272_v21 = vpop.eup %4355  ;;  %v6276_v34 = vmul.f32 %v722_v27, %v9637_v7  ;;  %v9639_v40 = vld [vmem:[#allocation20_spill] sm:$0xff] }
 0x223   :  { %4373 = vlog2.f32 %v1909_v11  ;;  %v729_v57 = vmul.f32 %v5645_v2, %v5645_v2  ;;  %1442 = vadd.xlane.f32.xlu1 %v1379_v47  ;;  %v6280_v28 = vpop.eup %4357  ;;  %v9638_v25 = vclamps-f32 %v6211_v22, 0.99999  ;;  %v6285_v0 = vmul.f32 %v721_v49, %v9639_v40  ;;  %v9641_v47 = vld [vmem:[#allocation23_spill] sm:$0xff]  ;;  %v6320_v40 = vpop.f32.mrb[12].mxu1 }
 0x224   :  { %4375 = vrcp.f32 %v1871_v50  ;;  %v6288_v11 = vmul.f32 0.5, %v6106_v16  ;;  %v6290_v62 = vpop.eup %4359  ;;  %v9640_v27 = vmax.f32 %v6217_v1, 1e-10  ;;  %v6296_v7 = vmul.f32 %v730_v60, %v9641_v47  ;;  %v9645_v60 = vld [vmem:[#allocation25_spill] sm:$0xff]  ;;  %9647 = vst [vmem:[#allocation34_spill] sm:$0xff] %v6320_v40 }
 0x225   :  { %v1870_v29 = vsub.f32 1.0, %v9638_v25  ;;  %v6299_v50 = vmul.f32 0.5, %v6103_v32  ;;  %v4362_v25 = vpop.eup %4361  ;;  %v6301_v15 = vmul.f32 0.6931472, %v4352_v59  ;;  %v9643_v16 = vclamps-f32 %v6226_v26, 0.99999 }
 0x226   :  { %4377 = vrsqrt.f32 %v9640_v27  ;;  %v4364_v58 = vpop.eup %4363  ;;  %v9644_v27 = vmax.f32 %v6237_v63, 1e-10  ;;  %v6310_v47 = vmul.f32 %v729_v57, %v9645_v60  ;;  %v6313_v32 = vmul.f32 0.5, %v6112_v51  ;;  %v6332_v60 = vpop.f32.mrb[13].mxu1 }
 0x227   :  { %9642 = vst [vmem:[#allocation28_spill] sm:$0xff] %v6299_v50  ;;  %4379 = vlog2.f32 %v1943_v30  ;;  %v1857_v49 = vsub.f32 1.0, %v9643_v16  ;;  %v724_v16 = vmul.f32 %v5649_v20, %v5649_v20  ;;  %v9650_v57 = vmax.f32 %v6256_v3, 1e-10  ;;  %9651 = vst [vmem:[#allocation38_spill] sm:$0xff] %v6332_v60  ;;  %v6344_v4 = vpop.f32.mrb[14].mxu1 }
 0x228   :  { %4381 = vrsqrt.f32 %v9644_v27  ;;  %v6323_v27 = vmul.f32 0.5, %v6109_v35  ;;  %v1394_v20 = vmul.f32 %v6320_v40, %v6320_v40  ;;  %v9653_v35 = vclamps-f32 %v6125_v56, 0.99999  ;;  %9656 = vst [vmem:[#allocation20_spill] sm:$0xff] %v6344_v4  ;;  %v6351_v56 = vpop.f32.mrb[15].mxu1 }
 0x229   :  { %v6315_v59 = vpop.eup %4365  ;;  %4383 = vrcp.f32 %v1870_v29  ;;  %v723_v29 = vmul.f32 %v5654_v42, %v5654_v42  ;;  %v9654_v37 = vclamps-f32 %v6132_v33, 0.99999  ;;  %v9657_v42 = vclamps-f32 %v6168_v10, 0.99999  ;;  %9659 = vst [vmem:[#allocation23_spill] sm:$0xff] %v6351_v56 }
 0x22a   :  { %9646 = vst [vmem:[#allocation15_spill] sm:$0xff] %v6315_v59  ;;  %9648 = vst [vmem:[#allocation37_spill] sm:$0xff] %v6323_v27  ;;  %v6325_v2 = vpop.eup %4367  ;;  %4385 = vrsqrt.f32 %v9650_v57  ;;  %v1820_v36 = vadd.f32 1.0, %v9653_v35  ;;  %v9655_v57 = vclamps-f32 %v6270_v13, 0.99999  ;;  %1472 = vadd.xlane.f32.xlu0 %v1394_v20 }
 0x22b   :  { %9649 = vst [vmem:[#allocation14_spill] sm:$0xff] %v6325_v2  ;;  %v6336_v30 = vpop.eup %4369  ;;  %v1807_v61 = vadd.f32 1.0, %v9654_v37  ;;  %4387 = vrcp.f32 %v1857_v49  ;;  %v1806_v53 = vadd.f32 1.0, %v9657_v42  ;;  %v9658_v27 = vmax.f32 %v6276_v34, 1e-10  ;;  %v9662_v42 = vld [vmem:[#allocation24_spill] sm:$0xff] }
 0x22c   :  { %9652 = vst [vmem:[#allocation18_spill] sm:$0xff] %v6336_v30  ;;  %v1856_v51 = vsub.f32 1.0, %v9655_v57  ;;  %v1395_v37 = vmul.f32 %v6344_v4, %v6344_v4  ;;  %v4372_v33 = vpop.eup %4371  ;;  %v1941_v49 = vmul.f32 %v4362_v25, %v1820_v36  ;;  %v9660_v35 = vmax.f32 %v6171_v6, 1e-10  ;;  %v9665_v6 = vld [vmem:[#allocation29_spill] sm:$0xff] }
 0x22d   :  { %4389 = vrsqrt.f32 %v9658_v27  ;;  %v9661_v10 = vmax.f32 %v6285_v0, 1e-10  ;;  %v6363_v27 = vmul.f32 %v724_v16, %v9662_v42  ;;  %v6365_v40 = vpop.eup %4373  ;;  %v9663_v20 = vmax.f32 %v6176_v52, 1e-10 }
 0x22e   :  { %v6358_v57 = vmul.f32 %v6315_v59, %v9660_v35  ;;  %v9664_v36 = vmax.f32 %v6296_v7, 1e-10  ;;  %v6375_v25 = vmul.f32 %v723_v29, %v9665_v6  ;;  %1474 = vadd.xlane.f32.xlu1 %v1395_v37  ;;  %v1376_v35 = vmul.f32 %v6241_v23, %v6241_v23 }
 0x22f   :  { %4391 = vrsqrt.f32 %v9661_v10  ;;  %v6370_v50 = vmul.f32 %v6325_v2, %v9663_v20  ;;  %v4376_v10 = vpop.eup %4375  ;;  %v6380_v16 = vmul.f32 0.6931472, %v6264_v38  ;;  %v1915_v42 = vmul.f32 %v4364_v58, %v1807_v61 }
 0x230   :  { %4393 = vrsqrt.f32 %v9664_v36  ;;  %v9666_v52 = vmax.f32 %v6186_v24, 1e-10  ;;  %v6387_v4 = vpop.eup %4377  ;;  %v6390_v29 = vmul.f32 0.6931472, %v6272_v21  ;;  %v1913_v37 = vmul.f32 %v4372_v33, %v1806_v53  ;;  %1436 = vadd.xlane.f32.xlu0 %v1376_v35 }
 0x231   :  { %4395 = vrcp.f32 %v1856_v51  ;;  %9667 = vst [vmem:[#allocation25_spill] sm:$0xff] %v6387_v4  ;;  %v9668_v36 = vmax.f32 %v6310_v47, 1e-10  ;;  %v1377_v38 = vmul.f32 %v6260_v45, %v6260_v45  ;;  %v6396_v61 = vpop.eup %4379  ;;  %v9669_v24 = vclamps-f32 %v6183_v9, 0.99999 }
 0x232   :  { %v6385_v20 = vmul.f32 %v6336_v30, %v9666_v52  ;;  %v9337_v51 = vclamps-f32 %v6358_v57, 0.99999  ;;  %v6402_v21 = vpop.eup %4381  ;;  %v732_v35 = vmul.f32 %v5661_v44, %v5661_v44  ;;  %v6411_v9 = vmul.f32 0.6931472, %v6280_v28 }
 0x233   :  { %4397 = vrsqrt.f32 %v9668_v36  ;;  %v1823_v58 = vadd.f32 1.0, %v9669_v24  ;;  %9670 = vst [vmem:[#allocation24_spill] sm:$0xff] %v6402_v21  ;;  %1438 = vadd.xlane.f32.xlu1 %v1377_v38  ;;  %v4384_v52 = vpop.eup %4383  ;;  %v9671_v24 = vmax.f32 %v6217_v1, 1e-10  ;;  %v1393_v38 = vmul.f32 %v6351_v56, %v6351_v56 }
 0x234   :  { %4399 = vlog2.f32 %v1941_v49  ;;  %v1392_v49 = vmul.f32 %v6332_v60, %v6332_v60  ;;  %v6419_v33 = vpop.eup %4385  ;;  %v6424_v6 = vmul.f32 0.5, %v6127_v39  ;;  %v1873_v1 = vsub.f32 1.0, %v9337_v51 }
 0x235   :  { %4401 = vlog2.f32 %v1915_v42  ;;  %v6417_v53 = vmul.f32 %v6387_v4, %v9671_v24  ;;  %9672 = vst [vmem:[#allocation29_spill] sm:$0xff] %v6419_v33  ;;  %v1947_v44 = vmul.f32 %v4376_v10, %v1823_v58  ;;  %v4388_v28 = vpop.eup %4387  ;;  %v9673_v42 = vclamps-f32 %v6211_v22, 0.99999  ;;  %v9679_v22 = vld [vmem:[#allocation30_spill] sm:$0xff] }
 0x236   :  { %4403 = vlog2.f32 %v1913_v37  ;;  %1468 = vadd.xlane.f32.xlu0 %v1392_v49  ;;  %v9674_v24 = vmax.f32 %v6237_v63, 1e-10  ;;  %v9675_v10 = vmax.f32 %v6363_v27, 1e-10  ;;  %v9677_v39 = vclamps-f32 %v6370_v50, 0.99999 }
 0x237   :  { %v1822_v36 = vadd.f32 1.0, %v9673_v42  ;;  %v6437_v37 = vpop.eup %4389  ;;  %v9678_v49 = vmax.f32 %v6375_v25, 1e-10  ;;  %v6444_v42 = vmul.f32 %v732_v35, %v9679_v22  ;;  %v731_v63 = vmul.f32 %v5664_v14, %v5664_v14  ;;  %1470 = vadd.xlane.f32.xlu1 %v1393_v38 }
 0x238   :  { %v6433_v60 = vmul.f32 %v6402_v21, %v9674_v24  ;;  %4405 = vrsqrt.f32 %v9675_v10  ;;  %9676 = vst [vmem:[#allocation89_spill] sm:$0xff] %v6437_v37  ;;  %v1872_v58 = vsub.f32 1.0, %v9677_v39  ;;  %v9681_v51 = vclamps-f32 %v6226_v26, 0.99999 }
 0x239   :  { %4407 = vrsqrt.f32 %v9678_v49  ;;  %v6448_v24 = vpop.eup %4391  ;;  %v9682_v56 = vclamps-f32 %v6385_v20, 0.99999  ;;  %v9683_v23 = vmax.f32 %v6256_v3, 1e-10  ;;  %v1945_v14 = vmul.f32 %v4384_v52, %v1822_v36  ;;  %v9689_v36 = vld [vmem:[#allocation31_spill] sm:$0xff] }
 0x23a   :  { %9680 = vst [vmem:[#allocation30_spill] sm:$0xff] %v6448_v24  ;;  %v1809_v10 = vadd.f32 1.0, %v9681_v51  ;;  %v6460_v35 = vpop.eup %4393  ;;  %4409 = vlog2.f32 %v1947_v44  ;;  %v9685_v38 = vclamps-f32 %v6270_v13, 0.99999  ;;  %v726_v26 = vmul.f32 %v5669_v46, %v5669_v46 }
 0x23b   :  { %v1859_v45 = vsub.f32 1.0, %v9682_v56  ;;  %v6458_v49 = vmul.f32 %v6419_v33, %v9683_v23  ;;  %9684 = vst [vmem:[#allocation90_spill] sm:$0xff] %v6460_v35  ;;  %v4396_v51 = vpop.eup %4395  ;;  %4411 = vrcp.f32 %v1873_v1  ;;  %v9342_v56 = vclamps-f32 %v6433_v60, 0.99999 }
 0x23c   :  { %v1808_v22 = vadd.f32 1.0, %v9685_v38  ;;  %v1919_v59 = vmul.f32 %v4388_v28, %v1809_v10  ;;  %v9686_v3 = vmax.f32 %v6276_v34, 1e-10  ;;  %4413 = vrcp.f32 %v1872_v58 }
 0x23d   :  { %v6472_v39 = vpop.eup %4397  ;;  %v9688_v52 = vmax.f32 %v6285_v0, 1e-10  ;;  %v9343_v46 = vmax.f32 %v6444_v42, 1e-10  ;;  %v6481_v44 = vmul.f32 %v731_v63, %v9689_v36  ;;  %4415 = vrcp.f32 %v1859_v45 }
 0x23e   :  { %v6470_v23 = vmul.f32 %v6437_v37, %v9686_v3  ;;  %9687 = vst [vmem:[#allocation91_spill] sm:$0xff] %v6472_v39  ;;  %v6483_v28 = vpop.eup %4399  ;;  %v9690_v34 = vclamps-f32 %v6417_v53, 0.99999  ;;  %v9344_v10 = vclamps-f32 %v6458_v49, 0.99999  ;;  %4417 = vlog2.f32 %v1945_v14  ;;  %v9692_v3 = vld [vmem:[#allocation32_spill] sm:$0xff] }
 0x23f   :  { %v6477_v13 = vmul.f32 %v6448_v24, %v9688_v52  ;;  %v9691_v58 = vmax.f32 %v6296_v7, 1e-10  ;;  %v1917_v38 = vmul.f32 %v4396_v51, %v1808_v22  ;;  %v6494_v52 = vmul.f32 %v726_v26, %v9692_v3  ;;  %v6498_v36 = vpop.eup %4401  ;;  %v9705_v24 = vld [vmem:[#allocation35_spill] sm:$0xff] }
 0x240   :  { %v1858_v1 = vsub.f32 1.0, %v9690_v34  ;;  %v725_v63 = vmul.f32 %v5667_v5, %v5667_v5  ;;  %4419 = vlog2.f32 %v1919_v59  ;;  %v1875_v45 = vsub.f32 1.0, %v9342_v56  ;;  %v6508_v14 = vpop.eup %4403 }
 0x241   :  { %v6491_v0 = vmul.f32 %v6460_v35, %v9691_v58  ;;  %v9345_v34 = vclamps-f32 %v6470_v23, 0.99999  ;;  %v9693_v7 = vmax.f32 %v6310_v47, 1e-10  ;;  %v9346_v22 = vclamps-f32 %v6477_v13, 0.99999 }
 0x242   :  { %4421 = vrsqrt.f32 %v9343_v46  ;;  %v6515_v59 = vmul.f32 0.5, %v6118_v54  ;;  %v6517_v26 = vpop.eup %4405  ;;  %v1874_v47 = vsub.f32 1.0, %v9344_v10  ;;  %v6523_v3 = vmul.f32 0.5, %v6139_v8  ;;  %v9696_v46 = vld [vmem:[#allocation33_spill] sm:$0xff] }
 0x243   :  { %v6506_v58 = vmul.f32 %v6472_v39, %v9693_v7  ;;  %9694 = vst [vmem:[#allocation31_spill] sm:$0xff] %v6517_v26  ;;  %4423 = vrcp.f32 %v1858_v1  ;;  %v6525_v7 = vpop.eup %4407  ;;  %v6529_v5 = vmul.f32 %v725_v63, %v9696_v46  ;;  %v6532_v54 = vmul.f32 0.5, %v6137_v18 }
 0x244   :  { %9695 = vst [vmem:[#allocation32_spill] sm:$0xff] %v6525_v7  ;;  %4425 = vlog2.f32 %v1917_v38  ;;  %v1877_v1 = vsub.f32 1.0, %v9345_v34  ;;  %v734_v8 = vmul.f32 %v5673_v41, %v5673_v41  ;;  %v6539_v51 = vpop.eup %4409  ;;  %v6542_v38 = vmul.f32 0.6931472, %v6290_v62 }
 0x245   :  { %4427 = vrcp.f32 %v1875_v45  ;;  %v1876_v46 = vsub.f32 1.0, %v9346_v22  ;;  %v9697_v18 = vmax.f32 %v6363_v27, 1e-10  ;;  %v9698_v45 = vmax.f32 %v6481_v44, 1e-10  ;;  %v4412_v34 = vpop.eup %4411 }
 0x246   :  { %v9699_v41 = vclamps-f32 %v6491_v0, 0.99999  ;;  %v9700_v56 = vmax.f32 %v6375_v25, 1e-10  ;;  %v6561_v22 = vmul.f32 0.5, %v6380_v16  ;;  %v4414_v27 = vpop.eup %4413  ;;  %v6573_v16 = vmul.f32 %v734_v8, %v9705_v24 }
 0x247   :  { %v6549_v63 = vmul.f32 %v6517_v26, %v9697_v18  ;;  %4429 = vrsqrt.f32 %v9698_v45  ;;  %v9701_v18 = vclamps-f32 %v6358_v57, 0.99999  ;;  %v9702_v39 = vclamps-f32 %v6370_v50, 0.99999  ;;  %v4416_v37 = vpop.eup %4415 }
 0x248   :  { %4431 = vrcp.f32 %v1874_v47  ;;  %v1885_v10 = vsub.f32 1.0, %v9699_v41  ;;  %v6558_v62 = vmul.f32 %v6525_v7, %v9700_v56  ;;  %v9703_v47 = vmax.f32 %v6494_v52, 1e-10 }
 0x249   :  { %v1825_v35 = vadd.f32 1.0, %v9701_v18  ;;  %v1824_v45 = vadd.f32 1.0, %v9702_v39  ;;  %v9704_v25 = vclamps-f32 %v6506_v58, 0.99999  ;;  %v733_v57 = vmul.f32 %v5671_v19, %v5671_v19  ;;  %v6577_v18 = vpop.eup %4417 }
 0x24a   :  { %4433 = vrsqrt.f32 %v9703_v47  ;;  %v9706_v39 = vclamps-f32 %v6385_v20, 0.99999  ;;  %v9352_v47 = vclamps-f32 %v6549_v63, 0.99999  ;;  %v6582_v41 = vpop.eup %4419  ;;  %v6586_v24 = vmul.f32 0.5, %v6301_v15 }
 0x24b   :  { %4435 = vrcp.f32 %v1877_v1  ;;  %v1884_v56 = vsub.f32 1.0, %v9704_v25  ;;  %v1951_v50 = vmul.f32 %v4412_v34, %v1825_v35  ;;  %v1949_v1 = vmul.f32 %v4414_v27, %v1824_v45  ;;  %v9709_v27 = vld [vmem:[#allocation36_spill] sm:$0xff] }
 0x24c   :  { %v1811_v26 = vadd.f32 1.0, %v9706_v39  ;;  %4437 = vrcp.f32 %v1876_v46  ;;  %v9353_v25 = vclamps-f32 %v6558_v62, 0.99999  ;;  %v6588_v8 = vpop.eup %4421  ;;  %v9708_v35 = vmax.f32 %v6529_v5, 1e-10 }
 0x24d   :  { %4439 = vrcp.f32 %v1885_v10  ;;  %9707 = vst [vmem:[#allocation33_spill] sm:$0xff] %v6588_v8  ;;  %v6593_v20 = vmul.f32 0.5, %v6411_v9  ;;  %v6596_v34 = vmul.f32 0.5, %v6390_v29  ;;  %v4424_v46 = vpop.eup %4423  ;;  %v9355_v10 = vmax.f32 %v6573_v16, 1e-10 }
 0x24e   :  { %v1923_v19 = vmul.f32 %v4416_v37, %v1811_v26  ;;  %4441 = vrsqrt.f32 %v9708_v35  ;;  %v6600_v45 = vmul.f32 %v733_v57, %v9709_v27  ;;  %v6603_v15 = vmul.f32 0.5, %v6173_v55  ;;  %v6605_v37 = vpop.eup %4425 }
 0x24f   :  { %4443 = vrcp.f32 %v1884_v56  ;;  %v9710_v26 = vclamps-f32 %v6417_v53, 0.99999  ;;  %v1879_v29 = vsub.f32 1.0, %v9352_v47  ;;  %v6612_v39 = vmul.f32 0.5, %v6163_v31  ;;  %v4428_v56 = vpop.eup %4427 }
 0x250   :  { %4445 = vlog2.f32 %v1951_v50  ;;  %v1878_v57 = vsub.f32 1.0, %v9353_v25  ;;  %v9711_v55 = vmax.f32 %v6444_v42, 1e-10  ;;  %v6622_v50 = vmul.f32 0.5, %v6196_v48 }
 0x251   :  { %v1810_v9 = vadd.f32 1.0, %v9710_v26  ;;  %4447 = vlog2.f32 %v1949_v1  ;;  %v6624_v53 = vpop.eup %4429  ;;  %v2005_v27 = vmul.f32 0.6931472, %v6365_v40  ;;  %v9713_v26 = vclamps-f32 %v6433_v60, 0.99999 }
 0x252   :  { %v6619_v35 = vmul.f32 %v6588_v8, %v9711_v55  ;;  %9712 = vst [vmem:[#allocation35_spill] sm:$0xff] %v6624_v53  ;;  %4449 = vlog2.f32 %v1923_v19  ;;  %v4432_v47 = vpop.eup %4431  ;;  %v2039_v25 = vmul.f32 0.6931472, %v6396_v61  ;;  %v2009_v42 = vmul.f32 0.6931472, %v6508_v14 }
 0x253   :  { %v1921_v31 = vmul.f32 %v4424_v46, %v1810_v9  ;;  %v1827_v1 = vadd.f32 1.0, %v9713_v26  ;;  %4451 = vrsqrt.f32 %v9355_v10  ;;  %v2011_v8 = vmul.f32 0.6931472, %v6498_v36 }
 0x254   :  { %v6634_v55 = vpop.eup %4433  ;;  %v9715_v19 = vclamps-f32 %v6458_v49, 0.99999  ;;  %4453 = vrcp.f32 %v1879_v29  ;;  %v2037_v9 = vmul.f32 0.6931472, %v6483_v28  ;;  %v9357_v61 = vclamps-f32 %v6619_v35, 0.99999 }
 0x255   :  { %9714 = vst [vmem:[#allocation36_spill] sm:$0xff] %v6634_v55  ;;  %v1955_v40 = vmul.f32 %v4428_v56, %v1827_v1  ;;  %v4436_v60 = vpop.eup %4435  ;;  %4455 = vrcp.f32 %v1878_v57  ;;  %v9716_v14 = vmax.f32 %v6481_v44, 1e-10  ;;  %v9717_v36 = vclamps-f32 %v6470_v23, 0.99999 }
 0x256   :  { %v1826_v46 = vadd.f32 1.0, %v9715_v19  ;;  %v4438_v10 = vpop.eup %4437  ;;  %4457 = vlog2.f32 %v1921_v31  ;;  %v6649_v49 = vmul.f32 0.5, %v6190_v43  ;;  %v9719_v28 = vmax.f32 %v6494_v52, 1e-10 }
 0x257   :  { %v6644_v26 = vmul.f32 %v6624_v53, %v9716_v14  ;;  %v1829_v56 = vadd.f32 1.0, %v9717_v36  ;;  %v4440_v29 = vpop.eup %4439  ;;  %v9720_v44 = vmax.f32 %v6600_v45, 1e-10  ;;  %v6658_v1 = vmul.f32 0.5, %v2009_v42 }
 0x258   :  { %v1953_v48 = vmul.f32 %v4432_v47, %v1826_v46  ;;  %9718 = vst [vmem:[#allocation92_spill] sm:$0xff] %v6649_v49  ;;  %v6654_v57 = vmul.f32 %v6634_v55, %v9719_v28  ;;  %v6660_v19 = vmul.f32 0.5, %v2005_v27  ;;  %v6662_v47 = vpop.eup %4441  ;;  %v9724_v43 = vclamps-f32 %v6477_v13, 0.99999  ;;  %v6666_v46 = vpop.f32.mrb[16].mxu0 }
 0x259   :  { %4459 = vrsqrt.f32 %v9720_v44  ;;  %9721 = vst [vmem:[#allocation93_spill] sm:$0xff] %v6658_v1  ;;  %9723 = vst [vmem:[#allocation95_spill] sm:$0xff] %v6662_v47  ;;  %v1959_v23 = vmul.f32 %v4436_v60, %v1829_v56  ;;  %v6668_v52 = vmul.f32 0.5, %v2011_v8  ;;  %v4444_v14 = vpop.eup %4443  ;;  %v9727_v36 = vclamps-f32 %v6491_v0, 0.99999  ;;  %v6675_v44 = vpop.f32.mrb[17].mxu0 }
 0x25a   :  { %9722 = vst [vmem:[#allocation94_spill] sm:$0xff] %v6660_v19  ;;  %4461 = vlog2.f32 %v1955_v40  ;;  %v1828_v31 = vadd.f32 1.0, %v9724_v43  ;;  %9725 = vst [vmem:[#allocation96_spill] sm:$0xff] %v6666_v46  ;;  %v1887_v42 = vsub.f32 1.0, %v9357_v61  ;;  %v1398_v40 = vmul.f32 %v6666_v46, %v6666_v46  ;;  %v4446_v13 = vpop.eup %4445  ;;  %v6682_v0 = vpop.f32.mrb[18].mxu0 }
 0x25b   :  { %9726 = vst [vmem:[#allocation97_spill] sm:$0xff] %v6668_v52  ;;  %v1837_v28 = vadd.f32 1.0, %v9727_v36  ;;  %9728 = vst [vmem:[#allocation98_spill] sm:$0xff] %v6675_v44  ;;  %v2043_v60 = vmul.f32 0.6931472, %v6539_v51  ;;  %4463 = vlog2.f32 %v1953_v48  ;;  %v4448_v36 = vpop.eup %4447  ;;  %v6690_v46 = vpop.f32.mrb[19].mxu0  ;;  %v1399_v51 = vmul.f32 %v6682_v0, %v6682_v0 }
 0x25c   :  { %v1957_v8 = vmul.f32 %v4438_v10, %v1828_v31  ;;  %v9729_v56 = vclamps-f32 %v6506_v58, 0.99999  ;;  %9730 = vst [vmem:[#allocation99_spill] sm:$0xff] %v6682_v0  ;;  %v9360_v61 = vclamps-f32 %v6654_v57, 0.99999  ;;  %1480 = vadd.xlane.f32.xlu0 %v1398_v40  ;;  %9732 = vst [vmem:[#allocation100_spill] sm:$0xff] %v6690_v46  ;;  %v4450_v10 = vpop.eup %4449  ;;  %4465 = vlog2.f32 %v1959_v23 }
 0x25d   :  { %v1975_v55 = vmul.f32 %v4440_v29, %v1837_v28  ;;  %v9731_v27 = vmax.f32 %v6529_v5, 1e-10  ;;  %v6695_v48 = vmul.f32 0.5, %v6542_v38  ;;  %v6697_v29 = vmul.f32 0.5, %v2037_v9  ;;  %v6699_v31 = vpop.eup %4451  ;;  %1482 = vadd.xlane.f32.xlu1 %v1399_v51  ;;  %v6716_v51 = vpop.xlane.xlu0 %1416 }
 0x25e   :  { %v1836_v43 = vadd.f32 1.0, %v9729_v56  ;;  %9735 = vst [vmem:[#allocation103_spill] sm:$0xff] %v6699_v31  ;;  %v2041_v5 = vmul.f32 0.6931472, %v6577_v18  ;;  %4467 = vrcp.f32 %v1887_v42  ;;  %v9736_v28 = vclamps-f32 %v6644_v26, 0.99999  ;;  %v4454_v56 = vpop.eup %4453 }
 0x25f   :  { %v6688_v53 = vmul.f32 %v6662_v47, %v9731_v27  ;;  %9733 = vst [vmem:[#allocation101_spill] sm:$0xff] %v6695_v48  ;;  %9734 = vst [vmem:[#allocation102_spill] sm:$0xff] %v6697_v29  ;;  %v6704_v40 = vmul.f32 0.5, %v2039_v25  ;;  %v2015_v23 = vmul.f32 0.6931472, %v6582_v41  ;;  %4469 = vlog2.f32 %v1957_v8  ;;  %v6729_v25 = vpop.xlane.xlu1 %1418 }
 0x260   :  { %v1973_v58 = vmul.f32 %v4444_v14, %v1836_v43  ;;  %v1886_v27 = vsub.f32 1.0, %v9736_v28  ;;  %v728_v38 = vmul.f32 %v5685_v12, %v5685_v12  ;;  %v6709_v9 = vmul.f32 0.5, %v2043_v60  ;;  %v4456_v14 = vpop.eup %4455 }
 0x261   :  { %9737 = vst [vmem:[#allocation104_spill] sm:$0xff] %v6704_v40  ;;  %4471 = vlog2.f32 %v1975_v55  ;;  %v9739_v18 = vclamps-f32 %v6549_v63, 0.99999  ;;  %v1881_v43 = vsub.f32 1.0, %v9360_v61  ;;  %v4458_v28 = vpop.eup %4457  ;;  %v9740_v41 = vclamps-f32 %v6558_v62, 0.99999 }
 0x262   :  { %9738 = vst [vmem:[#allocation105_spill] sm:$0xff] %v6709_v9  ;;  %4473 = vlog2.f32 %v1973_v58  ;;  %v9741_v12 = vmax.f32 %v6573_v16, 1e-10  ;;  %v1510_v63 = vmax.f32 %v6716_v51, 1e-30  ;;  %v6731_v47 = vmul.f32 0.5, %v2041_v5 }
 0x263   :  { %v1831_v42 = vadd.f32 1.0, %v9739_v18  ;;  %v1830_v8 = vadd.f32 1.0, %v9740_v41  ;;  %v6726_v55 = vpop.eup %4459  ;;  %v2013_v18 = vmul.f32 0.6931472, %v6605_v37  ;;  %4475 = vrcp.f32 %v1886_v27  ;;  %v9744_v41 = vld [vmem:[#allocation39_spill] sm:$0xff]  ;;  %v9784_v9 = vld [vmem:[#allocation28_spill] sm:$0xff] }
 0x264   :  { %v6723_v60 = vmul.f32 %v6699_v31, %v9741_v12  ;;  %9742 = vst [vmem:[#allocation106_spill] sm:$0xff] %v6726_v55  ;;  %9743 = vst [vmem:[#allocation107_spill] sm:$0xff] %v6731_v47  ;;  %v4462_v58 = vpop.eup %4461  ;;  %v6734_v0 = vmul.f32 %v728_v38, %v9744_v41  ;;  %4477 = vrsqrt.f32 %v1510_v63  ;;  %v1511_v16 = vmax.f32 %v6729_v25, 1e-30 }
 0x265   :  { %v1963_v61 = vmul.f32 %v4454_v56, %v1831_v42  ;;  %v1961_v62 = vmul.f32 %v4456_v14, %v1830_v8  ;;  %v6737_v12 = vmul.f32 0.6931472, %v4446_v13  ;;  %4479 = vrcp.f32 %v1881_v43  ;;  %v6741_v56 = vpop.f32.mrb[16].mxu1  ;;  %v6745_v5 = vpop.eup %4463 }
 0x266   :  { %v9745_v31 = vclamps-f32 %v6688_v53, 0.99999  ;;  %9746 = vst [vmem:[#allocation39_spill] sm:$0xff] %v6741_v56  ;;  %v6743_v27 = vmul.f32 0.5, %v2015_v23  ;;  %v9748_v38 = vmax.f32 %v6600_v45, 1e-10  ;;  %v1406_v13 = vmul.f32 %v6741_v56, %v6741_v56  ;;  %v6764_v45 = vpop.eup %4465 }
 0x267   :  { %v6753_v8 = vpop.f32.mrb[17].mxu1  ;;  %4481 = vrsqrt.f32 %v1511_v16  ;;  %v2019_v43 = vmul.f32 0.6931472, %v4450_v10  ;;  %v6762_v41 = vmul.f32 0.5, %v2013_v18  ;;  %v6771_v10 = vpop.xlane.xlu1 %1450  ;;  %v2017_v56 = vmul.f32 0.6931472, %v4458_v28 }
 0x268   :  { %v1880_v37 = vsub.f32 1.0, %v9745_v31  ;;  %9747 = vst [vmem:[#allocation108_spill] sm:$0xff] %v6743_v27  ;;  %v6751_v42 = vmul.f32 %v6726_v55, %v9748_v38  ;;  %9749 = vst [vmem:[#allocation109_spill] sm:$0xff] %v6753_v8  ;;  %v6757_v31 = vpop.xlane.xlu0 %1448  ;;  %4483 = vlog2.f32 %v1963_v61  ;;  %v6759_v23 = vpop.f32.mrb[18].mxu1  ;;  %v2045_v38 = vmul.f32 0.6931472, %v4448_v36  ;;  %1496 = vadd.xlane.f32.xlu0 %v1406_v13 }
 0x269   :  { %9750 = vst [vmem:[#allocation110_spill] sm:$0xff] %v6759_v23  ;;  %v1526_v63 = vmax.f32 %v6757_v31, 1e-30  ;;  %9751 = vst [vmem:[#allocation111_spill] sm:$0xff] %v6762_v41  ;;  %4485 = vlog2.f32 %v1961_v62  ;;  %v6767_v55 = vpop.f32.mrb[19].mxu1  ;;  %v1407_v16 = vmul.f32 %v6759_v23, %v6759_v23  ;;  %v4468_v61 = vpop.eup %4467  ;;  %v1396_v23 = vmul.f32 %v6675_v44, %v6675_v44 }
 0x26a   :  { %9752 = vst [vmem:[#allocation112_spill] sm:$0xff] %v6767_v55  ;;  %v9753_v7 = vclamps-f32 %v6619_v35, 0.99999  ;;  %v1527_v2 = vmax.f32 %v6771_v10, 1e-30  ;;  %v6776_v36 = vpop.eup %4469  ;;  %v1397_v14 = vmul.f32 %v6690_v46, %v6690_v46  ;;  %v6803_v21 = vmul.f32 0.5, %v2045_v38 }
 0x26b   :  { %4487 = vrsqrt.f32 %v1526_v63  ;;  %v9754_v62 = vclamps-f32 %v6723_v60, 0.99999  ;;  %1498 = vadd.xlane.f32.xlu1 %v1407_v16  ;;  %v6785_v28 = vpop.eup %4471  ;;  %v6788_v63 = vmul.f32 0.5, %v2019_v43  ;;  %v727_v16 = vmul.f32 %v5687_v17, %v5687_v17  ;;  %v6798_v44 = vpop.xlane.xlu1 %1414 }
 0x26c   :  { %v1839_v18 = vadd.f32 1.0, %v9753_v7  ;;  %4489 = vrcp.f32 %v1880_v37  ;;  %v6783_v27 = vpop.xlane.xlu0 %1412  ;;  %v2051_v7 = vmul.f32 0.6931472, %v4462_v58  ;;  %v6790_v37 = vpop.eup %4473  ;;  %1476 = vadd.xlane.f32.xlu0 %v1396_v23  ;;  %v1509_v58 = vmax.f32 %v6798_v44, 1e-30  ;;  %9758 = vst [vmem:[#allocation115_spill] sm:$0xff] %v6803_v21 }
 0x26d   :  { %v1889_v13 = vsub.f32 1.0, %v9754_v62  ;;  %4491 = vrsqrt.f32 %v1527_v2  ;;  %v1508_v35 = vmax.f32 %v6783_v27, 1e-30  ;;  %9755 = vst [vmem:[#allocation113_spill] sm:$0xff] %v6788_v63  ;;  %v9756_v62 = vmax.f32 %v6734_v0, 1e-10  ;;  %v4476_v2 = vpop.eup %4475 }
 0x26e   :  { %v1979_v41 = vmul.f32 %v4468_v61, %v1839_v18  ;;  %v6801_v43 = vmul.f32 0.5, %v2017_v56  ;;  %v6805_v61 = vpop.eup %4477  ;;  %v9759_v18 = vclamps-f32 %v6644_v26, 0.99999  ;;  %v9760_v17 = vclamps-f32 %v6751_v42, 0.99999 }
 0x26f   :  { %4493 = vrsqrt.f32 %v9756_v62  ;;  %1478 = vadd.xlane.f32.xlu1 %v1397_v14  ;;  %v1404_v46 = vmul.f32 %v6753_v8, %v6753_v8  ;;  %v4480_v63 = vpop.eup %4479  ;;  %v9762_v56 = vclamps-f32 %v6654_v57, 0.99999  ;;  %v1606_v21 = vmul.f32 %v6805_v61, %v6716_v51  ;;  %v9763_v14 = vld [vmem:[#allocation40_spill] sm:$0xff]  ;;  %v6827_v33 = vpop.xlane.xlu1 %1446 }
 0x270   :  { %4495 = vrsqrt.f32 %v1508_v35  ;;  %9757 = vst [vmem:[#allocation114_spill] sm:$0xff] %v6801_v43  ;;  %v1838_v62 = vadd.f32 1.0, %v9759_v18  ;;  %v1888_v23 = vsub.f32 1.0, %v9760_v17  ;;  %v6813_v35 = vpop.xlane.xlu0 %1444  ;;  %v6823_v17 = vmul.f32 %v727_v16, %v9763_v14  ;;  %9765 = vst [vmem:[#allocation117_spill] sm:$0xff] %v6827_v33 }
 0x271   :  { %4497 = vrcp.f32 %v1889_v13  ;;  %9761 = vst [vmem:[#allocation116_spill] sm:$0xff] %v6813_v35  ;;  %v1833_v38 = vadd.f32 1.0, %v9762_v56  ;;  %v1524_v26 = vmax.f32 %v6813_v35, 1e-30  ;;  %v6820_v13 = vpop.eup %4481  ;;  %1492 = vadd.xlane.f32.xlu0 %v1404_v46  ;;  %v1405_v8 = vmul.f32 %v6767_v55, %v6767_v55  ;;  %v9766_v56 = vld [vmem:[#allocation59_spill] sm:$0xff] }
 0x272   :  { %4499 = vrsqrt.f32 %v1509_v58  ;;  %v1977_v18 = vmul.f32 %v4476_v2, %v1838_v62  ;;  %9764 = vst [vmem:[#allocation40_spill] sm:$0xff] %v6823_v17  ;;  %v6829_v57 = vpop.eup %4483  ;;  %v1654_v43 = vmul.f32 %v9766_v56, %v1606_v21  ;;  %v1607_v58 = vmul.f32 %v6820_v13, %v6729_v25  ;;  %v9768_v56 = vld [vmem:[#allocation57_spill] sm:$0xff] }
 0x273   :  { %4501 = vlog2.f32 %v1979_v41  ;;  %v1525_v41 = vmax.f32 %v6827_v33, 1e-30  ;;  %v6835_v2 = vpop.eup %4485  ;;  %v2049_v16 = vmul.f32 0.6931472, %v6745_v5  ;;  %v1967_v46 = vmul.f32 %v4480_v63, %v1833_v38  ;;  %1494 = vadd.xlane.f32.xlu1 %v1405_v8  ;;  %v6851_v63 = vpop.xlane.xlu1 %1426 }
 0x274   :  { %4503 = vrsqrt.f32 %v1524_v26  ;;  %v6838_v62 = vpop.xlane.xlu0 %1424  ;;  %v6841_v14 = vmul.f32 0.5, %v6737_v12  ;;  %v2134_v21 = vmul.f32 %v6424_v6, %v1654_v43  ;;  %v1655_v26 = vmul.f32 %v9768_v56, %v1607_v58 }
 0x275   :  { %4505 = vrcp.f32 %v1888_v23  ;;  %v6843_v55 = vpop.eup %4487  ;;  %v1514_v30 = vmax.f32 %v6838_v62, 1e-30  ;;  %v6853_v12 = vmul.f32 0.5, %v2051_v7  ;;  %v9770_v6 = vclamps-f32 %v6688_v53, 0.99999 }
 0x276   :  { %9767 = vst [vmem:[#allocation59_spill] sm:$0xff] %v6841_v14  ;;  %4507 = vrsqrt.f32 %v1525_v41  ;;  %v4490_v4 = vpop.eup %4489  ;;  %v1622_v8 = vmul.f32 %v6843_v55, %v6757_v31  ;;  %v3760_v38 = vclamps-f32 %v2134_v21, 15.0  ;;  %v2135_v58 = vmul.f32 %v6515_v59, %v1655_v26 }
 0x277   :  { %4509 = vlog2.f32 %v1977_v18  ;;  %9769 = vst [vmem:[#allocation57_spill] sm:$0xff] %v6853_v12  ;;  %v6855_v23 = vpop.eup %4491  ;;  %v1832_v43 = vadd.f32 1.0, %v9770_v6  ;;  %v9772_v18 = vld [vmem:[#allocation63_spill] sm:$0xff]  ;;  %v6867_v7 = vmul.f32 0.5, %v2049_v16  ;;  %v2055_v53 = vmul.f32 0.6931472, %v6764_v45 }
 0x278   :  { %4511 = vrsqrt.f32 %v1514_v30  ;;  %v1670_v56 = vmul.f32 %v9772_v18, %v1622_v8  ;;  %v1623_v5 = vmul.f32 %v6855_v23, %v6771_v10  ;;  %v6865_v14 = vpop.xlane.xlu0 %1456  ;;  %v3761_v59 = vclamps-f32 %v2135_v58, 15.0  ;;  %v9775_v8 = vld [vmem:[#allocation61_spill] sm:$0xff]  ;;  %v9777_v58 = vld [vmem:[#allocation54_spill] sm:$0xff] }
 0x279   :  { %v6860_v41 = vpop.eup %4493  ;;  %4513 = vlog2.f32 %v1967_v46  ;;  %9773 = vst [vmem:[#allocation63_spill] sm:$0xff] %v6867_v7  ;;  %v1965_v21 = vmul.f32 %v4490_v4, %v1832_v43  ;;  %v9774_v46 = vmax.f32 %v6823_v17, 1e-10  ;;  %v2053_v7 = vmul.f32 0.6931472, %v6776_v36 }
 0x27a   :  { %9771 = vst [vmem:[#allocation118_spill] sm:$0xff] %v6860_v41  ;;  %v6869_v12 = vpop.eup %4495  ;;  %4515 = vtanh.f32 %v3760_v38  ;;  %v2150_v26 = vmul.f32 %v6523_v3, %v1670_v56  ;;  %v1671_v6 = vmul.f32 %v9775_v8, %v1623_v5  ;;  %v6884_v4 = vmul.f32 0.6931472, %v6785_v28 }
 0x27b   :  { %v6872_v30 = vpop.eup %4497  ;;  %4517 = vrsqrt.f32 %v9774_v46  ;;  %v1604_v16 = vmul.f32 %v6869_v12, %v6783_v27  ;;  %v1515_v45 = vmax.f32 %v6851_v63, 1e-30  ;;  %v6893_v46 = vpop.xlane.xlu1 %1458  ;;  %v6898_v36 = vmul.f32 0.6931472, %v6790_v37 }
 0x27c   :  { %v6880_v18 = vpop.eup %4499  ;;  %9776 = vst [vmem:[#allocation61_spill] sm:$0xff] %v6884_v4  ;;  %4519 = vtanh.f32 %v3761_v59  ;;  %v3776_v38 = vclamps-f32 %v2150_v26, 15.0  ;;  %v2151_v3 = vmul.f32 %v6532_v54, %v1671_v6  ;;  %v9778_v28 = vmax.f32 %v6734_v0, 1e-10  ;;  %v6910_v29 = vpop.xlane.xlu0 %1420 }
 0x27d   :  { %v6887_v43 = vpop.eup %4501  ;;  %v1652_v5 = vmul.f32 %v9777_v58, %v1604_v16  ;;  %v1605_v56 = vmul.f32 %v6880_v18, %v6798_v44  ;;  %4521 = vlog2.f32 %v1965_v21  ;;  %v1530_v54 = vmax.f32 %v6865_v14, 1e-30  ;;  %v9779_v58 = vld [vmem:[#allocation56_spill] sm:$0xff] }
 0x27e   :  { %v6895_v8 = vpop.eup %4503  ;;  %v6903_v59 = vmul.f32 %v6860_v41, %v9778_v28  ;;  %4523 = vtanh.f32 %v3776_v38  ;;  %v3777_v6 = vclamps-f32 %v2151_v3, 15.0  ;;  %v2059_v21 = vmul.f32 0.6931472, %v6829_v57  ;;  %v9781_v57 = vld [vmem:[#allocation53_spill] sm:$0xff] }
 0x27f   :  { %v6906_v26 = vpop.eup %4505  ;;  %v2132_v16 = vmul.f32 %v6288_v11, %v1652_v5  ;;  %v1653_v40 = vmul.f32 %v9779_v58, %v1605_v56  ;;  %v1620_v0 = vmul.f32 %v6895_v8, %v6813_v35  ;;  %4525 = vrsqrt.f32 %v1515_v45 }
 0x280   :  { %v6912_v37 = vpop.eup %4507  ;;  %v1531_v28 = vmax.f32 %v6893_v46, 1e-30  ;;  %4527 = vtanh.f32 %v3777_v6  ;;  %v1512_v45 = vmax.f32 %v6910_v29, 1e-30  ;;  %v9783_v6 = vld [vmem:[#allocation55_spill] sm:$0xff]  ;;  %v6934_v52 = vmul.f32 0.5, %v2059_v21 }
 0x281   :  { %v6918_v41 = vpop.eup %4509  ;;  %v3758_v38 = vclamps-f32 %v2132_v16, 15.0  ;;  %v2133_v11 = vmul.f32 %v6313_v32, %v1653_v40  ;;  %v1621_v3 = vmul.f32 %v6912_v37, %v6827_v33  ;;  %v1668_v58 = vmul.f32 %v9781_v57, %v1620_v0 }
 0x282   :  { %9780 = vst [vmem:[#allocation54_spill] sm:$0xff] %v6918_v41  ;;  %v6923_v5 = vpop.eup %4511  ;;  %4529 = vrsqrt.f32 %v1530_v54  ;;  %9785 = vst [vmem:[#allocation53_spill] sm:$0xff] %v6934_v52  ;;  %v6936_v56 = vmul.f32 0.5, %v2053_v7  ;;  %v6946_v57 = vmul.f32 0.5, %v2055_v53  ;;  %v9791_v21 = vclamps-f32 %v6903_v59, 0.99999 }
 0x283   :  { %v6928_v48 = vpop.eup %4513  ;;  %4531 = vtanh.f32 %v3758_v38  ;;  %v3759_v19 = vclamps-f32 %v2133_v11, 15.0  ;;  %v1669_v16 = vmul.f32 %v9783_v6, %v1621_v3  ;;  %v1610_v32 = vmul.f32 %v6923_v5, %v6838_v62  ;;  %v9788_v38 = vld [vmem:[#allocation37_spill] sm:$0xff]  ;;  %v6944_v3 = vpop.xlane.xlu1 %1422 }
 0x284   :  { %9782 = vst [vmem:[#allocation56_spill] sm:$0xff] %v6928_v48  ;;  %v4516_v40 = vpop.eup %4515  ;;  %v2148_v47 = vmul.f32 %v9784_v9, %v1668_v58  ;;  %4533 = vrsqrt.f32 %v1531_v28  ;;  %9786 = vst [vmem:[#allocation55_spill] sm:$0xff] %v6936_v56  ;;  %v2057_v9 = vmul.f32 0.6931472, %v6835_v2  ;;  %v1883_v28 = vsub.f32 1.0, %v9791_v21  ;;  %v6963_v21 = vpop.f32.mrb[20].mxu0 }
 0x285   :  { %v6938_v54 = vpop.eup %4517  ;;  %v6941_v0 = vmul.f32 %v4516_v40, %v6805_v61  ;;  %4535 = vtanh.f32 %v3759_v19  ;;  %v2149_v11 = vmul.f32 %v9788_v38, %v1669_v16  ;;  %9789 = vst [vmem:[#allocation37_spill] sm:$0xff] %v6944_v3  ;;  %9790 = vst [vmem:[#allocation119_spill] sm:$0xff] %v6946_v57  ;;  %v9792_v16 = vld [vmem:[#allocation74_spill] sm:$0xff]  ;;  %v9794_v53 = vclamps-f32 %v6723_v60, 0.99999  ;;  %v6966_v52 = vpop.f32.mrb[21].mxu0 }
 0x286   :  { %9787 = vst [vmem:[#allocation28_spill] sm:$0xff] %v6938_v54  ;;  %v4520_v6 = vpop.eup %4519  ;;  %v3774_v7 = vclamps-f32 %v2148_v47, 15.0  ;;  %4537 = vrsqrt.f32 %v1512_v45  ;;  %v1658_v40 = vmul.f32 %v9792_v16, %v1610_v32  ;;  %v9795_v2 = vclamps-f32 %v6751_v42, 0.99999  ;;  %9796 = vst [vmem:[#allocation120_spill] sm:$0xff] %v6963_v21 }
 0x287   :  { %v2374_v58 = vmul.f32 %v6941_v0, %v6941_v0  ;;  %v6954_v61 = vmul.f32 %v4520_v6, %v6820_v13  ;;  %v3775_v19 = vclamps-f32 %v2149_v11, 15.0  ;;  %v6957_v38 = vpop.eup %4521  ;;  %v1841_v57 = vadd.f32 1.0, %v9794_v53  ;;  %9797 = vst [vmem:[#allocation121_spill] sm:$0xff] %v6966_v52  ;;  %v6977_v11 = vpop.f32.mrb[22].mxu0 }
 0x288   :  { %9793 = vst [vmem:[#allocation74_spill] sm:$0xff] %v6957_v38  ;;  %v1840_v56 = vadd.f32 1.0, %v9795_v2  ;;  %4539 = vtanh.f32 %v3774_v7  ;;  %v1513_v47 = vmax.f32 %v6944_v3, 1e-30  ;;  %v4524_v45 = vpop.eup %4523  ;;  %v1402_v13 = vmul.f32 %v6963_v21, %v6963_v21  ;;  %9798 = vst [vmem:[#allocation122_spill] sm:$0xff] %v6977_v11 }
 0x289   :  { %v6971_v32 = vmul.f32 %v2374_v58, %v6716_v51  ;;  %v2375_v60 = vmul.f32 %v6954_v61, %v6954_v61  ;;  %4541 = vtanh.f32 %v3775_v19  ;;  %v6975_v42 = vpop.eup %4525  ;;  %v6980_v6 = vmul.f32 %v4524_v45, %v6843_v55  ;;  %v6987_v58 = vpop.f32.mrb[23].mxu0 }
 0x28a   :  { %4543 = vrcp.f32 %v1883_v28  ;;  %v6982_v7 = vmul.f32 0.5, %v2057_v9  ;;  %v6985_v16 = vmul.f32 0.5, %v6898_v36  ;;  %v4528_v53 = vpop.eup %4527  ;;  %1488 = vadd.xlane.f32.xlu0 %v1402_v13  ;;  %9801 = vst [vmem:[#allocation125_spill] sm:$0xff] %v6987_v58  ;;  %v1403_v19 = vmul.f32 %v6977_v11, %v6977_v11 }
 0x28b   :  { %v6993_v28 = vmul.f32 %v2375_v60, %v6729_v25  ;;  %v2138_v55 = vmul.f32 %v6561_v22, %v1658_v40  ;;  %v1983_v9 = vmul.f32 %v6872_v30, %v1841_v57  ;;  %v2390_v36 = vmul.f32 %v6980_v6, %v6980_v6 }
 0x28c   :  { %9799 = vst [vmem:[#allocation123_spill] sm:$0xff] %v6982_v7  ;;  %9800 = vst [vmem:[#allocation124_spill] sm:$0xff] %v6985_v16  ;;  %v6996_v45 = vpop.eup %4529  ;;  %v7002_v13 = vmul.f32 %v4528_v53, %v6855_v23  ;;  %4545 = vrsqrt.f32 %v1513_v47  ;;  %1490 = vadd.xlane.f32.xlu1 %v1403_v19  ;;  %v1400_v2 = vmul.f32 %v6966_v52, %v6966_v52  ;;  %v9802_v60 = vmax.f32 %v6971_v32, 1e-10  ;;  %v7022_v19 = vpop.xlane.xlu0 %1452 }
 0x28d   :  { %v4532_v21 = vpop.eup %4531  ;;  %v1611_v30 = vmul.f32 %v6975_v42, %v6851_v63  ;;  %v1981_v40 = vmul.f32 %v6906_v26, %v1840_v56  ;;  %v7015_v23 = vmul.f32 %v2390_v36, %v6757_v31  ;;  %9803 = vst [vmem:[#allocation126_spill] sm:$0xff] %v7022_v19  ;;  %v1401_v22 = vmul.f32 %v6987_v58, %v6987_v58 }
 0x28e   :  { %4547 = vrsqrt.f32 %v9802_v60  ;;  %v7011_v57 = vpop.eup %4533  ;;  %v2391_v47 = vmul.f32 %v7002_v13, %v7002_v13  ;;  %v7020_v53 = vmul.f32 %v4532_v21, %v6869_v12  ;;  %1484 = vadd.xlane.f32.xlu0 %v1400_v2  ;;  %v9804_v52 = vmax.f32 %v6993_v28, 1e-10  ;;  %v9805_v2 = vld [vmem:[#allocation43_spill] sm:$0xff] }
 0x28f   :  { %v4536_v60 = vpop.eup %4535  ;;  %v3764_v26 = vclamps-f32 %v2138_v55, 15.0  ;;  %v1626_v56 = vmul.f32 %v6996_v45, %v6865_v14  ;;  %v9806_v55 = vld [vmem:[#allocation73_spill] sm:$0xff]  ;;  %v1627_v7 = vmul.f32 %v7011_v57, %v6893_v46  ;;  %v1528_v11 = vmax.f32 %v7022_v19, 1e-30 }
 0x290   :  { %4549 = vrsqrt.f32 %v9804_v52  ;;  %v7030_v36 = vpop.eup %4537  ;;  %v7034_v12 = vmul.f32 %v2391_v47, %v6771_v10  ;;  %v2372_v21 = vmul.f32 %v7020_v53, %v7020_v53  ;;  %v7039_v58 = vmul.f32 %v4536_v60, %v6880_v18  ;;  %1486 = vadd.xlane.f32.xlu1 %v1401_v22 }
 0x291   :  { %v736_v52 = vmul.f32 %v9805_v2, %v9805_v2  ;;  %v1659_v16 = vmul.f32 %v9806_v55, %v1611_v30  ;;  %v9807_v47 = vmax.f32 %v7015_v23, 1e-10  ;;  %v9809_v2 = vld [vmem:[#allocation76_spill] sm:$0xff]  ;;  %v1608_v49 = vmul.f32 %v7030_v36, %v6910_v29 }
 0x292   :  { %v4540_v38 = vpop.eup %4539  ;;  %v2487_v1 = vmax.f32 %v7034_v12, 1e-10  ;;  %v7051_v18 = vmul.f32 %v2372_v21, %v6783_v27  ;;  %v2373_v60 = vmul.f32 %v7039_v58, %v7039_v58  ;;  %v1674_v55 = vmul.f32 %v9809_v2, %v1626_v56 }
 0x293   :  { %4551 = vrsqrt.f32 %v9807_v47  ;;  %v4542_v22 = vpop.eup %4541  ;;  %v7056_v30 = vmul.f32 %v4540_v38, %v6895_v8  ;;  %v2139_v38 = vmul.f32 %v6586_v24, %v1659_v16  ;;  %v9816_v16 = vld [vmem:[#allocation70_spill] sm:$0xff]  ;;  %vm3382_vm8 = vcmp.gt.f32.partialorder %v6716_v51, 0.0 }
 0x294   :  { %4553 = vtanh.f32 %v3764_v26  ;;  %v7061_v48 = vpop.eup %4543  ;;  %v9382_v12 = vmax.f32 %v7051_v18, 1e-10  ;;  %v7065_v21 = vmul.f32 %v2373_v60, %v6798_v44  ;;  %v7068_v47 = vmul.f32 %v4542_v22, %v6912_v37  ;;  %v9812_v26 = vld [vmem:[#allocation75_spill] sm:$0xff] }
 0x295   :  { %9808 = vst [vmem:[#allocation43_spill] sm:$0xff] %v7056_v30  ;;  %9810 = vst [vmem:[#allocation73_spill] sm:$0xff] %v7061_v48  ;;  %4555 = vrsqrt.f32 %v2487_v1  ;;  %v2388_v8 = vmul.f32 %v7056_v30, %v7056_v30  ;;  %v1675_v56 = vmul.f32 %v9812_v26, %v1627_v7  ;;  %v9814_v48 = vclamps-f32 %v6903_v59, 0.99999 }
 0x296   :  { %9811 = vst [vmem:[#allocation76_spill] sm:$0xff] %v7068_v47  ;;  %4557 = vlog2.f32 %v1983_v9  ;;  %v7074_v2 = vpop.eup %4545  ;;  %v2389_v9 = vmul.f32 %v7068_v47, %v7068_v47  ;;  %v2154_v7 = vmul.f32 %v6593_v20, %v1674_v55  ;;  %v1656_v22 = vmul.f32 %v9816_v16, %v1608_v49 }
 0x297   :  { %9813 = vst [vmem:[#allocation75_spill] sm:$0xff] %v7074_v2  ;;  %v7078_v41 = vadd.f32 1.0, %v9814_v48  ;;  %4559 = vrsqrt.f32 %v9382_v12  ;;  %v7088_v24 = vmul.f32 %v2388_v8, %v6813_v35  ;;  %v9817_v48 = vld [vmem:[#allocation41_spill] sm:$0xff]  ;;  %v9818_v26 = vmax.f32 %v6971_v32, 1e-10 }
 0x298   :  { %v7085_v60 = vpop.eup %4547  ;;  %4561 = vrsqrt.f32 %v1528_v11  ;;  %v7093_v59 = vmul.f32 %v736_v52, %v9817_v48  ;;  %v7101_v37 = vmul.f32 %v2389_v9, %v6827_v33  ;;  %v3765_v20 = vclamps-f32 %v2139_v38, 15.0 }
 0x299   :  { %9815 = vst [vmem:[#allocation127_spill] sm:$0xff] %v7078_v41  ;;  %4563 = vlog2.f32 %v1981_v40  ;;  %v7098_v12 = vmul.f32 %v7085_v60, %v9818_v26  ;;  %v9384_v8 = vmax.f32 %v7088_v24, 1e-10  ;;  %v2155_v49 = vmul.f32 %v6596_v34, %v1675_v56  ;;  %v9823_v26 = vld [vmem:[#allocation65_spill] sm:$0xff] }
 0x29a   :  { %v7103_v41 = vpop.eup %4549  ;;  %v1609_v11 = vmul.f32 %v7074_v2, %v6944_v3  ;;  %v9819_v32 = vmax.f32 %v6993_v28, 1e-10  ;;  %v9820_v52 = vmax.f32 %v7065_v21, 1e-10  ;;  %v9383_v55 = vmax.f32 %v7101_v37, 1e-10 }
 0x29b   :  { %vm2614_vm0 = vcmp.gt.f32.partialorder %v7098_v12, 0.999  ;;  %v3780_v34 = vclamps-f32 %v2154_v7, 15.0  ;;  %v2136_v56 = vmul.f32 %v6603_v15, %v1656_v22  ;;  %v7129_v9 = vmul.f32 0.6931472, %v6887_v43 }
 0x29c   :  { %v7113_v40 = vmul.f32 %v7103_v41, %v9819_v32  ;;  %4565 = vrsqrt.f32 %v9820_v52  ;;  %v7121_v38 = vsel %vm2614_vm0, 0.999, %v7098_v12  ;;  %v9822_v15 = vmax.f32 %v7015_v23, 1e-10 }
 0x29d   :  { %4567 = vrsqrt.f32 %v9384_v8  ;;  %v7126_v28 = vpop.eup %4551  ;;  %9821 = vst [vmem:[#allocation70_spill] sm:$0xff] %v7129_v9  ;;  %v9386_v16 = vclamps-f32 %v7121_v38, 0.99999  ;;  %v3781_v22 = vclamps-f32 %v2155_v49, 15.0  ;;  %v1657_v8 = vmul.f32 %v9823_v26, %v1609_v11  ;;  %v7158_v49 = vpop.xlane.xlu1 %1454 }
 0x29e   :  { %vm2615_vm1 = vcmp.gt.f32.partialorder %v7113_v40, 0.999  ;;  %4569 = vrsqrt.f32 %v9383_v55  ;;  %v4554_v48 = vpop.eup %4553  ;;  %v7144_v43 = vmul.f32 %v7126_v28, %v9822_v15  ;;  %v3762_v15 = vclamps-f32 %v2136_v56, 15.0  ;;  %v7178_v26 = vpop.f32.mrb[20].mxu1 }
 0x29f   :  { %v7139_v7 = vsel %vm2615_vm1, 0.999, %v7113_v40  ;;  %v7146_v32 = vpop.eup %4555  ;;  %v3046_v52 = vsub.f32 1.0, %v9386_v16  ;;  %4571 = vtanh.f32 %v3765_v20  ;;  %v7170_v11 = vmul.f32 %v4554_v48, %v6923_v5  ;;  %v7188_v5 = vpop.f32.mrb[21].mxu1 }
 0x2a0   :  { %v9387_v55 = vclamps-f32 %v7139_v7, 0.99999  ;;  %v7152_v9 = vpop.eup %4557  ;;  %vm2630_vm2 = vcmp.gt.f32.partialorder %v7144_v43, 0.999  ;;  %v7156_v23 = vmul.f32 %v7146_v32, %v2487_v1  ;;  %4573 = vtanh.f32 %v3780_v34  ;;  %v9827_v34 = vld [vmem:[#allocation44_spill] sm:$0xff]  ;;  %9831 = vst [vmem:[#allocation130_spill] sm:$0xff] %v7188_v5 }
 0x2a1   :  { %9824 = vst [vmem:[#allocation41_spill] sm:$0xff] %v7152_v9  ;;  %v7160_v54 = vpop.eup %4559  ;;  %4575 = vrcp.f32 %v3046_v52  ;;  %v7167_v20 = vsel %vm2630_vm2, 0.999, %v7144_v43  ;;  %9825 = vst [vmem:[#allocation65_spill] sm:$0xff] %v7170_v11  ;;  %v7176_v56 = vmul.f32 %v9827_v34, %v9827_v34  ;;  %v7192_v48 = vmul.f32 %v6612_v39, %v1657_v8  ;;  %v7195_v3 = vpop.f32.mrb[22].mxu1 }
 0x2a2   :  { %v3047_v16 = vsub.f32 1.0, %v9387_v55  ;;  %v7172_v1 = vpop.eup %4561  ;;  %9828 = vst [vmem:[#allocation44_spill] sm:$0xff] %v7178_v26  ;;  %v9392_v52 = vclamps-f32 %v7167_v20, 0.99999  ;;  %v9829_v55 = vmax.f32 %v7051_v18, 1e-10  ;;  %4577 = vtanh.f32 %v3781_v22 }
 0x2a3   :  { %9826 = vst [vmem:[#allocation128_spill] sm:$0xff] %v7172_v1  ;;  %v7186_v17 = vpop.eup %4563  ;;  %vm2631_vm3 = vcmp.gt.f32.partialorder %v7156_v23, 0.999  ;;  %9832 = vst [vmem:[#allocation131_spill] sm:$0xff] %v7195_v3  ;;  %v1408_v18 = vmul.f32 %v7188_v5, %v7188_v5  ;;  %v7209_v39 = vpop.f32.mrb[23].mxu1  ;;  %v2378_v34 = vmul.f32 %v7170_v11, %v7170_v11  ;;  %v7216_v5 = vmul.f32 %v7172_v1, %v7022_v19 }
 0x2a4   :  { %v7184_v9 = vmul.f32 %v7160_v54, %v9829_v55  ;;  %9830 = vst [vmem:[#allocation129_spill] sm:$0xff] %v7186_v17  ;;  %4579 = vrcp.f32 %v3047_v16  ;;  %v2758_v55 = vmul.f32 0.999, %v7085_v60  ;;  %v3062_v22 = vsub.f32 1.0, %v9392_v52  ;;  %9833 = vst [vmem:[#allocation132_spill] sm:$0xff] %v7209_v39 }
 0x2a5   :  { %v7205_v16 = vsel %vm2631_vm3, 0.999, %v7156_v23  ;;  %4581 = vtanh.f32 %v3762_v15  ;;  %v1409_v4 = vmul.f32 %v7209_v39, %v7209_v39  ;;  %1500 = vadd.xlane.f32.xlu0 %v1408_v18  ;;  %v2759_v33 = vmul.f32 0.999, %v7103_v41 }
 0x2a6   :  { %v7207_v17 = vpop.eup %4565  ;;  %4583 = vrcp.f32 %v3062_v22  ;;  %vm2612_vm4 = vcmp.gt.f32.partialorder %v7184_v9, 0.999  ;;  %v2710_v15 = vsel %vm2614_vm0, 1.001001, %v7085_v60  ;;  %v9834_v11 = vclamps-f32 %v7205_v16, 0.99999 }
 0x2a7   :  { %v7218_v52 = vpop.eup %4567  ;;  %v7234_v1 = vsel %vm2612_vm4, 0.999, %v7184_v9  ;;  %1502 = vadd.xlane.f32.xlu1 %v1409_v4  ;;  %v1410_v22 = vmul.f32 %v7178_v26, %v7178_v26  ;;  %v2806_v39 = vsel %vm2614_vm0, %v2758_v55, 1.0  ;;  %v9835_v60 = vmax.f32 %v7065_v21, 1e-10 }
 0x2a8   :  { %v7224_v8 = vpop.eup %4569  ;;  %v3063_v19 = vsub.f32 1.0, %v9834_v11  ;;  %v3806_v2 = vclamps-f32 %v7234_v1, 0.99999  ;;  %v2774_v30 = vmul.f32 0.999, %v7126_v28  ;;  %v1411_v21 = vmul.f32 %v7195_v3, %v7195_v3 }
 0x2a9   :  { %v7245_v11 = vmul.f32 %v7207_v17, %v9835_v60  ;;  %v4572_v47 = vpop.eup %4571  ;;  %v9836_v18 = vmax.f32 %v7088_v24, 1e-10  ;;  %v9837_v26 = vmax.f32 %v7101_v37, 1e-10  ;;  %1504 = vadd.xlane.f32.xlu0 %v1410_v22  ;;  %v9838_v55 = vclamps-f32 %v7121_v38, 0.99999 }
 0x2aa   :  { %4585 = vrcp.f32 %v3063_v19  ;;  %v4574_v1 = vpop.eup %4573  ;;  %v3044_v35 = vsub.f32 1.0, %v3806_v2  ;;  %v2711_v24 = vsel %vm2615_vm1, 1.001001, %v7103_v41  ;;  %v2807_v37 = vsel %vm2615_vm1, %v2759_v33, 1.0 }
 0x2ab   :  { %v7251_v4 = vmul.f32 %v7218_v52, %v9836_v18  ;;  %v7256_v12 = vmul.f32 %v7224_v8, %v9837_v26  ;;  %v2998_v60 = vadd.f32 1.0, %v9838_v55  ;;  %vm2613_vm5 = vcmp.gt.f32.partialorder %v7245_v11, 0.999  ;;  %v4576_v19 = vpop.eup %4575  ;;  %1506 = vadd.xlane.f32.xlu1 %v1411_v21 }
 0x2ac   :  { %v9839_v26 = vclamps-f32 %v7139_v7, 0.99999  ;;  %v7273_v22 = vsel %vm2613_vm5, 0.999, %v7245_v11  ;;  %v4578_v38 = vpop.eup %4577  ;;  %v2726_v3 = vsel %vm2630_vm2, 1.001001, %v7126_v28  ;;  %4587 = vrcp.f32 %v3044_v35 }
 0x2ad   :  { %v3097_v55 = vmul.f32 %v4576_v19, %v2998_v60  ;;  %v9405_v41 = vclamps-f32 %v7273_v22, 0.99999  ;;  %v7279_v33 = vmul.f32 %v2806_v39, %v2710_v15  ;;  %v2822_v7 = vsel %vm2630_vm2, %v2774_v30, 1.0 }
 0x2ae   :  { %v2999_v18 = vadd.f32 1.0, %v9839_v26  ;;  %v4580_v40 = vpop.eup %4579  ;;  %vm2628_vm6 = vcmp.gt.f32.partialorder %v7251_v4, 0.999  ;;  %vm2629_vm7 = vcmp.gt.f32.partialorder %v7256_v12, 0.999  ;;  %v7288_v19 = vmul.f32 %v2807_v37, %v2711_v24 }
 0x2af   :  { %4589 = vlog2.f32 %v3097_v55  ;;  %v2775_v60 = vmul.f32 0.999, %v7146_v32  ;;  %v3045_v28 = vsub.f32 1.0, %v9405_v41  ;;  %v4582_v35 = vpop.eup %4581  ;;  %v9840_v39 = vclamps-f32 %v7167_v20, 0.99999 }
 0x2b0   :  { %v3099_v21 = vmul.f32 %v4580_v40, %v2999_v18  ;;  %v7295_v30 = vsel %vm2628_vm6, 0.999, %v7251_v4  ;;  %v7298_v43 = vmul.f32 %v2378_v34, %v6838_v62  ;;  %v4584_v26 = vpop.eup %4583  ;;  %v7300_v18 = vmul.f32 %v2822_v7, %v2726_v3 }
 0x2b1   :  { %v3014_v15 = vadd.f32 1.0, %v9840_v39  ;;  %v3822_v55 = vclamps-f32 %v7295_v30, 0.99999  ;;  %v7306_v24 = vsel %vm2629_vm7, 0.999, %v7256_v12  ;;  %v2823_v40 = vsel %vm2631_vm3, %v2775_v60, 1.0 }
 0x2b2   :  { %4591 = vlog2.f32 %v3099_v21  ;;  %v2727_v37 = vsel %vm2631_vm3, 1.001001, %v7146_v32  ;;  %v3823_v34 = vclamps-f32 %v7306_v24, 0.99999  ;;  %v9841_v3 = vclamps-f32 %v7205_v16, 0.99999 }
 0x2b3   :  { %v3129_v20 = vmul.f32 %v4584_v26, %v3014_v15  ;;  %4593 = vrcp.f32 %v3045_v28  ;;  %v2756_v21 = vmul.f32 0.999, %v7160_v54  ;;  %v3060_v39 = vsub.f32 1.0, %v3822_v55 }
 0x2b4   :  { %v3015_v7 = vadd.f32 1.0, %v9841_v3  ;;  %v4586_v30 = vpop.eup %4585  ;;  %v3061_v41 = vsub.f32 1.0, %v3823_v34  ;;  %v9407_v15 = vmax.f32 %v7298_v43, 1e-10  ;;  %v7319_v26 = vmul.f32 %v4572_v47, %v6975_v42 }
 0x2b5   :  { %4595 = vlog2.f32 %v3129_v20  ;;  %v7322_v28 = vmul.f32 %v4574_v1, %v6996_v45  ;;  %v7325_v23 = vmul.f32 %v4578_v38, %v7011_v57  ;;  %v2708_v16 = vsel %vm2612_vm4, 1.001001, %v7160_v54 }
 0x2b6   :  { %v3131_v32 = vmul.f32 %v4586_v30, %v3015_v7  ;;  %4597 = vrcp.f32 %v3060_v39  ;;  %v2996_v60 = vadd.f32 1.0, %v3806_v2  ;;  %v2379_v24 = vmul.f32 %v7319_v26, %v7319_v26  ;;  %v4588_v20 = vpop.eup %4587 }
 0x2b7   :  { %4599 = vrcp.f32 %v3061_v41  ;;  %v2394_v42 = vmul.f32 %v7322_v28, %v7322_v28  ;;  %v2395_v45 = vmul.f32 %v7325_v23, %v7325_v23  ;;  %v7337_v57 = vmul.f32 %v4582_v35, %v7030_v36 }
 0x2b8   :  { %4601 = vlog2.f32 %v3131_v32  ;;  %v2804_v47 = vsel %vm2612_vm4, %v2756_v21, 1.0  ;;  %v3093_v54 = vmul.f32 %v4588_v20, %v2996_v60  ;;  %v7344_v2 = vmul.f32 %v2379_v24, %v6851_v63 }
 0x2b9   :  { %4603 = vrsqrt.f32 %v9407_v15  ;;  %v4590_v1 = vpop.eup %4589  ;;  %v7347_v38 = vmul.f32 %v2823_v40, %v2727_v37  ;;  %v2757_v41 = vmul.f32 0.999, %v7207_v17  ;;  %v7351_v36 = vmul.f32 %v2394_v42, %v6865_v14 }
 0x2ba   :  { %v7354_v9 = vmul.f32 %v2395_v45, %v6893_v46  ;;  %v3193_v35 = vmul.f32 0.6931472, %v4590_v1  ;;  %4605 = vlog2.f32 %v3093_v54  ;;  %v7357_v3 = vmul.f32 0.999, %v7218_v52 }
 0x2bb   :  { %v9406_v7 = vmax.f32 %v7344_v2, 1e-10  ;;  %vm3383_vm9 = vcmp.gt.f32.partialorder %v6729_v25, 0.0  ;;  %v7361_v37 = vmul.f32 %v2804_v47, %v2708_v16  ;;  %v9842_v40 = vclamps-f32 %v7273_v22, 0.99999  ;;  %v9843_v22 = vld [vmem:[#allocation72_spill] sm:$0xff] }
 0x2bc   :  { %v4592_v21 = vpop.eup %4591  ;;  %v2490_v30 = vmax.f32 %v7351_v36, 1e-10  ;;  %v2376_v32 = vmul.f32 %v7337_v57, %v7337_v57  ;;  %v3286_v24 = vmul.f32 0.5, %v3193_v35  ;;  %v2491_v42 = vmax.f32 %v7354_v9, 1e-10 }
 0x2bd   :  { %v2997_v39 = vadd.f32 1.0, %v9842_v40  ;;  %v4594_v60 = vpop.eup %4593  ;;  %v3195_v20 = vmul.f32 0.6931472, %v4592_v21  ;;  %4607 = vrsqrt.f32 %v9406_v7  ;;  %v2709_v16 = vsel %vm2613_vm5, 1.001001, %v7207_v17 }
 0x2be   :  { %4609 = vrsqrt.f32 %v2490_v30  ;;  %v1672_v47 = vmul.f32 %v9843_v22, %v7216_v5  ;;  %v3334_v1 = vmul.f32 %v3286_v24, %v7279_v33  ;;  %vm3398_vm10 = vcmp.gt.f32.partialorder %v6757_v31, 0.0 }
 0x2bf   :  { %v3095_v45 = vmul.f32 %v4594_v60, %v2997_v39  ;;  %v4596_v54 = vpop.eup %4595  ;;  %v3287_v35 = vmul.f32 0.5, %v3195_v20  ;;  %v2805_v21 = vsel %vm2613_vm5, %v2757_v41, 1.0  ;;  %v3012_v40 = vadd.f32 1.0, %v3822_v55  ;;  %v9844_v20 = vld [vmem:[#allocation45_spill] sm:$0xff] }
 0x2c0   :  { %v4598_v7 = vpop.eup %4597  ;;  %v3225_v15 = vmul.f32 0.6931472, %v4596_v54  ;;  %v3013_v17 = vadd.f32 1.0, %v3823_v34  ;;  %v7383_v39 = vmul.f32 %v2376_v32, %v6910_v29  ;;  %v3430_v5 = vmul.f32 %v3334_v1, %v6941_v0 }
 0x2c1   :  { %4611 = vlog2.f32 %v3095_v45  ;;  %v4600_v60 = vpop.eup %4599  ;;  %v3335_v22 = vmul.f32 %v3287_v35, %v7288_v19  ;;  %v3125_v33 = vmul.f32 %v4598_v7, %v3012_v40  ;;  %vm3399_vm11 = vcmp.gt.f32.partialorder %v6771_v10, 0.0  ;;  %v9846_v35 = vld [vmem:[#allocation47_spill] sm:$0xff] }
 0x2c2   :  { %4613 = vrsqrt.f32 %v2491_v42  ;;  %v4602_v24 = vpop.eup %4601  ;;  %v3302_v11 = vmul.f32 0.5, %v3225_v15  ;;  %v7390_v55 = vmul.f32 %v2805_v21, %v2709_v16  ;;  %v3127_v41 = vmul.f32 %v4600_v60, %v3013_v17 }
 0x2c3   :  { %v2152_v34 = vmul.f32 %v6622_v50, %v1672_v47  ;;  %v7393_v32 = vpop.eup %4603  ;;  %v3478_v0 = vsel %vm3382_vm8, %v3430_v5, 0.0  ;;  %v3431_v19 = vmul.f32 %v3335_v22, %v6954_v61  ;;  %v3227_v7 = vmul.f32 0.6931472, %v4602_v24 }
 0x2c4   :  { %4615 = vlog2.f32 %v3125_v33  ;;  %v3526_v45 = vmul.f32 %v9844_v20, %v3478_v0  ;;  %v3350_v15 = vmul.f32 %v3302_v11, %v7300_v18  ;;  %v9845_v16 = vmax.f32 %v7298_v43, 1e-10  ;;  %v4606_v50 = vpop.eup %4605  ;;  %v9848_v11 = vld [vmem:[#allocation49_spill] sm:$0xff] }
 0x2c5   :  { %4617 = vlog2.f32 %v3127_v41  ;;  %v3479_v47 = vsel %vm3383_vm9, %v3431_v19, 0.0  ;;  %v3303_v51 = vmul.f32 0.5, %v3227_v7  ;;  %vm3380_vm12 = vcmp.gt.f32.partialorder %v6783_v27, 0.0 }
 0x2c6   :  { %v7403_v54 = vmul.f32 %v7393_v32, %v9845_v16  ;;  %v2773_v61 = vmul.f32 0.999, %v7224_v8  ;;  %v2472_v1 = vmax.f32 %v7383_v39, 1e-10  ;;  %3574 = vst [vmem:[#allocation7 + $0x10] sm:$0xff] %v3526_v45  ;;  %v3527_v18 = vmul.f32 %v9846_v35, %v3479_v47 }
 0x2c7   :  { %v3446_v21 = vmul.f32 %v3350_v15, %v6980_v6  ;;  %v3189_v43 = vmul.f32 0.6931472, %v4606_v50  ;;  %v7413_v40 = vpop.eup %4607  ;;  %v3351_v25 = vmul.f32 %v3303_v51, %v7347_v38  ;;  %v2724_v17 = vsel %vm2628_vm6, 1.001001, %v7218_v52 }
 0x2c8   :  { %vm2618_vm13 = vcmp.gt.f32.partialorder %v7403_v54, 0.999  ;;  %v3778_v5 = vclamps-f32 %v2152_v34, 15.0  ;;  %v7424_v22 = vpop.eup %4609  ;;  %3575 = vst [vmem:[#allocation7 + $0x18] sm:$0xff] %v3527_v18  ;;  %v9847_v38 = vclamps-f32 %v7192_v48, 15.0  ;;  %v2820_v34 = vsel %vm2628_vm6, %v7357_v3, 1.0 }
 0x2c9   :  { %v7422_v60 = vsel %vm2618_vm13, 0.999, %v7403_v54  ;;  %v3494_v6 = vsel %vm3398_vm10, %v3446_v21, 0.0  ;;  %v3284_v33 = vmul.f32 0.5, %v3189_v43  ;;  %v3447_v41 = vmul.f32 %v3351_v25, %v7002_v13  ;;  %v9850_v3 = vld [vmem:[#allocation51_spill] sm:$0xff]  ;;  %v9851_v18 = vld [vmem:[#allocation46_spill] sm:$0xff] }
 0x2ca   :  { %v3812_v24 = vclamps-f32 %v7422_v60, 0.99999  ;;  %4619 = vtanh.f32 %v9847_v38  ;;  %v3542_v52 = vmul.f32 %v9848_v11, %v3494_v6  ;;  %v9849_v0 = vmax.f32 %v7344_v2, 1e-10  ;;  %v9854_v38 = vld [vmem:[#allocation42_spill] sm:$0xff] }
 0x2cb   :  { %v4612_v31 = vpop.eup %4611  ;;  %v3332_v7 = vmul.f32 %v3284_v33, %v7361_v37  ;;  %v7445_v48 = vmul.f32 %v7424_v22, %v2490_v30  ;;  %4621 = vrsqrt.f32 %v2472_v1  ;;  %v3495_v4 = vsel %vm3399_vm11, %v3447_v41, 0.0  ;;  %v7496_v41 = vpop.xlane.xlu0 %1432 }
 0x2cc   :  { %v7439_v19 = vmul.f32 %v7413_v40, %v9849_v0  ;;  %v3050_v20 = vsub.f32 1.0, %v3812_v24  ;;  %v7449_v13 = vpop.eup %4613  ;;  %3590 = vst [vmem:[#allocation7 + $0x90] sm:$0xff] %v3542_v52  ;;  %v3191_v2 = vmul.f32 0.6931472, %v4612_v31  ;;  %4623 = vtanh.f32 %v3778_v5  ;;  %v9855_v0 = vld [vmem:[#allocation48_spill] sm:$0xff] }
 0x2cd   :  { %v3543_v37 = vmul.f32 %v9850_v3, %v3495_v4  ;;  %v3428_v36 = vmul.f32 %v3332_v7, %v7020_v53  ;;  %v2725_v10 = vsel %vm2629_vm7, 1.001001, %v7224_v8  ;;  %v2821_v16 = vsel %vm2629_vm7, %v2773_v61, 1.0  ;;  %v9857_v7 = vld [vmem:[#allocation43_spill] sm:$0xff]  ;;  %v9858_v3 = vld [vmem:[#allocation76_spill] sm:$0xff] }
 0x2ce   :  { %vm2619_vm14 = vcmp.gt.f32.partialorder %v7439_v19, 0.999  ;;  %4625 = vrcp.f32 %v3050_v20  ;;  %v4616_v45 = vpop.eup %4615  ;;  %v3285_v15 = vmul.f32 0.5, %v3191_v2  ;;  %vm2634_vm15 = vcmp.gt.f32.partialorder %v7445_v48, 0.999 }
 0x2cf   :  { %v7459_v30 = vsel %vm2619_vm14, 0.999, %v7439_v19  ;;  %v4618_v47 = vpop.eup %4617  ;;  %3591 = vst [vmem:[#allocation7 + $0x98] sm:$0xff] %v3543_v37  ;;  %v3476_v53 = vsel %vm3380_vm12, %v3428_v36, 0.0  ;;  %v3221_v51 = vmul.f32 0.6931472, %v4616_v45  ;;  %v7473_v35 = vmul.f32 %v7449_v13, %v2491_v42 }
 0x2d0   :  { %v3813_v50 = vclamps-f32 %v7459_v30, 0.99999  ;;  %v3524_v8 = vmul.f32 %v3476_v53, %v9851_v18  ;;  %v3333_v12 = vmul.f32 %v3285_v15, %v7390_v55  ;;  %v3223_v61 = vmul.f32 0.6931472, %v4618_v47  ;;  %v9859_v45 = vld [vmem:[#allocation75_spill] sm:$0xff]  ;;  %v9860_v47 = vld [vmem:[#allocation117_spill] sm:$0xff] }
 0x2d1   :  { %v9852_v21 = vmax.f32 %v7158_v49, 1e-30  ;;  %v2868_v43 = vmul.f32 %v2820_v34, %v2724_v17  ;;  %v3300_v25 = vmul.f32 0.5, %v3221_v51  ;;  %v7484_v9 = vsel %vm2634_vm15, 0.999, %v7445_v48  ;;  %v7516_v51 = vpop.xlane.xlu1 %1434  ;;  %v9861_v18 = vld [vmem:[#allocation50_spill] sm:$0xff] }
 0x2d2   :  { %v3051_v27 = vsub.f32 1.0, %v3813_v50  ;;  %3572 = vst [vmem:[#allocation7] sm:$0xff] %v3524_v8  ;;  %v3429_v42 = vmul.f32 %v3333_v12, %v7039_v58  ;;  %v2869_v60 = vmul.f32 %v2821_v16, %v2725_v10  ;;  %v3301_v5 = vmul.f32 0.5, %v3223_v61 }
 0x2d3   :  { %4627 = vrsqrt.f32 %v9852_v21  ;;  %v3828_v55 = vclamps-f32 %v7484_v9, 0.99999  ;;  %vm3381_vm0 = vcmp.gt.f32.partialorder %v6798_v44, 0.0  ;;  %v3348_v17 = vmul.f32 %v3300_v25, %v2868_v43  ;;  %v9856_v44 = vld [vmem:[#allocation116_spill] sm:$0xff] }
 0x2d4   :  { %v4620_v6 = vpop.eup %4619  ;;  %4629 = vrcp.f32 %v3051_v27  ;;  %vm2635_vm1 = vcmp.gt.f32.partialorder %v7473_v35, 0.999  ;;  %v9853_v33 = vmax.f32 %v7093_v59, 1e-10  ;;  %v7494_v11 = vmul.f32 %v7176_v56, %v9854_v38  ;;  %v9862_v43 = vld [vmem:[#allocation52_spill] sm:$0xff]  ;;  %v9864_v38 = vld [vmem:[#allocation61_spill] sm:$0xff] }
 0x2d5   :  { %v3477_v52 = vsel %vm3381_vm0, %v3429_v42, 0.0  ;;  %v3349_v58 = vmul.f32 %v3301_v5, %v2869_v60  ;;  %v7498_v34 = vpop.eup %4621  ;;  %vm3396_vm2 = vcmp.gt.f32.partialorder %v9856_v44, 0.0  ;;  %v3444_v20 = vmul.f32 %v3348_v17, %v9857_v7  ;;  %v7563_v30 = vpop.xlane.xlu1 %1466 }
 0x2d6   :  { %4631 = vrsqrt.f32 %v9853_v33  ;;  %v3525_v31 = vmul.f32 %v3477_v52, %v9855_v0  ;;  %v3066_v4 = vsub.f32 1.0, %v3828_v55  ;;  %v4624_v2 = vpop.eup %4623  ;;  %v3002_v56 = vadd.f32 1.0, %v3812_v24 }
 0x2d7   :  { %v3445_v37 = vmul.f32 %v3349_v58, %v9858_v3  ;;  %v7509_v36 = vsel %vm2635_vm1, 0.999, %v7473_v35  ;;  %v7512_v15 = vmul.f32 %v4620_v6, %v9859_v45  ;;  %v3492_v16 = vsel %vm3396_vm2, %v3444_v20, 0.0  ;;  %v7537_v6 = vpop.xlane.xlu0 %1464  ;;  %v9869_v3 = vld [vmem:[#allocation28_spill] sm:$0xff] }
 0x2d8   :  { %v4626_v10 = vpop.eup %4625  ;;  %3573 = vst [vmem:[#allocation7 + $0x8] sm:$0xff] %v3525_v31  ;;  %vm3397_vm3 = vcmp.gt.f32.partialorder %v9860_v47, 0.0  ;;  %4633 = vrcp.f32 %v3066_v4  ;;  %v3829_v53 = vclamps-f32 %v7509_v36, 0.99999  ;;  %v3540_v24 = vmul.f32 %v3492_v16, %v9861_v18  ;;  %v9866_v31 = vld [vmem:[#allocation37_spill] sm:$0xff]  ;;  %v9867_v4 = vld [vmem:[#allocation40_spill] sm:$0xff] }
 0x2d9   :  { %v3493_v8 = vsel %vm3397_vm3, %v3445_v37, 0.0  ;;  %v3105_v12 = vmul.f32 %v4626_v10, %v3002_v56  ;;  %v7522_v61 = vmul.f32 %v7498_v34, %v2472_v1  ;;  %v9408_v21 = vmax.f32 %v7494_v11, 1e-10  ;;  %v9863_v1 = vld [vmem:[#allocation128_spill] sm:$0xff] }
 0x2da   :  { %v3541_v25 = vmul.f32 %v3493_v8, %v9862_v43  ;;  %v3067_v27 = vsub.f32 1.0, %v3829_v53  ;;  %v1518_v42 = vmax.f32 %v7496_v41, 1e-30  ;;  %3588 = vst [vmem:[#allocation7 + $0x80] sm:$0xff] %v3540_v24  ;;  %v2377_v39 = vmul.f32 %v7512_v15, %v7512_v15  ;;  %v9873_v8 = vld [vmem:[#allocation126_spill] sm:$0xff]  ;;  %v9874_v43 = vld [vmem:[#allocation71_spill] sm:$0xff] }
 0x2db   :  { %4635 = vlog2.f32 %v3105_v12  ;;  %vm2616_vm4 = vcmp.gt.f32.partialorder %v7522_v61, 0.999  ;;  %v7535_v5 = vmul.f32 %v4624_v2, %v9863_v1  ;;  %v1519_v33 = vmax.f32 %v7516_v51, 1e-30 }
 0x2dc   :  { %3589 = vst [vmem:[#allocation7 + $0x88] sm:$0xff] %v3541_v25  ;;  %4637 = vrcp.f32 %v3067_v27  ;;  %v7542_v17 = vsel %vm2616_vm4, 0.999, %v7522_v61  ;;  %v7546_v52 = vmul.f32 0.5, %v9864_v38  ;;  %v3003_v58 = vadd.f32 1.0, %v3813_v50  ;;  %v9870_v50 = vld [vmem:[#allocation70_spill] sm:$0xff]  ;;  %v7586_v38 = vpop.xlane.xlu0 %1428 }
 0x2dd   :  { %v7529_v60 = vpop.eup %4627  ;;  %v3810_v0 = vclamps-f32 %v7542_v17, 0.99999  ;;  %v7552_v44 = vmul.f32 %v2377_v39, %v9866_v31  ;;  %v2392_v7 = vmul.f32 %v7535_v5, %v7535_v5  ;;  %v9868_v2 = vmax.f32 %v9867_v4, 1e-10  ;;  %v9875_v27 = vld [vmem:[#allocation54_spill] sm:$0xff]  ;;  %v9884_v17 = vld [vmem:[#allocation93_spill] sm:$0xff] }
 0x2de   :  { %9865 = vst [vmem:[#allocation72_spill] sm:$0xff] %v7546_v52  ;;  %v4630_v20 = vpop.eup %4629  ;;  %v1625_v56 = vmul.f32 %v7529_v60, %v7158_v49  ;;  %4639 = vrsqrt.f32 %v1518_v42  ;;  %v7566_v45 = vmul.f32 0.5, %v9870_v50  ;;  %v2762_v24 = vmul.f32 0.999, %v7393_v32 }
 0x2df   :  { %v7559_v37 = vmul.f32 %v9869_v3, %v9868_v2  ;;  %4641 = vrsqrt.f32 %v9408_v21  ;;  %v3107_v16 = vmul.f32 %v4630_v20, %v3003_v58  ;;  %v3048_v47 = vsub.f32 1.0, %v3810_v0  ;;  %v9876_v20 = vld [vmem:[#allocation56_spill] sm:$0xff] }
 0x2e0   :  { %9871 = vst [vmem:[#allocation45_spill] sm:$0xff] %v7566_v45  ;;  %v7568_v10 = vpop.eup %4631  ;;  %v9410_v18 = vmax.f32 %v7552_v44, 1e-10  ;;  %v7577_v12 = vmul.f32 %v2392_v7, %v9873_v8  ;;  %v1673_v25 = vmul.f32 %v9874_v43, %v1625_v56  ;;  %4643 = vrsqrt.f32 %v1519_v33  ;;  %v9878_v2 = vld [vmem:[#allocation92_spill] sm:$0xff]  ;;  %v9900_v45 = vld [vmem:[#allocation94_spill] sm:$0xff] }
 0x2e1   :  { %9872 = vst [vmem:[#allocation47_spill] sm:$0xff] %v7568_v10  ;;  %v7581_v42 = vmul.f32 0.6931472, %v9875_v27  ;;  %v2763_v39 = vmul.f32 0.999, %v7413_v40  ;;  %4645 = vlog2.f32 %v3107_v16  ;;  %v3018_v1 = vadd.f32 1.0, %v3828_v55 }
 0x2e2   :  { %v4634_v58 = vpop.eup %4633  ;;  %v7589_v4 = vmul.f32 0.6931472, %v9876_v20  ;;  %4647 = vrcp.f32 %v3048_v47  ;;  %v9409_v7 = vmax.f32 %v7577_v12, 1e-10  ;;  %v2153_v33 = vmul.f32 %v9878_v2, %v1673_v25  ;;  %v7604_v47 = vpop.xlane.xlu1 %1430 }
 0x2e3   :  { %v2778_v50 = vmul.f32 0.999, %v7424_v22  ;;  %v3137_v43 = vmul.f32 %v4634_v58, %v3018_v1  ;;  %4649 = vrsqrt.f32 %v9410_v18  ;;  %v2714_v9 = vsel %vm2618_vm13, 1.001001, %v7393_v32  ;;  %v7621_v2 = vpop.xlane.xlu0 %1460 }
 0x2e4   :  { %9877 = vst [vmem:[#allocation49_spill] sm:$0xff] %v7589_v4  ;;  %v2810_v55 = vsel %vm2618_vm13, %v2762_v24, 1.0  ;;  %4651 = vrsqrt.f32 %v9409_v7  ;;  %v3779_v16 = vclamps-f32 %v2153_v33, 15.0  ;;  %v2715_v27 = vsel %vm2619_vm14, 1.001001, %v7413_v40  ;;  %9879 = vst [vmem:[#allocation51_spill] sm:$0xff] %v7621_v2 }
 0x2e5   :  { %v4636_v25 = vpop.eup %4635  ;;  %v2811_v1 = vsel %vm2619_vm14, %v2763_v39, 1.0  ;;  %4653 = vlog2.f32 %v3137_v43  ;;  %v3019_v32 = vadd.f32 1.0, %v3829_v53  ;;  %vm3386_vm5 = vcmp.gt.f32.partialorder %v6838_v62, 0.0  ;;  %v9888_v62 = vld [vmem:[#allocation11_spill] sm:$0xff]  ;;  %v9936_v4 = vld [vmem:[#allocation25_spill] sm:$0xff] }
 0x2e6   :  { %v4638_v54 = vpop.eup %4637  ;;  %v3201_v24 = vmul.f32 0.6931472, %v4636_v25  ;;  %4655 = vtanh.f32 %v3779_v16  ;;  %v1534_v58 = vmax.f32 %v7537_v6, 1e-30  ;;  %v2730_v20 = vsel %vm2634_vm15, 1.001001, %v7424_v22 }
 0x2e7   :  { %v2826_v40 = vsel %vm2634_vm15, %v2778_v50, 1.0  ;;  %v3139_v19 = vmul.f32 %v4638_v54, %v3019_v32  ;;  %v1535_v39 = vmax.f32 %v7563_v30, 1e-30  ;;  %v2858_v53 = vmul.f32 %v2810_v55, %v2714_v9  ;;  %v7635_v55 = vpop.xlane.xlu1 %1462 }
 0x2e8   :  { %v7623_v36 = vpop.eup %4639  ;;  %v3290_v33 = vmul.f32 0.5, %v3201_v24  ;;  %v2859_v43 = vmul.f32 %v2811_v1, %v2715_v27  ;;  %v1516_v16 = vmax.f32 %v7586_v38, 1e-30  ;;  %v2779_v21 = vmul.f32 0.999, %v7449_v13  ;;  %9881 = vst [vmem:[#allocation42_spill] sm:$0xff] %v7635_v55 }
 0x2e9   :  { %v7626_v25 = vpop.eup %4641  ;;  %4657 = vlog2.f32 %v3139_v19  ;;  %v1614_v22 = vmul.f32 %v7623_v36, %v7496_v41  ;;  %v1517_v48 = vmax.f32 %v7604_v47, 1e-30  ;;  %v2874_v54 = vmul.f32 %v2826_v40, %v2730_v20  ;;  %v9882_v24 = vld [vmem:[#allocation16_spill] sm:$0xff] }
 0x2ea   :  { %9880 = vst [vmem:[#allocation46_spill] sm:$0xff] %v7626_v25  ;;  %v7632_v50 = vpop.eup %4643  ;;  %v3338_v32 = vmul.f32 %v3290_v33, %v2858_v53  ;;  %4659 = vrsqrt.f32 %v1534_v58  ;;  %v1532_v9 = vmax.f32 %v7621_v2, 1e-30  ;;  %vm3387_vm6 = vcmp.gt.f32.partialorder %v6851_v63, 0.0  ;;  %v9883_v53 = vld [vmem:[#allocation65_spill] sm:$0xff] }
 0x2eb   :  { %v4646_v27 = vpop.eup %4645  ;;  %v3000_v1 = vadd.f32 1.0, %v3810_v0  ;;  %v1662_v19 = vmul.f32 %v9882_v24, %v1614_v22  ;;  %v1615_v56 = vmul.f32 %v7632_v50, %v7516_v51  ;;  %4661 = vrsqrt.f32 %v1535_v39 }
 0x2ec   :  { %v4648_v7 = vpop.eup %4647  ;;  %v3434_v20 = vmul.f32 %v3338_v32, %v9883_v53  ;;  %v3203_v58 = vmul.f32 0.6931472, %v4646_v27  ;;  %v2731_v40 = vsel %vm2635_vm1, 1.001001, %v7449_v13  ;;  %4663 = vrsqrt.f32 %v1516_v16  ;;  %v9886_v16 = vld [vmem:[#allocation58_spill] sm:$0xff] }
 0x2ed   :  { %v7647_v33 = vpop.eup %4649  ;;  %v3101_v18 = vmul.f32 %v4648_v7, %v3000_v1  ;;  %v2142_v0 = vmul.f32 %v9884_v17, %v1662_v19  ;;  %4665 = vrsqrt.f32 %v1517_v48  ;;  %v1533_v22 = vmax.f32 %v7635_v55, 1e-30 }
 0x2ee   :  { %v7651_v24 = vpop.eup %4651  ;;  %v3482_v39 = vsel %vm3386_vm5, %v3434_v20, 0.0  ;;  %v3291_v32 = vmul.f32 0.5, %v3203_v58  ;;  %v9885_v27 = vmax.f32 %v7552_v44, 1e-10  ;;  %4667 = vrsqrt.f32 %v1532_v9 }
 0x2ef   :  { %v4654_v13 = vpop.eup %4653  ;;  %v3530_v7 = vmul.f32 %v9886_v16, %v3482_v39  ;;  %vm3402_vm7 = vcmp.gt.f32.partialorder %v6865_v14, 0.0  ;;  %4669 = vlog2.f32 %v3101_v18  ;;  %v9887_v48 = vmax.f32 %v7577_v12, 1e-10 }
 0x2f0   :  { %v7658_v53 = vmul.f32 %v7647_v33, %v9885_v27  ;;  %v1663_v19 = vmul.f32 %v9888_v62, %v1615_v56  ;;  %v4656_v20 = vpop.eup %4655  ;;  %v3339_v58 = vmul.f32 %v3291_v32, %v2859_v43  ;;  %v3233_v44 = vmul.f32 0.6931472, %v4654_v13 }
 0x2f1   :  { %v7665_v1 = vmul.f32 %v7651_v24, %v9887_v48  ;;  %v3768_v17 = vclamps-f32 %v2142_v0, 15.0  ;;  %3578 = vst [vmem:[#allocation7 + $0x30] sm:$0xff] %v3530_v7  ;;  %v2827_v9 = vsel %vm2635_vm1, %v2779_v21, 1.0  ;;  %v2760_v39 = vmul.f32 0.999, %v7498_v34  ;;  %v9889_v21 = vld [vmem:[#allocation97_spill] sm:$0xff] }
 0x2f2   :  { %vm2617_vm8 = vcmp.gt.f32.partialorder %v7658_v53, 0.999  ;;  %v7678_v12 = vmul.f32 %v4656_v20, %v7529_v60  ;;  %v3435_v56 = vmul.f32 %v3339_v58, %v7319_v26  ;;  %v3306_v43 = vmul.f32 0.5, %v3233_v44  ;;  %v9890_v48 = vld [vmem:[#allocation62_spill] sm:$0xff] }
 0x2f3   :  { %v7675_v18 = vsel %vm2617_vm8, 0.999, %v7658_v53  ;;  %4671 = vrsqrt.f32 %v1533_v22  ;;  %v4658_v0 = vpop.eup %4657  ;;  %vm2632_vm9 = vcmp.gt.f32.partialorder %v7665_v1, 0.999  ;;  %v2143_v27 = vmul.f32 %v9889_v21, %v1663_v19 }
 0x2f4   :  { %v9412_v32 = vclamps-f32 %v7675_v18, 0.99999  ;;  %v2393_v35 = vmul.f32 %v7678_v12, %v7678_v12  ;;  %4673 = vtanh.f32 %v3768_v17  ;;  %v7686_v13 = vpop.eup %4659  ;;  %v3483_v60 = vsel %vm3387_vm6, %v3435_v56, 0.0 }
 0x2f5   :  { %v3354_v16 = vmul.f32 %v3306_v43, %v2874_v54  ;;  %v3235_v26 = vmul.f32 0.6931472, %v4658_v0  ;;  %v2712_v22 = vsel %vm2616_vm4, 1.001001, %v7498_v34  ;;  %v7693_v7 = vpop.eup %4661  ;;  %v3531_v62 = vmul.f32 %v9890_v48, %v3483_v60  ;;  %v9891_v60 = vld [vmem:[#allocation66_spill] sm:$0xff] }
 0x2f6   :  { %v2808_v20 = vsel %vm2616_vm4, %v2760_v39, 1.0  ;;  %v3049_v19 = vsub.f32 1.0, %v9412_v32  ;;  %v2680_v63 = vsel %vm2632_vm9, 0.999, %v7665_v1  ;;  %v7703_v54 = vpop.eup %4663  ;;  %v2875_v44 = vmul.f32 %v2827_v9, %v2731_v40 }
 0x2f7   :  { %v3450_v58 = vmul.f32 %v3354_v16, %v7322_v28  ;;  %v3307_v34 = vmul.f32 0.5, %v3235_v26  ;;  %v3826_v17 = vclamps-f32 %v2680_v63, 0.99999  ;;  %v7706_v56 = vpop.eup %4665  ;;  %3579 = vst [vmem:[#allocation7 + $0x38] sm:$0xff] %v3531_v62  ;;  %vm3403_vm10 = vcmp.gt.f32.partialorder %v6893_v46, 0.0  ;;  %v9898_v46 = vld [vmem:[#allocation105_spill] sm:$0xff] }
 0x2f8   :  { %4675 = vrcp.f32 %v3049_v19  ;;  %v7710_v61 = vmul.f32 %v2393_v35, %v7158_v49  ;;  %v3769_v39 = vclamps-f32 %v2143_v27, 15.0  ;;  %v7712_v43 = vpop.eup %4667  ;;  %v2856_v28 = vmul.f32 %v2808_v20, %v2712_v22  ;;  %v9892_v22 = vld [vmem:[#allocation19_spill] sm:$0xff] }
 0x2f9   :  { %v3498_v0 = vsel %vm3402_vm7, %v3450_v58, 0.0  ;;  %v3355_v21 = vmul.f32 %v3307_v34, %v2875_v44  ;;  %v3064_v40 = vsub.f32 1.0, %v3826_v17  ;;  %v4670_v9 = vpop.eup %4669  ;;  %vm3384_vm11 = vcmp.gt.f32.partialorder %v6910_v29, 0.0  ;;  %v9893_v44 = vld [vmem:[#allocation17_spill] sm:$0xff] }
 0x2fa   :  { %v3546_v16 = vmul.f32 %v9891_v60, %v3498_v0  ;;  %v9411_v26 = vmax.f32 %v7710_v61, 1e-10  ;;  %4677 = vtanh.f32 %v3769_v39  ;;  %v1630_v35 = vmul.f32 %v7686_v13, %v7537_v6 }
 0x2fb   :  { %v3451_v27 = vmul.f32 %v3355_v21, %v7325_v23  ;;  %v3197_v48 = vmul.f32 0.6931472, %v4670_v9  ;;  %4679 = vrcp.f32 %v3064_v40  ;;  %v1631_v14 = vmul.f32 %v7693_v7, %v7563_v30  ;;  %v9894_v21 = vld [vmem:[#allocation68_spill] sm:$0xff]  ;;  %v9895_v9 = vld [vmem:[#allocation107_spill] sm:$0xff] }
 0x2fc   :  { %3594 = vst [vmem:[#allocation7 + $0xb0] sm:$0xff] %v3546_v16  ;;  %4681 = vrsqrt.f32 %v9411_v26  ;;  %v1678_v62 = vmul.f32 %v9892_v22, %v1630_v35  ;;  %v1612_v20 = vmul.f32 %v7703_v54, %v7586_v38  ;;  %v1613_v19 = vmul.f32 %v7706_v56, %v7604_v47  ;;  %v9896_v16 = vld [vmem:[#allocation84_spill] sm:$0xff]  ;;  %v9897_v22 = vld [vmem:[#allocation77_spill] sm:$0xff] }
 0x2fd   :  { %v7731_v63 = vpop.eup %4671  ;;  %v3499_v23 = vsel %vm3403_vm10, %v3451_v27, 0.0  ;;  %v3288_v58 = vmul.f32 0.5, %v3197_v48  ;;  %v1679_v34 = vmul.f32 %v9893_v44, %v1631_v14  ;;  %v1628_v39 = vmul.f32 %v7712_v43, %v7621_v2  ;;  %v9899_v48 = vld [vmem:[#allocation88_spill] sm:$0xff]  ;;  %v7747_v44 = vpop.xlane.xlu0 %1440 }
 0x2fe   :  { %v4674_v0 = vpop.eup %4673  ;;  %v3547_v40 = vmul.f32 %v9894_v21, %v3499_v23  ;;  %v2158_v60 = vmul.f32 %v9895_v9, %v1678_v62  ;;  %v1660_v35 = vmul.f32 %v9896_v16, %v1612_v20  ;;  %v1661_v26 = vmul.f32 %v9897_v22, %v1613_v19  ;;  %v9901_v21 = vld [vmem:[#allocation101_spill] sm:$0xff]  ;;  %v9904_v16 = vld [vmem:[#allocation102_spill] sm:$0xff]  ;;  %v9905_v22 = vld [vmem:[#allocation87_spill] sm:$0xff] }
 0x2ff   :  { %v3336_v32 = vmul.f32 %v3288_v58, %v2856_v28  ;;  %v7743_v3 = vmul.f32 %v4674_v0, %v7623_v36  ;;  %v2159_v27 = vmul.f32 %v9898_v46, %v1679_v34  ;;  %v1676_v14 = vmul.f32 %v9899_v48, %v1628_v39 }
 0x300   :  { %3595 = vst [vmem:[#allocation7 + $0xb8] sm:$0xff] %v3547_v40  ;;  %v3784_v52 = vclamps-f32 %v2158_v60, 15.0  ;;  %v2140_v23 = vmul.f32 %v9900_v45, %v1660_v35  ;;  %v2141_v62 = vmul.f32 %v9901_v21, %v1661_v26  ;;  %v1629_v20 = vmul.f32 %v7731_v63, %v7635_v55 }
 0x301   :  { %v3432_v28 = vmul.f32 %v3336_v32, %v7337_v57  ;;  %v9902_v36 = vclamps-f32 %v7675_v18, 0.99999  ;;  %v2382_v58 = vmul.f32 %v7743_v3, %v7743_v3  ;;  %v3785_v34 = vclamps-f32 %v2159_v27, 15.0  ;;  %v9903_v18 = vld [vmem:[#allocation60_spill] sm:$0xff]  ;;  %v7774_v21 = vpop.xlane.xlu0 %1472 }
 0x302   :  { %v4676_v39 = vpop.eup %4675  ;;  %v3016_v0 = vadd.f32 1.0, %v3826_v17  ;;  %4683 = vtanh.f32 %v3784_v52  ;;  %v3766_v40 = vclamps-f32 %v2140_v23, 15.0  ;;  %v3767_v9 = vclamps-f32 %v2141_v62, 15.0  ;;  %v7772_v23 = vpop.xlane.xlu1 %1442 }
 0x303   :  { %v3001_v19 = vadd.f32 1.0, %v9902_v36  ;;  %v3480_v45 = vsel %vm3384_vm11, %v3432_v28, 0.0  ;;  %v7761_v60 = vmul.f32 %v2382_v58, %v7496_v41  ;;  %4685 = vtanh.f32 %v3785_v34  ;;  %v9907_v28 = vld [vmem:[#allocation127_spill] sm:$0xff] }
 0x304   :  { %v4678_v57 = vpop.eup %4677  ;;  %v3528_v32 = vmul.f32 %v3480_v45, %v9903_v18  ;;  %4687 = vtanh.f32 %v3766_v40  ;;  %v2156_v35 = vmul.f32 %v9904_v16, %v1676_v14  ;;  %v1677_v46 = vmul.f32 %v9905_v22, %v1629_v20  ;;  %v9908_v14 = vld [vmem:[#allocation73_spill] sm:$0xff] }
 0x305   :  { %v3103_v26 = vmul.f32 %v4676_v39, %v3001_v19  ;;  %v4680_v17 = vpop.eup %4679  ;;  %v9906_v52 = vclamps-f32 %v7559_v37, 0.99999  ;;  %v2478_v29 = vmax.f32 %v7761_v60, 1e-10  ;;  %v7770_v48 = vmul.f32 %v4678_v57, %v7632_v50 }
 0x306   :  { %v7776_v62 = vpop.eup %4681  ;;  %v1971_v36 = vmul.f32 %v9908_v14, %v9907_v28  ;;  %v9909_v20 = vmax.f32 %v7093_v59, 1e-10  ;;  %3576 = vst [vmem:[#allocation7 + $0x20] sm:$0xff] %v3528_v32  ;;  %v3133_v58 = vmul.f32 %v4680_v17, %v3016_v0  ;;  %v9911_v50 = vmax.f32 %v7494_v11, 1e-10  ;;  %v9914_v0 = vld [vmem:[#allocation104_spill] sm:$0xff]  ;;  %v7823_v28 = vpop.xlane.xlu0 %1436 }
 0x307   :  { %v1882_v27 = vsub.f32 1.0, %v9906_v52  ;;  %4689 = vlog2.f32 %v3103_v26  ;;  %v9913_v39 = vmax.f32 %v7710_v61, 1e-10  ;;  %v2383_v59 = vmul.f32 %v7770_v48, %v7770_v48  ;;  %v9916_v26 = vld [vmem:[#allocation74_spill] sm:$0xff] }
 0x308   :  { %v7783_v19 = vmul.f32 %v7568_v10, %v9909_v20  ;;  %4691 = vtanh.f32 %v3767_v9  ;;  %v7788_v34 = vmul.f32 %v7626_v25, %v9911_v50  ;;  %v3782_v45 = vclamps-f32 %v2156_v35, 15.0 }
 0x309   :  { %v7793_v40 = vmul.f32 %v7776_v62, %v9913_v39  ;;  %4693 = vrsqrt.f32 %v2478_v29  ;;  %v2157_v9 = vmul.f32 %v9914_v0, %v1677_v46  ;;  %v7801_v11 = vmul.f32 0.5, %v7581_v42 }
 0x30a   :  { %9910 = vst [vmem:[#allocation48_spill] sm:$0xff] %v7783_v19  ;;  %9912 = vst [vmem:[#allocation116_spill] sm:$0xff] %v7788_v34  ;;  %4695 = vlog2.f32 %v3133_v58  ;;  %v7804_v57 = vmul.f32 0.6931472, %v9916_v26  ;;  %v2761_v61 = vmul.f32 0.999, %v7647_v33  ;;  %v7809_v18 = vmul.f32 %v2383_v59, %v7516_v51 }
 0x30b   :  { %9915 = vst [vmem:[#allocation43_spill] sm:$0xff] %v7801_v11  ;;  %vm2633_vm12 = vcmp.gt.f32.partialorder %v7793_v40, 0.999  ;;  %v9918_v32 = vmov %v9906_v52  ;;  %4697 = vrcp.f32 %v1882_v27  ;;  %v7821_v52 = vpop.xlane.xlu1 %1474  ;;  %v2713_v27 = vsel %vm2617_vm8, 1.001001, %v7647_v33 }
 0x30c   :  { %9917 = vst [vmem:[#allocation76_spill] sm:$0xff] %v7804_v57  ;;  %v7813_v16 = vadd.f32 1.0, %v9918_v32  ;;  %v2681_v42 = vsel %vm2633_vm12, 0.999, %v7793_v40  ;;  %4699 = vlog2.f32 %v1971_v36  ;;  %v9413_v17 = vmax.f32 %v7809_v18, 1e-10  ;;  %v4684_v37 = vpop.eup %4683 }
 0x30d   :  { %v3827_v46 = vclamps-f32 %v2681_v42, 0.99999  ;;  %4701 = vtanh.f32 %v3782_v45  ;;  %v3783_v14 = vclamps-f32 %v2157_v9, 15.0  ;;  %v1522_v20 = vmax.f32 %v7747_v44, 1e-30  ;;  %v4686_v58 = vpop.eup %4685 }
 0x30e   :  { %v2809_v36 = vsel %vm2617_vm8, %v2761_v61, 1.0  ;;  %4703 = vrsqrt.f32 %v9413_v17  ;;  %v7834_v39 = vmul.f32 %v4684_v37, %v7686_v13  ;;  %v4688_v59 = vpop.eup %4687  ;;  %v2776_v0 = vmul.f32 0.999, %v7651_v24 }
 0x30f   :  { %v3065_v50 = vsub.f32 1.0, %v3827_v46  ;;  %v7838_v33 = vmul.f32 %v4686_v58, %v7693_v7  ;;  %v1523_v45 = vmax.f32 %v7772_v23, 1e-30  ;;  %v1538_v9 = vmax.f32 %v7774_v21, 1e-30 }
 0x310   :  { %vm3385_vm13 = vcmp.gt.f32.partialorder %v9866_v31, 0.0  ;;  %v2398_v53 = vmul.f32 %v7834_v39, %v7834_v39  ;;  %v7846_v13 = vmul.f32 %v4688_v59, %v7703_v54  ;;  %v2857_v42 = vmul.f32 %v2809_v36, %v2713_v27  ;;  %v7864_v27 = vpop.xlane.xlu1 %1438  ;;  %v7866_v36 = vpop.xlane.xlu0 %1468 }
 0x311   :  { %v4690_v26 = vpop.eup %4689  ;;  %4705 = vrcp.f32 %v3065_v50  ;;  %v2399_v37 = vmul.f32 %v7838_v33, %v7838_v33  ;;  %v2728_v50 = vsel %vm2632_vm9, 1.001001, %v7651_v24  ;;  %v2824_v35 = vsel %vm2632_vm9, %v2776_v0, 1.0 }
 0x312   :  { %v4692_v32 = vpop.eup %4691  ;;  %v3199_v7 = vmul.f32 0.6931472, %v4690_v26  ;;  %4707 = vtanh.f32 %v3783_v14  ;;  %v7857_v22 = vmul.f32 %v2398_v53, %v7537_v6  ;;  %v2380_v54 = vmul.f32 %v7846_v13, %v7846_v13 }
 0x313   :  { %v7851_v58 = vpop.eup %4693  ;;  %v7862_v59 = vmul.f32 %v4692_v32, %v7706_v56  ;;  %vm3400_vm14 = vcmp.gt.f32.partialorder %v9873_v8, 0.0  ;;  %v7877_v53 = vmul.f32 %v2399_v37, %v7563_v30  ;;  %4709 = vrsqrt.f32 %v1522_v20 }
 0x314   :  { %v4696_v14 = vpop.eup %4695  ;;  %v3289_v26 = vmul.f32 0.5, %v3199_v7  ;;  %v7874_v24 = vmul.f32 %v7851_v58, %v2478_v29  ;;  %v7881_v61 = vmul.f32 %v2380_v54, %v7586_v38  ;;  %v2872_v37 = vmul.f32 %v2824_v35, %v2728_v50 }
 0x315   :  { %9919 = vst [vmem:[#allocation75_spill] sm:$0xff] %v7862_v59  ;;  %v3229_v56 = vmul.f32 0.6931472, %v4696_v14  ;;  %v2381_v1 = vmul.f32 %v7862_v59, %v7862_v59  ;;  %v4698_v0 = vpop.eup %4697  ;;  %4711 = vrsqrt.f32 %v1523_v45  ;;  %v3017_v10 = vadd.f32 1.0, %v3827_v46  ;;  %v7906_v45 = vpop.xlane.xlu1 %1470 }
 0x316   :  { %v3337_v7 = vmul.f32 %v3289_v26, %v2857_v42  ;;  %vm2622_vm15 = vcmp.gt.f32.partialorder %v7874_v24, 0.999  ;;  %v7887_v29 = vpop.eup %4699  ;;  %v9921_v26 = vmax.f32 %v7857_v22, 1e-10  ;;  %v9922_v35 = vmax.f32 %v7877_v53, 1e-10 }
 0x317   :  { %9920 = vst [vmem:[#allocation117_spill] sm:$0xff] %v7887_v29  ;;  %v3304_v17 = vmul.f32 0.5, %v3229_v56  ;;  %v7892_v14 = vsel %vm2622_vm15, 0.999, %v7874_v24  ;;  %v4702_v54 = vpop.eup %4701  ;;  %v7904_v56 = vmul.f32 %v2381_v1, %v7604_v47  ;;  %v9925_v25 = vmax.f32 %v7881_v61, 1e-10 }
 0x318   :  { %v3433_v32 = vmul.f32 %v3337_v7, %v7512_v15  ;;  %v3816_v42 = vclamps-f32 %v7892_v14, 0.99999  ;;  %4713 = vrsqrt.f32 %v9921_v26  ;;  %v7898_v20 = vpop.eup %4703  ;;  %v7908_v15 = vpop.xlane.xlu0 %1480  ;;  %v7924_v31 = vmul.f32 %v4702_v54, %v7712_v43  ;;  %v9928_v43 = vld [vmem:[#allocation67_spill] sm:$0xff] }
 0x319   :  { %v3352_v60 = vmul.f32 %v3304_v17, %v2872_v37  ;;  %4715 = vrsqrt.f32 %v9922_v35  ;;  %v9923_v17 = vmax.f32 %v7809_v18, 1e-10  ;;  %v9924_v35 = vld [vmem:[#allocation64_spill] sm:$0xff]  ;;  %v9416_v18 = vmax.f32 %v7904_v56, 1e-10 }
 0x31a   :  { %v3481_v46 = vsel %vm3385_vm13, %v3433_v32, 0.0  ;;  %v3054_v7 = vsub.f32 1.0, %v3816_v42  ;;  %4717 = vrsqrt.f32 %v1538_v9  ;;  %9926 = vst [vmem:[#allocation50_spill] sm:$0xff] %v7924_v31  ;;  %v7929_v9 = vmul.f32 %v4698_v0, %v7813_v16 }
 0x31b   :  { %v7917_v37 = vmul.f32 %v7898_v20, %v9923_v17  ;;  %v4706_v26 = vpop.eup %4705  ;;  %v3529_v1 = vmul.f32 %v3481_v46, %v9924_v35  ;;  %v3448_v50 = vmul.f32 %v3352_v60, %v7535_v5  ;;  %4719 = vrsqrt.f32 %v9925_v25 }
 0x31c   :  { %v4708_v32 = vpop.eup %4707  ;;  %v3135_v11 = vmul.f32 %v4706_v26, %v3017_v10  ;;  %4721 = vrcp.f32 %v3054_v7  ;;  %9927 = vst [vmem:[#allocation52_spill] sm:$0xff] %v7929_v9  ;;  %v2777_v60 = vmul.f32 0.999, %v7776_v62  ;;  %v1520_v46 = vmax.f32 %v7823_v28, 1e-30  ;;  %v7946_v7 = vpop.xlane.xlu1 %1482 }
 0x31d   :  { %vm2623_vm0 = vcmp.gt.f32.partialorder %v7917_v37, 0.999  ;;  %3577 = vst [vmem:[#allocation7 + $0x28] sm:$0xff] %v3529_v1  ;;  %v3496_v5 = vsel %vm3400_vm14, %v3448_v50, 0.0  ;;  %v2396_v16 = vmul.f32 %v7924_v31, %v7924_v31  ;;  %v7942_v0 = vmul.f32 %v4708_v32, %v7731_v63  ;;  %9930 = vst [vmem:[#allocation61_spill] sm:$0xff] %v7946_v7  ;;  %v7948_v17 = vpop.xlane.xlu0 %1496  ;;  %v7950_v26 = vpop.eup %4709 }
 0x31e   :  { %v2671_v25 = vsel %vm2623_vm0, 0.999, %v7917_v37  ;;  %v3544_v10 = vmul.f32 %v3496_v5, %v9928_v43  ;;  %4723 = vlog2.f32 %v3135_v11  ;;  %9931 = vst [vmem:[#allocation37_spill] sm:$0xff] %v7948_v17  ;;  %v2729_v11 = vsel %vm2633_vm12, 1.001001, %v7776_v62  ;;  %v9942_v37 = vld [vmem:[#allocation113_spill] sm:$0xff] }
 0x31f   :  { %v3817_v54 = vclamps-f32 %v2671_v25, 0.99999  ;;  %9929 = vst [vmem:[#allocation128_spill] sm:$0xff] %v7942_v0  ;;  %4725 = vrsqrt.f32 %v9416_v18  ;;  %v7958_v1 = vpop.eup %4711  ;;  %v2825_v32 = vsel %vm2633_vm12, %v2777_v60, 1.0  ;;  %v7963_v5 = vmul.f32 %v2396_v16, %v7621_v2  ;;  %v9941_v2 = vld [vmem:[#allocation29_spill] sm:$0xff] }
 0x320   :  { %3592 = vst [vmem:[#allocation7 + $0xa0] sm:$0xff] %v3544_v10  ;;  %v2397_v25 = vmul.f32 %v7942_v0, %v7942_v0  ;;  %v9932_v43 = vmax.f32 %v7821_v52, 1e-30  ;;  %v9933_v60 = vmax.f32 %v7857_v22, 1e-10  ;;  %v2873_v63 = vmul.f32 %v2825_v32, %v2729_v11 }
 0x321   :  { %v3055_v35 = vsub.f32 1.0, %v3817_v54  ;;  %v9417_v8 = vmax.f32 %v7963_v5, 1e-10  ;;  %v2766_v50 = vmul.f32 0.999, %v7851_v58  ;;  %vm3401_vm3 = vcmp.gt.f32.partialorder %v7158_v49, 0.0 }
 0x322   :  { %4727 = vrsqrt.f32 %v9932_v43  ;;  %v7969_v62 = vpop.eup %4713  ;;  %v7983_v43 = vmul.f32 %v2397_v25, %v7635_v55  ;;  %v9934_v18 = vmax.f32 %v7877_v53, 1e-10  ;;  %v3006_v25 = vadd.f32 1.0, %v3816_v42  ;;  %v9938_v55 = vld [vmem:[#allocation18_spill] sm:$0xff] }
 0x323   :  { %4729 = vrcp.f32 %v3055_v35  ;;  %v7974_v40 = vpop.eup %4715  ;;  %v7979_v16 = vmul.f32 %v7969_v62, %v9933_v60  ;;  %v1618_v35 = vmul.f32 %v7950_v26, %v7747_v44  ;;  %v2718_v53 = vsel %vm2622_vm15, 1.001001, %v7851_v58 }
 0x324   :  { %v7987_v10 = vpop.eup %4717  ;;  %v7993_v22 = vmul.f32 %v7974_v40, %v9934_v18  ;;  %4731 = vrsqrt.f32 %v1520_v46  ;;  %v9935_v14 = vmax.f32 %v7881_v61, 1e-10  ;;  %v1619_v46 = vmul.f32 %v7958_v1, %v7772_v23 }
 0x325   :  { %v7995_v60 = vpop.eup %4719  ;;  %vm2638_vm1 = vcmp.gt.f32.partialorder %v7979_v16, 0.999  ;;  %4733 = vrsqrt.f32 %v9417_v8  ;;  %v1666_v58 = vmul.f32 %v9936_v4, %v1618_v35  ;;  %v2814_v29 = vsel %vm2622_vm15, %v2766_v50, 1.0 }
 0x326   :  { %v4722_v32 = vpop.eup %4721  ;;  %v8009_v18 = vsel %vm2638_vm1, 0.999, %v7979_v16  ;;  %v8014_v42 = vmul.f32 %v7995_v60, %v9935_v14  ;;  %vm2639_vm2 = vcmp.gt.f32.partialorder %v7993_v22, 0.999  ;;  %v2767_v61 = vmul.f32 0.999, %v7898_v20 }
 0x327   :  { %v3113_v8 = vmul.f32 %v4722_v32, %v3006_v25  ;;  %v3832_v11 = vclamps-f32 %v8009_v18, 0.99999  ;;  %v8028_v14 = vsel %vm2639_vm2, 0.999, %v7993_v22  ;;  %v9937_v25 = vmax.f32 %v7983_v43, 1e-10 }
 0x328   :  { %v4724_v57 = vpop.eup %4723  ;;  %v1634_v4 = vmul.f32 %v7987_v10, %v7774_v21  ;;  %v3007_v24 = vadd.f32 1.0, %v3817_v54  ;;  %v3833_v50 = vclamps-f32 %v8028_v14, 0.99999  ;;  %vm2620_vm4 = vcmp.gt.f32.partialorder %v8014_v42, 0.999 }
 0x329   :  { %4735 = vrsqrt.f32 %v9937_v25  ;;  %v3231_v32 = vmul.f32 0.6931472, %v4724_v57  ;;  %v3070_v18 = vsub.f32 1.0, %v3832_v11  ;;  %v8034_v35 = vpop.eup %4725  ;;  %v1667_v0 = vmul.f32 %v9938_v55, %v1619_v46 }
 0x32a   :  { %4737 = vlog2.f32 %v3113_v8  ;;  %v8044_v57 = vsel %vm2620_vm4, 0.999, %v8014_v42  ;;  %v9939_v8 = vld [vmem:[#allocation114_spill] sm:$0xff]  ;;  %v2719_v54 = vsel %vm2623_vm0, 1.001001, %v7898_v20  ;;  %v2815_v14 = vsel %vm2623_vm0, %v2767_v61, 1.0 }
 0x32b   :  { %v3305_v19 = vmul.f32 0.5, %v3231_v32  ;;  %4739 = vrcp.f32 %v3070_v18  ;;  %v2146_v25 = vmul.f32 %v9939_v8, %v1666_v58  ;;  %v3071_v55 = vsub.f32 1.0, %v3833_v50 }
 0x32c   :  { %v8039_v34 = vpop.eup %4727  ;;  %v3814_v46 = vclamps-f32 %v8044_v57, 0.99999  ;;  %v9940_v17 = vmax.f32 %v7904_v56, 1e-10  ;;  %v1682_v58 = vmul.f32 %v9941_v2, %v1634_v4  ;;  %v2782_v7 = vmul.f32 0.999, %v7969_v62 }
 0x32d   :  { %v4730_v9 = vpop.eup %4729  ;;  %v3353_v32 = vmul.f32 %v3305_v19, %v2873_v63  ;;  %4741 = vrcp.f32 %v3071_v55  ;;  %v2147_v61 = vmul.f32 %v9942_v37, %v1667_v0  ;;  %v3772_v56 = vclamps-f32 %v2146_v25, 15.0  ;;  %v9945_v57 = vld [vmem:[#allocation69_spill] sm:$0xff] }
 0x32e   :  { %v3115_v18 = vmul.f32 %v4730_v9, %v3007_v24  ;;  %v8056_v31 = vmul.f32 %v8034_v35, %v9940_v17  ;;  %v8059_v8 = vpop.eup %4731  ;;  %v3052_v20 = vsub.f32 1.0, %v3814_v46  ;;  %v2862_v9 = vmul.f32 %v2814_v29, %v2718_v53  ;;  %v9944_v24 = vld [vmem:[#allocation63_spill] sm:$0xff] }
 0x32f   :  { %v8063_v59 = vpop.eup %4733  ;;  %v3449_v19 = vmul.f32 %v3353_v32, %v7678_v12  ;;  %v8067_v17 = vmul.f32 %v2815_v14, %v2719_v54  ;;  %v9943_v12 = vmax.f32 %v7963_v5, 1e-10  ;;  %v2162_v29 = vmul.f32 %v9944_v24, %v1682_v58 }
 0x330   :  { %4743 = vlog2.f32 %v3115_v18  ;;  %vm2621_vm5 = vcmp.gt.f32.partialorder %v8056_v31, 0.999  ;;  %v2734_v54 = vsel %vm2638_vm1, 1.001001, %v7969_v62  ;;  %v3773_v49 = vclamps-f32 %v2147_v61, 15.0 }
 0x331   :  { %4745 = vrcp.f32 %v3052_v20  ;;  %v8072_v2 = vsel %vm2621_vm5, 0.999, %v8056_v31  ;;  %v3497_v0 = vsel %vm3401_vm3, %v3449_v19, 0.0  ;;  %v8080_v4 = vmul.f32 %v8063_v59, %v9943_v12 }
 0x332   :  { %v3815_v63 = vclamps-f32 %v8072_v2, 0.99999  ;;  %v3545_v25 = vmul.f32 %v3497_v0, %v9945_v57  ;;  %4747 = vtanh.f32 %v3772_v56  ;;  %vm3390_vm6 = vcmp.gt.f32.partialorder %v7496_v41, 0.0  ;;  %v9951_v41 = vld [vmem:[#allocation111_spill] sm:$0xff] }
 0x333   :  { %v8083_v53 = vpop.eup %4735  ;;  %v2830_v5 = vsel %vm2638_vm1, %v2782_v7, 1.0  ;;  %vm2636_vm7 = vcmp.gt.f32.partialorder %v8080_v4, 0.999  ;;  %v9946_v32 = vmax.f32 %v7983_v43, 1e-10  ;;  %v3022_v58 = vadd.f32 1.0, %v3832_v11 }
 0x334   :  { %v4738_v14 = vpop.eup %4737  ;;  %v3053_v55 = vsub.f32 1.0, %v3815_v63  ;;  %3593 = vst [vmem:[#allocation7 + $0xa8] sm:$0xff] %v3545_v25  ;;  %v8103_v20 = vsel %vm2636_vm7, 0.999, %v8080_v4  ;;  %4749 = vtanh.f32 %v3773_v49  ;;  %v1635_v43 = vmul.f32 %v8039_v34, %v7821_v52 }
 0x335   :  { %v8098_v18 = vmul.f32 %v8083_v53, %v9946_v32  ;;  %v3209_v62 = vmul.f32 0.6931472, %v4738_v14  ;;  %v4740_v7 = vpop.eup %4739  ;;  %v3830_v16 = vclamps-f32 %v8103_v20, 0.99999  ;;  %v1616_v19 = vmul.f32 %v8059_v8, %v7823_v28 }
 0x336   :  { %4751 = vrcp.f32 %v3053_v55  ;;  %v3145_v61 = vmul.f32 %v4740_v7, %v3022_v58  ;;  %v8116_v56 = vmul.f32 %v2830_v5, %v2734_v54  ;;  %v2783_v0 = vmul.f32 0.999, %v7974_v40  ;;  %v9947_v54 = vld [vmem:[#allocation24_spill] sm:$0xff] }
 0x337   :  { %vm2637_vm8 = vcmp.gt.f32.partialorder %v8098_v18, 0.999  ;;  %v3294_v37 = vmul.f32 0.5, %v3209_v62  ;;  %v3023_v12 = vadd.f32 1.0, %v3833_v50  ;;  %v3068_v24 = vsub.f32 1.0, %v3830_v16  ;;  %v4742_v57 = vpop.eup %4741 }
 0x338   :  { %v8112_v11 = vsel %vm2637_vm8, 0.999, %v8098_v18  ;;  %4753 = vlog2.f32 %v3145_v61  ;;  %v3788_v14 = vclamps-f32 %v2162_v29, 15.0  ;;  %vm3391_vm9 = vcmp.gt.f32.partialorder %v7516_v51, 0.0 }
 0x339   :  { %v3342_v25 = vmul.f32 %v3294_v37, %v2862_v9  ;;  %v3831_v49 = vclamps-f32 %v8112_v11, 0.99999  ;;  %v3147_v32 = vmul.f32 %v4742_v57, %v3023_v12  ;;  %v3004_v62 = vadd.f32 1.0, %v3814_v46  ;;  %v9948_v12 = vld [vmem:[#allocation57_spill] sm:$0xff] }
 0x33a   :  { %v4744_v55 = vpop.eup %4743  ;;  %4755 = vrcp.f32 %v3068_v24  ;;  %v1683_v5 = vmul.f32 %v9947_v54, %v1635_v43  ;;  %v2735_v9 = vsel %vm2639_vm2, 1.001001, %v7974_v40  ;;  %v2764_v37 = vmul.f32 0.999, %v7995_v60 }
 0x33b   :  { %v4746_v58 = vpop.eup %4745  ;;  %v3438_v50 = vmul.f32 %v3342_v25, %v7743_v3  ;;  %v3211_v7 = vmul.f32 0.6931472, %v4744_v55  ;;  %4757 = vlog2.f32 %v3147_v32  ;;  %v3069_v61 = vsub.f32 1.0, %v3831_v49  ;;  %v9949_v3 = vld [vmem:[#allocation12_spill] sm:$0xff]  ;;  %v9950_v55 = vld [vmem:[#allocation78_spill] sm:$0xff] }
 0x33c   :  { %v3109_v29 = vmul.f32 %v4746_v58, %v3004_v62  ;;  %v2163_v46 = vmul.f32 %v9948_v12, %v1683_v5  ;;  %v4748_v24 = vpop.eup %4747  ;;  %4759 = vtanh.f32 %v3788_v14  ;;  %v1664_v25 = vmul.f32 %v9949_v3, %v1616_v19 }
 0x33d   :  { %v3486_v43 = vsel %vm3390_vm6, %v3438_v50, 0.0  ;;  %v3295_v57 = vmul.f32 0.5, %v3211_v7  ;;  %v8137_v40 = vmul.f32 %v4748_v24, %v7950_v26  ;;  %v3005_v5 = vadd.f32 1.0, %v3815_v63 }
 0x33e   :  { %v3534_v54 = vmul.f32 %v9950_v55, %v3486_v43  ;;  %4761 = vlog2.f32 %v3109_v29  ;;  %v3789_v32 = vclamps-f32 %v2163_v46, 15.0  ;;  %v4750_v62 = vpop.eup %4749  ;;  %v2144_v50 = vmul.f32 %v9951_v41, %v1664_v25  ;;  %v9953_v46 = vld [vmem:[#allocation80_spill] sm:$0xff] }
 0x33f   :  { %v3343_v58 = vmul.f32 %v3295_v57, %v8067_v17  ;;  %4763 = vrcp.f32 %v3069_v61  ;;  %v2831_v19 = vsel %vm2639_vm2, %v2783_v0, 1.0  ;;  %v2386_v14 = vmul.f32 %v8137_v40, %v8137_v40 }
 0x340   :  { %v4752_v7 = vpop.eup %4751  ;;  %3582 = vst [vmem:[#allocation7 + $0x50] sm:$0xff] %v3534_v54  ;;  %v8148_v26 = vmul.f32 %v4750_v62, %v7958_v1  ;;  %4765 = vtanh.f32 %v3789_v32  ;;  %v2716_v2 = vsel %vm2620_vm4, 1.001001, %v7995_v60  ;;  %v3770_v29 = vclamps-f32 %v2144_v50, 15.0 }
 0x341   :  { %v3439_v17 = vmul.f32 %v3343_v58, %v7770_v48  ;;  %v3111_v63 = vmul.f32 %v4752_v7, %v3005_v5  ;;  %v2812_v61 = vsel %vm2620_vm4, %v2764_v37, 1.0  ;;  %v8157_v22 = vmul.f32 %v2386_v14, %v7747_v44 }
 0x342   :  { %v2387_v0 = vmul.f32 %v8148_v26, %v8148_v26  ;;  %v9952_v1 = vmax.f32 %v7864_v27, 1e-30  ;;  %v4754_v12 = vpop.eup %4753  ;;  %vm3406_vm10 = vcmp.gt.f32.partialorder %v7537_v6, 0.0  ;;  %v2765_v60 = vmul.f32 0.999, %v8034_v35 }
 0x343   :  { %v3487_v48 = vsel %vm3391_vm9, %v3439_v17, 0.0  ;;  %v3020_v42 = vadd.f32 1.0, %v3830_v16  ;;  %v3241_v43 = vmul.f32 0.6931472, %v4754_v12  ;;  %v2482_v57 = vmax.f32 %v8157_v22, 1e-10 }
 0x344   :  { %4767 = vrsqrt.f32 %v9952_v1  ;;  %v4756_v37 = vpop.eup %4755  ;;  %v3535_v24 = vmul.f32 %v9953_v46, %v3487_v48  ;;  %v8172_v3 = vmul.f32 %v2387_v0, %v7772_v23  ;;  %v2879_v25 = vmul.f32 %v2831_v19, %v2735_v9 }
 0x345   :  { %4769 = vlog2.f32 %v3111_v63  ;;  %v2780_v51 = vmul.f32 0.999, %v8063_v59  ;;  %v3141_v55 = vmul.f32 %v4756_v37, %v3020_v42  ;;  %v4758_v54 = vpop.eup %4757  ;;  %v3310_v32 = vmul.f32 0.5, %v3241_v43 }
 0x346   :  { %4771 = vtanh.f32 %v3770_v29  ;;  %3583 = vst [vmem:[#allocation7 + $0x58] sm:$0xff] %v3535_v24  ;;  %vm3407_vm11 = vcmp.gt.f32.partialorder %v7563_v30, 0.0  ;;  %v2860_v20 = vmul.f32 %v2812_v61, %v2716_v2  ;;  %v2483_v16 = vmax.f32 %v8172_v3, 1e-10  ;;  %v4760_v62 = vpop.eup %4759 }
 0x347   :  { %4773 = vrsqrt.f32 %v2482_v57  ;;  %v3243_v58 = vmul.f32 0.6931472, %v4758_v54  ;;  %v2717_v9 = vsel %vm2621_vm5, 1.001001, %v8034_v35  ;;  %v2813_v5 = vsel %vm2621_vm5, %v2765_v60, 1.0  ;;  %v9955_v60 = vld [vmem:[#allocation82_spill] sm:$0xff] }
 0x348   :  { %4775 = vlog2.f32 %v3141_v55  ;;  %v4762_v41 = vpop.eup %4761  ;;  %v3358_v50 = vmul.f32 %v3310_v32, %v8116_v56  ;;  %vm3388_vm12 = vcmp.gt.f32.partialorder %v7586_v38, 0.0  ;;  %v3021_v7 = vadd.f32 1.0, %v3831_v49 }
 0x349   :  { %4777 = vrsqrt.f32 %v2483_v16  ;;  %v8191_v19 = vmul.f32 %v4760_v62, %v7987_v10  ;;  %v4764_v14 = vpop.eup %4763  ;;  %v3311_v35 = vmul.f32 0.5, %v3243_v58  ;;  %v3205_v17 = vmul.f32 0.6931472, %v4762_v41  ;;  %v9958_v62 = vld [vmem:[#allocation85_spill] sm:$0xff] }
 0x34a   :  { %v2732_v31 = vsel %vm2636_vm7, 1.001001, %v8063_v59  ;;  %v2828_v56 = vsel %vm2636_vm7, %v2780_v51, 1.0  ;;  %v4766_v2 = vpop.eup %4765  ;;  %v3454_v11 = vmul.f32 %v3358_v50, %v7834_v39  ;;  %v2861_v49 = vmul.f32 %v2813_v5, %v2717_v9 }
 0x34b   :  { %v3143_v63 = vmul.f32 %v4764_v14, %v3021_v7  ;;  %v2402_v29 = vmul.f32 %v8191_v19, %v8191_v19  ;;  %v3359_v10 = vmul.f32 %v3311_v35, %v2879_v25  ;;  %v3292_v61 = vmul.f32 0.5, %v3205_v17  ;;  %v9959_v35 = vld [vmem:[#allocation79_spill] sm:$0xff] }
 0x34c   :  { %v8202_v0 = vmul.f32 %v4766_v2, %v8039_v34  ;;  %v9954_v1 = vmax.f32 %v7866_v36, 1e-30  ;;  %v3502_v4 = vsel %vm3406_vm10, %v3454_v11, 0.0  ;;  %v2876_v12 = vmul.f32 %v2828_v56, %v2732_v31  ;;  %v9960_v56 = vld [vmem:[#allocation75_spill] sm:$0xff] }
 0x34d   :  { %v8211_v39 = vmul.f32 %v2402_v29, %v7774_v21  ;;  %v3550_v42 = vmul.f32 %v9955_v60, %v3502_v4  ;;  %v3455_v37 = vmul.f32 %v3359_v10, %v7838_v33  ;;  %v3340_v34 = vmul.f32 %v3292_v61, %v2860_v20  ;;  %v9961_v29 = vld [vmem:[#allocation61_spill] sm:$0xff] }
 0x34e   :  { %4779 = vrsqrt.f32 %v9954_v1  ;;  %v8206_v59 = vpop.eup %4767  ;;  %vm3389_vm13 = vcmp.gt.f32.partialorder %v7604_v47, 0.0  ;;  %v2403_v46 = vmul.f32 %v8202_v0, %v8202_v0  ;;  %v2781_v6 = vmul.f32 0.999, %v8083_v53 }
 0x34f   :  { %4781 = vlog2.f32 %v3143_v63  ;;  %v4770_v48 = vpop.eup %4769  ;;  %v2498_v43 = vmax.f32 %v8211_v39, 1e-10  ;;  %v9956_v25 = vmax.f32 %v7906_v45, 1e-30  ;;  %3598 = vst [vmem:[#allocation7 + $0xd0] sm:$0xff] %v3550_v42  ;;  %v3503_v55 = vsel %vm3407_vm11, %v3455_v37, 0.0 }
 0x350   :  { %v3207_v24 = vmul.f32 0.6931472, %v4770_v48  ;;  %v4772_v51 = vpop.eup %4771  ;;  %v3436_v33 = vmul.f32 %v3340_v34, %v7846_v13  ;;  %v8226_v54 = vmul.f32 %v2403_v46, %v7821_v52  ;;  %v9957_v32 = vmax.f32 %v7908_v15, 1e-30  ;;  %v9963_v48 = vld [vmem:[#allocation27_spill] sm:$0xff]  ;;  %v9964_v42 = vld [vmem:[#allocation81_spill] sm:$0xff] }
 0x351   :  { %4783 = vrsqrt.f32 %v9956_v25  ;;  %v8230_v20 = vpop.eup %4773  ;;  %v3551_v58 = vmul.f32 %v9958_v62, %v3503_v55  ;;  %v8236_v5 = vmul.f32 %v4772_v51, %v8059_v8  ;;  %v1617_v7 = vmul.f32 %v8206_v59, %v7864_v27  ;;  %v9965_v34 = vld [vmem:[#allocation51_spill] sm:$0xff]  ;;  %v9966_v25 = vld [vmem:[#allocation50_spill] sm:$0xff]  ;;  %v9967_v55 = vld [vmem:[#allocation37_spill] sm:$0xff] }
 0x352   :  { %4785 = vrsqrt.f32 %v9957_v32  ;;  %v3293_v9 = vmul.f32 0.5, %v3207_v24  ;;  %v4776_v30 = vpop.eup %4775  ;;  %v3484_v13 = vsel %vm3388_vm12, %v3436_v33, 0.0  ;;  %v8243_v41 = vmul.f32 %v8230_v20, %v2482_v57  ;;  %v9980_v39 = vld [vmem:[#allocation42_spill] sm:$0xff] }
 0x353   :  { %4787 = vrsqrt.f32 %v2498_v43  ;;  %v2499_v50 = vmax.f32 %v8226_v54, 1e-10  ;;  %v8248_v14 = vpop.eup %4777  ;;  %3599 = vst [vmem:[#allocation7 + $0xd8] sm:$0xff] %v3551_v58  ;;  %v3532_v8 = vmul.f32 %v3484_v13, %v9959_v35  ;;  %v3237_v31 = vmul.f32 0.6931472, %v4776_v30  ;;  %v9969_v13 = vld [vmem:[#allocation52_spill] sm:$0xff] }
 0x354   :  { %v3341_v17 = vmul.f32 %v3293_v9, %v2861_v49  ;;  %v2384_v38 = vmul.f32 %v8236_v5, %v8236_v5  ;;  %v2733_v22 = vsel %vm2637_vm8, 1.001001, %v8083_v53  ;;  %vm2626_vm14 = vcmp.gt.f32.partialorder %v8243_v41, 0.999  ;;  %v9982_v54 = vld [vmem:[#allocation115_spill] sm:$0xff] }
 0x355   :  { %v8260_v57 = vmul.f32 %v8248_v14, %v2483_v16  ;;  %4789 = vrsqrt.f32 %v2499_v50  ;;  %3580 = vst [vmem:[#allocation7 + $0x40] sm:$0xff] %v3532_v8  ;;  %v3308_v11 = vmul.f32 0.5, %v3237_v31  ;;  %v2829_v49 = vsel %vm2637_vm8, %v2781_v6, 1.0  ;;  %v9970_v8 = vld [vmem:[#allocation108_spill] sm:$0xff] }
 0x356   :  { %v3437_v2 = vmul.f32 %v3341_v17, %v9960_v56  ;;  %v8270_v53 = vsel %vm2626_vm14, 0.999, %v8243_v41  ;;  %v8277_v16 = vmul.f32 %v2384_v38, %v7823_v28  ;;  %v9962_v10 = vmax.f32 %v9961_v29, 1e-30  ;;  %v9971_v31 = vld [vmem:[#allocation48_spill] sm:$0xff] }
 0x357   :  { %v3820_v3 = vclamps-f32 %v8270_v53, 0.99999  ;;  %vm2627_vm15 = vcmp.gt.f32.partialorder %v8260_v57, 0.999  ;;  %v3356_v1 = vmul.f32 %v3308_v11, %v2876_v12  ;;  %v1665_v60 = vmul.f32 %v9963_v48, %v1617_v7  ;;  %v9974_v53 = vld [vmem:[#allocation41_spill] sm:$0xff]  ;;  %v9977_v48 = vld [vmem:[#allocation116_spill] sm:$0xff] }
 0x358   :  { %v8272_v63 = vpop.eup %4779  ;;  %4791 = vrsqrt.f32 %v9962_v10  ;;  %v3485_v18 = vsel %vm3389_vm13, %v3437_v2, 0.0  ;;  %v8286_v4 = vsel %vm2627_vm15, 0.999, %v8260_v57  ;;  %vm3404_vm0 = vcmp.gt.f32.partialorder %v9965_v34, 0.0  ;;  %v9973_v2 = vld [vmem:[#allocation83_spill] sm:$0xff] }
 0x359   :  { %v4782_v61 = vpop.eup %4781  ;;  %v3533_v37 = vmul.f32 %v3485_v18, %v9964_v42  ;;  %v3058_v24 = vsub.f32 1.0, %v3820_v3  ;;  %v3452_v51 = vmul.f32 %v3356_v1, %v9966_v25  ;;  %v3821_v47 = vclamps-f32 %v8286_v4, 0.99999  ;;  %v9976_v18 = vld [vmem:[#allocation14_spill] sm:$0xff] }
 0x35a   :  { %v3239_v46 = vmul.f32 0.6931472, %v4782_v61  ;;  %v1632_v12 = vmul.f32 %v8272_v63, %v7866_v36  ;;  %v9968_v33 = vmax.f32 %v9967_v55, 1e-30  ;;  %v2877_v62 = vmul.f32 %v2829_v49, %v2733_v22 }
 0x35b   :  { %v8291_v6 = vpop.eup %4783  ;;  %3581 = vst [vmem:[#allocation7 + $0x48] sm:$0xff] %v3533_v37  ;;  %v2480_v9 = vmax.f32 %v8277_v16, 1e-10  ;;  %v3500_v7 = vsel %vm3404_vm0, %v3452_v51, 0.0  ;;  %v3059_v35 = vsub.f32 1.0, %v3821_v47  ;;  %v2145_v17 = vmul.f32 %v9970_v8, %v1665_v60  ;;  %v9979_v37 = vld [vmem:[#allocation128_spill] sm:$0xff] }
 0x35c   :  { %4793 = vrsqrt.f32 %v9968_v33  ;;  %v8299_v32 = vpop.eup %4785  ;;  %v3309_v58 = vmul.f32 0.5, %v3239_v46  ;;  %v9972_v38 = vclamps-f32 %v9971_v31, 0.99999  ;;  %v3548_v11 = vmul.f32 %v3500_v7, %v9973_v2  ;;  %v10000_v16 = vld [vmem:[#allocation49_spill] sm:$0xff] }
 0x35d   :  { %4795 = vrcp.f32 %v3058_v24  ;;  %v8302_v30 = vpop.eup %4787  ;;  %v8317_v10 = vmul.f32 0.6931472, %v9974_v53  ;;  %v3771_v61 = vclamps-f32 %v2145_v17, 15.0  ;;  %v1680_v1 = vmul.f32 %v9976_v18, %v1632_v12 }
 0x35e   :  { %4797 = vlog2.f32 %v9969_v13  ;;  %v1891_v56 = vsub.f32 1.0, %v9972_v38  ;;  %v3357_v22 = vmul.f32 %v3309_v58, %v2877_v62  ;;  %v8314_v49 = vmul.f32 %v8302_v30, %v2498_v43  ;;  %3596 = vst [vmem:[#allocation7 + $0xc0] sm:$0xff] %v3548_v11  ;;  %v9981_v62 = vld [vmem:[#allocation86_spill] sm:$0xff]  ;;  %v9983_v13 = vld [vmem:[#allocation117_spill] sm:$0xff]  ;;  %v9984_v11 = vld [vmem:[#allocation15_spill] sm:$0xff] }
 0x35f   :  { %9975 = vst [vmem:[#allocation40_spill] sm:$0xff] %v8317_v10  ;;  %4799 = vrcp.f32 %v3059_v35  ;;  %v8320_v4 = vpop.eup %4789  ;;  %v9978_v60 = vclamps-f32 %v9977_v48, 0.99999  ;;  %vm3405_vm2 = vcmp.gt.f32.partialorder %v9980_v39, 0.0  ;;  %v1633_v24 = vmul.f32 %v8291_v6, %v7906_v45 }
 0x360   :  { %v3453_v34 = vmul.f32 %v3357_v22, %v9979_v37  ;;  %vm2642_vm1 = vcmp.gt.f32.partialorder %v8314_v49, 0.999  ;;  %4801 = vrsqrt.f32 %v2480_v9  ;;  %v8337_v46 = vmul.f32 %v8320_v4, %v2499_v50 }
 0x361   :  { %v1890_v42 = vsub.f32 1.0, %v9978_v60  ;;  %v8332_v43 = vsel %vm2642_vm1, 0.999, %v8314_v49  ;;  %4803 = vrcp.f32 %v1891_v56  ;;  %v1638_v33 = vmul.f32 %v8299_v32, %v7908_v15 }
 0x362   :  { %v8341_v25 = vpop.eup %4791  ;;  %v3501_v51 = vsel %vm3405_vm2, %v3453_v34, 0.0  ;;  %v3836_v12 = vclamps-f32 %v8332_v43, 0.99999  ;;  %vm2643_vm3 = vcmp.gt.f32.partialorder %v8337_v46, 0.999  ;;  %4805 = vtanh.f32 %v3771_v61  ;;  %v9985_v61 = vld [vmem:[#allocation129_spill] sm:$0xff] }
 0x363   :  { %v3549_v58 = vmul.f32 %v3501_v51, %v9981_v62  ;;  %v2160_v50 = vmul.f32 %v9982_v54, %v1680_v1  ;;  %v2067_v7 = vmul.f32 0.6931472, %v9983_v13  ;;  %4807 = vrcp.f32 %v1890_v42  ;;  %v9987_v1 = vld [vmem:[#allocation32_spill] sm:$0xff]  ;;  %v9988_v43 = vld [vmem:[#allocation59_spill] sm:$0xff] }
 0x364   :  { %v3074_v35 = vsub.f32 1.0, %v3836_v12  ;;  %v8353_v8 = vsel %vm2643_vm3, 0.999, %v8337_v46  ;;  %v3010_v38 = vadd.f32 1.0, %v3820_v3  ;;  %v1681_v22 = vmul.f32 %v9984_v11, %v1633_v24  ;;  %v9989_v24 = vld [vmem:[#allocation123_spill] sm:$0xff] }
 0x365   :  { %3597 = vst [vmem:[#allocation7 + $0xc8] sm:$0xff] %v3549_v58  ;;  %v3837_v56 = vclamps-f32 %v8353_v8, 0.99999  ;;  %v3786_v2 = vclamps-f32 %v2160_v50, 15.0  ;;  %v8360_v18 = vmul.f32 0.6931472, %v9985_v61  ;;  %v1686_v60 = vmul.f32 %v9987_v1, %v1638_v33 }
 0x366   :  { %v8355_v17 = vpop.eup %4793  ;;  %4809 = vrcp.f32 %v3074_v35  ;;  %v1639_v42 = vmul.f32 %v8341_v25, %v9961_v29  ;;  %v3011_v39 = vadd.f32 1.0, %v3821_v47  ;;  %v2161_v51 = vmul.f32 %v9988_v43, %v1681_v22  ;;  %v9990_v58 = vld [vmem:[#allocation31_spill] sm:$0xff]  ;;  %v8390_v43 = vpop.xlane.xlu1 %1498 }
 0x367   :  { %v4796_v53 = vpop.eup %4795  ;;  %9986 = vst [vmem:[#allocation70_spill] sm:$0xff] %v8360_v18  ;;  %v3075_v3 = vsub.f32 1.0, %v3837_v56  ;;  %4811 = vtanh.f32 %v3786_v2  ;;  %v2166_v62 = vmul.f32 %v9989_v24, %v1686_v60  ;;  %v1646_v50 = vmul.f32 %v8355_v17, %v9967_v55  ;;  %v9995_v60 = vld [vmem:[#allocation53_spill] sm:$0xff]  ;;  %9997 = vst [vmem:[#allocation54_spill] sm:$0xff] %v8390_v43 }
 0x368   :  { %v4798_v37 = vpop.eup %4797  ;;  %v3121_v34 = vmul.f32 %v4796_v53, %v3010_v38  ;;  %v1687_v54 = vmul.f32 %v9990_v58, %v1639_v42  ;;  %v9991_v13 = vclamps-f32 %v9971_v31, 0.99999  ;;  %v8376_v47 = vmul.f32 0.5, %v2067_v7  ;;  %v9993_v38 = vld [vmem:[#allocation76_spill] sm:$0xff] }
 0x369   :  { %v4800_v33 = vpop.eup %4799  ;;  %v8379_v11 = vmul.f32 0.5, %v9993_v38  ;;  %v2065_v22 = vmul.f32 0.6931472, %v4798_v37  ;;  %v3787_v61 = vclamps-f32 %v2161_v51, 15.0  ;;  %v3792_v31 = vclamps-f32 %v2166_v62, 15.0  ;;  %v10002_v62 = vld [vmem:[#allocation43_spill] sm:$0xff] }
 0x36a   :  { %v8374_v35 = vadd.f32 1.0, %v9991_v13  ;;  %4813 = vlog2.f32 %v3121_v34  ;;  %v8381_v2 = vpop.eup %4801  ;;  %v3123_v53 = vmul.f32 %v4800_v33, %v3011_v39  ;;  %v2167_v42 = vmul.f32 %v9995_v60, %v1687_v54  ;;  %v9996_v34 = vld [vmem:[#allocation35_spill] sm:$0xff] }
 0x36b   :  { %9994 = vst [vmem:[#allocation71_spill] sm:$0xff] %v8379_v11  ;;  %4815 = vrcp.f32 %v3075_v3  ;;  %v8386_v1 = vmul.f32 %v8381_v2, %v2480_v9  ;;  %v1694_v7 = vmul.f32 %v9996_v34, %v1646_v50  ;;  %v8392_v24 = vpop.eup %4803  ;;  %v9999_v58 = vclamps-f32 %v9977_v48, 0.99999 }
 0x36c   :  { %9992 = vst [vmem:[#allocation126_spill] sm:$0xff] %v8374_v35  ;;  %9998 = vst [vmem:[#allocation56_spill] sm:$0xff] %v8392_v24  ;;  %v2770_v39 = vmul.f32 0.999, %v8230_v20  ;;  %4817 = vlog2.f32 %v3123_v53  ;;  %v8400_v3 = vmul.f32 0.5, %v10000_v16  ;;  %v4806_v9 = vpop.eup %4805  ;;  %v3793_v51 = vclamps-f32 %v2167_v42, 15.0 }
 0x36d   :  { %v8396_v37 = vadd.f32 1.0, %v9999_v58  ;;  %vm2624_vm4 = vcmp.gt.f32.partialorder %v8386_v1, 0.999  ;;  %4819 = vtanh.f32 %v3787_v61  ;;  %v2174_v54 = vmul.f32 %v10002_v62, %v1694_v7  ;;  %v8404_v50 = vpop.eup %4807  ;;  %v8425_v58 = vpop.xlane.xlu0 %1476 }
 0x36e   :  { %10001 = vst [vmem:[#allocation92_spill] sm:$0xff] %v8400_v3  ;;  %10003 = vst [vmem:[#allocation16_spill] sm:$0xff] %v8404_v50  ;;  %v8409_v48 = vsel %vm2624_vm4, 0.999, %v8386_v1  ;;  %v8412_v33 = vmul.f32 %v4806_v9, %v8206_v59  ;;  %v1551_v13 = vmax.f32 %v8390_v43, 1e-30  ;;  %4821 = vtanh.f32 %v3792_v31 }
 0x36f   :  { %v8415_v38 = vmul.f32 0.5, %v2065_v22  ;;  %v3026_v53 = vadd.f32 1.0, %v3836_v12  ;;  %v3818_v61 = vclamps-f32 %v8409_v48, 0.99999  ;;  %v3800_v60 = vclamps-f32 %v2174_v54, 15.0 }
 0x370   :  { %v4810_v42 = vpop.eup %4809  ;;  %v2722_v34 = vsel %vm2626_vm14, 1.001001, %v8230_v20  ;;  %v2818_v7 = vsel %vm2626_vm14, %v2770_v39, 1.0  ;;  %v2385_v59 = vmul.f32 %v8412_v33, %v8412_v33  ;;  %4823 = vtanh.f32 %v3793_v51 }
 0x371   :  { %v4812_v22 = vpop.eup %4811  ;;  %v2771_v12 = vmul.f32 0.999, %v8248_v14  ;;  %v3153_v16 = vmul.f32 %v4810_v42, %v3026_v53  ;;  %v3056_v31 = vsub.f32 1.0, %v3818_v61  ;;  %4825 = vtanh.f32 %v3800_v60  ;;  %v8442_v42 = vpop.xlane.xlu1 %1478 }
 0x372   :  { %v2786_v9 = vmul.f32 0.999, %v8302_v30  ;;  %v8430_v62 = vmul.f32 %v2385_v59, %v7864_v27  ;;  %v8433_v20 = vmul.f32 %v4812_v22, %v8272_v63  ;;  %4827 = vrsqrt.f32 %v1551_v13 }
 0x373   :  { %v2866_v39 = vmul.f32 %v2818_v7, %v2722_v34  ;;  %vm3394_vm5 = vcmp.gt.f32.partialorder %v7747_v44, 0.0  ;;  %4829 = vlog2.f32 %v3153_v16  ;;  %v3027_v51 = vadd.f32 1.0, %v3837_v56 }
 0x374   :  { %v4814_v41 = vpop.eup %4813  ;;  %v1540_v54 = vmax.f32 %v8425_v58, 1e-30  ;;  %4831 = vrcp.f32 %v3056_v31  ;;  %v2481_v60 = vmax.f32 %v8430_v62, 1e-10  ;;  %v2400_v63 = vmul.f32 %v8433_v20, %v8433_v20 }
 0x375   :  { %v4816_v48 = vpop.eup %4815  ;;  %v3217_v53 = vmul.f32 0.6931472, %v4814_v41  ;;  %v2723_v13 = vsel %vm2627_vm15, 1.001001, %v8248_v14  ;;  %v2819_v8 = vsel %vm2627_vm15, %v2771_v12, 1.0  ;;  %v2834_v22 = vsel %vm2642_vm1, %v2786_v9, 1.0 }
 0x376   :  { %v2738_v56 = vsel %vm2642_vm1, 1.001001, %v8302_v30  ;;  %v3155_v34 = vmul.f32 %v4816_v48, %v3027_v51  ;;  %v4818_v7 = vpop.eup %4817  ;;  %4833 = vrsqrt.f32 %v2481_v60  ;;  %v8457_v16 = vmul.f32 %v2400_v63, %v7866_v36 }
 0x377   :  { %v3298_v59 = vmul.f32 0.5, %v3217_v53  ;;  %v4820_v14 = vpop.eup %4819  ;;  %v3219_v31 = vmul.f32 0.6931472, %v4818_v7  ;;  %vm3395_vm6 = vcmp.gt.f32.partialorder %v7772_v23, 0.0  ;;  %v2867_v12 = vmul.f32 %v2819_v8, %v2723_v13 }
 0x378   :  { %4835 = vlog2.f32 %v3155_v34  ;;  %v2496_v41 = vmax.f32 %v8457_v16, 1e-10  ;;  %v8463_v49 = vmul.f32 %v4820_v14, %v8291_v6  ;;  %v4822_v9 = vpop.eup %4821  ;;  %v2882_v48 = vmul.f32 %v2834_v22, %v2738_v56 }
 0x379   :  { %v3346_v30 = vmul.f32 %v3298_v59, %v2866_v39  ;;  %v3299_v51 = vmul.f32 0.5, %v3219_v31  ;;  %v2787_v53 = vmul.f32 0.999, %v8320_v4  ;;  %4837 = vrsqrt.f32 %v1540_v54 }
 0x37a   :  { %v4824_v63 = vpop.eup %4823  ;;  %4839 = vrsqrt.f32 %v2496_v41  ;;  %v2401_v39 = vmul.f32 %v8463_v49, %v8463_v49  ;;  %v8472_v13 = vmul.f32 %v4822_v9, %v8299_v32  ;;  %v2739_v56 = vsel %vm2643_vm3, 1.001001, %v8320_v4 }
 0x37b   :  { %v3442_v7 = vmul.f32 %v3346_v30, %v8137_v40  ;;  %v4826_v6 = vpop.eup %4825  ;;  %v3347_v8 = vmul.f32 %v3299_v51, %v2867_v12  ;;  %v3008_v34 = vadd.f32 1.0, %v3818_v61  ;;  %v8478_v54 = vmul.f32 %v4824_v63, %v8341_v25  ;;  %v8480_v40 = vpop.xlane.xlu0 %1492  ;;  %v10005_v61 = vld [vmem:[#allocation26_spill] sm:$0xff] }
 0x37c   :  { %v8482_v59 = vpop.eup %4827  ;;  %v8487_v32 = vmul.f32 %v2401_v39, %v7906_v45  ;;  %v2406_v14 = vmul.f32 %v8472_v13, %v8472_v13  ;;  %v8492_v31 = vmul.f32 %v4826_v6, %v8355_v17  ;;  %v2835_v39 = vsel %vm2643_vm3, %v2787_v53, 1.0 }
 0x37d   :  { %v3490_v22 = vsel %vm3394_vm5, %v3442_v7, 0.0  ;;  %v4830_v4 = vpop.eup %4829  ;;  %v3443_v30 = vmul.f32 %v3347_v8, %v8148_v26  ;;  %v2407_v12 = vmul.f32 %v8478_v54, %v8478_v54  ;;  %v1647_v44 = vmul.f32 %v8482_v59, %v8390_v43 }
 0x37e   :  { %10004 = vst [vmem:[#allocation65_spill] sm:$0xff] %v8492_v31  ;;  %v3538_v25 = vmul.f32 %v10005_v61, %v3490_v22  ;;  %v4832_v9 = vpop.eup %4831  ;;  %v3249_v51 = vmul.f32 0.6931472, %v4830_v4  ;;  %v2497_v63 = vmax.f32 %v8487_v32, 1e-10  ;;  %v8502_v7 = vmul.f32 %v2406_v14, %v7908_v15  ;;  %v8513_v22 = vpop.xlane.xlu1 %1494  ;;  %v10006_v14 = vld [vmem:[#allocation22_spill] sm:$0xff] }
 0x37f   :  { %v2414_v17 = vmul.f32 %v8492_v31, %v8492_v31  ;;  %v3491_v26 = vsel %vm3395_vm6, %v3443_v30, 0.0  ;;  %v3117_v6 = vmul.f32 %v4832_v9, %v3008_v34  ;;  %v8511_v8 = vmul.f32 %v2407_v12, %v9961_v29  ;;  %v10007_v34 = vld [vmem:[#allocation33_spill] sm:$0xff]  ;;  %v8528_v12 = vpop.xlane.xlu0 %1488 }
 0x380   :  { %3586 = vst [vmem:[#allocation7 + $0x70] sm:$0xff] %v3538_v25  ;;  %v8515_v4 = vpop.eup %4833  ;;  %v3539_v61 = vmul.f32 %v10006_v14, %v3491_v26  ;;  %v3314_v57 = vmul.f32 0.5, %v3249_v51  ;;  %4841 = vrsqrt.f32 %v2497_v63  ;;  %v9433_v23 = vmax.f32 %v8502_v7, 1e-10 }
 0x381   :  { %4843 = vlog2.f32 %v3117_v6  ;;  %v8524_v46 = vmul.f32 %v8515_v4, %v2481_v60  ;;  %v9432_v53 = vmax.f32 %v8511_v8, 1e-10  ;;  %v1695_v30 = vmul.f32 %v10007_v34, %v1647_v44 }
 0x382   :  { %v4836_v25 = vpop.eup %4835  ;;  %3587 = vst [vmem:[#allocation7 + $0x78] sm:$0xff] %v3539_v61  ;;  %v3362_v9 = vmul.f32 %v3314_v57, %v2882_v48  ;;  %4845 = vrsqrt.f32 %v9433_v23  ;;  %v8533_v26 = vmul.f32 %v2414_v17, %v9967_v55  ;;  %vm3410_vm7 = vcmp.gt.f32.partialorder %v7774_v21, 0.0  ;;  %v10008_v61 = vld [vmem:[#allocation45_spill] sm:$0xff] }
 0x383   :  { %v3251_v51 = vmul.f32 0.6931472, %v4836_v25  ;;  %v8535_v6 = vpop.eup %4837  ;;  %vm2625_vm8 = vcmp.gt.f32.partialorder %v8524_v46, 0.999  ;;  %4847 = vrsqrt.f32 %v9432_v53  ;;  %v1548_v62 = vmax.f32 %v8480_v40, 1e-30 }
 0x384   :  { %v8542_v60 = vpop.eup %4839  ;;  %v3458_v57 = vmul.f32 %v3362_v9, %v8191_v19  ;;  %v2883_v48 = vmul.f32 %v2835_v39, %v2739_v56  ;;  %v8548_v17 = vsel %vm2625_vm8, 0.999, %v8524_v46  ;;  %v2175_v25 = vmul.f32 %v10008_v61, %v1695_v30  ;;  %v8559_v19 = vpop.xlane.xlu1 %1490  ;;  %v10010_v53 = vld [vmem:[#allocation34_spill] sm:$0xff] }
 0x385   :  { %v3315_v44 = vmul.f32 0.5, %v3251_v51  ;;  %v9434_v21 = vclamps-f32 %v8548_v17, 0.99999  ;;  %v8554_v14 = vmul.f32 %v8542_v60, %v2496_v41  ;;  %v10009_v34 = vmax.f32 %v8442_v42, 1e-30  ;;  %v8569_v30 = vpop.xlane.xlu0 %1484 }
 0x386   :  { %v3506_v56 = vsel %vm3410_vm7, %v3458_v57, 0.0  ;;  %v2768_v9 = vmul.f32 0.999, %v8381_v2  ;;  %v9435_v51 = vmax.f32 %v8533_v26, 1e-10  ;;  %v1636_v41 = vmul.f32 %v8535_v6, %v8425_v58 }
 0x387   :  { %4849 = vrsqrt.f32 %v10009_v34  ;;  %v3363_v39 = vmul.f32 %v3315_v44, %v2883_v48  ;;  %v3554_v23 = vmul.f32 %v10010_v53, %v3506_v56  ;;  %v3057_v16 = vsub.f32 1.0, %v9434_v21 }
 0x388   :  { %vm2640_vm9 = vcmp.gt.f32.partialorder %v8554_v14, 0.999  ;;  %vm3411_vm10 = vcmp.gt.f32.partialorder %v7821_v52, 0.0  ;;  %4851 = vrsqrt.f32 %v1548_v62  ;;  %v3801_v44 = vclamps-f32 %v2175_v25, 15.0  ;;  %v10011_v62 = vld [vmem:[#allocation20_spill] sm:$0xff] }
 0x389   :  { %v3459_v57 = vmul.f32 %v3363_v39, %v8202_v0  ;;  %v8576_v48 = vsel %vm2640_vm9, 0.999, %v8554_v14  ;;  %3602 = vst [vmem:[#allocation7 + $0xf0] sm:$0xff] %v3554_v23  ;;  %4853 = vrcp.f32 %v3057_v16  ;;  %v1549_v61 = vmax.f32 %v8513_v22, 1e-30 }
 0x38a   :  { %v9436_v53 = vclamps-f32 %v8576_v48, 0.99999  ;;  %v8580_v34 = vpop.eup %4841  ;;  %v2720_v52 = vsel %vm2624_vm4, 1.001001, %v8381_v2  ;;  %v2816_v0 = vsel %vm2624_vm4, %v2768_v9, 1.0  ;;  %4855 = vrsqrt.f32 %v9435_v51  ;;  %v8598_v2 = vpop.xlane.xlu1 %1486 }
 0x38b   :  { %v3507_v56 = vsel %vm3411_vm10, %v3459_v57, 0.0  ;;  %v4844_v23 = vpop.eup %4843  ;;  %v8595_v16 = vmul.f32 %v8580_v34, %v2497_v63  ;;  %v10012_v57 = vld [vmem:[#allocation30_spill] sm:$0xff]  ;;  %4857 = vtanh.f32 %v3801_v44  ;;  %v10013_v32 = vmax.f32 %v8502_v7, 1e-10 }
 0x38c   :  { %v3555_v39 = vmul.f32 %v10011_v62, %v3507_v56  ;;  %v3072_v25 = vsub.f32 1.0, %v9436_v53  ;;  %v1684_v21 = vmul.f32 %v10012_v57, %v1636_v41  ;;  %v8600_v1 = vpop.eup %4845  ;;  %v3213_v9 = vmul.f32 0.6931472, %v4844_v23  ;;  %v8613_v57 = vpop.xlane.xlu0 %1500  ;;  %v10015_v41 = vld [vmem:[#allocation55_spill] sm:$0xff] }
 0x38d   :  { %v8604_v62 = vpop.eup %4847  ;;  %vm2641_vm11 = vcmp.gt.f32.partialorder %v8595_v16, 0.999  ;;  %v8610_v63 = vmul.f32 %v8600_v1, %v10013_v32  ;;  %v2864_v44 = vmul.f32 %v2816_v0, %v2720_v52  ;;  %v10014_v7 = vmax.f32 %v8511_v8, 1e-10 }
 0x38e   :  { %3603 = vst [vmem:[#allocation7 + $0xf8] sm:$0xff] %v3555_v39  ;;  %4859 = vrcp.f32 %v3072_v25  ;;  %v3296_v23 = vmul.f32 0.5, %v3213_v9  ;;  %v8618_v56 = vsel %vm2641_vm11, 0.999, %v8595_v16  ;;  %v2164_v52 = vmul.f32 %v10015_v41, %v1684_v21  ;;  %v8640_v53 = vpop.xlane.xlu1 %1502 }
 0x38f   :  { %4861 = vrsqrt.f32 %v1549_v61  ;;  %v3835_v25 = vclamps-f32 %v8618_v56, 0.99999  ;;  %vm2646_vm12 = vcmp.gt.f32.partialorder %v8610_v63, 0.999  ;;  %v8627_v32 = vmul.f32 %v8604_v62, %v10014_v7 }
 0x390   :  { %v3344_v0 = vmul.f32 %v3296_v23, %v2864_v44  ;;  %v8633_v9 = vsel %vm2646_vm12, 0.999, %v8610_v63  ;;  %vm3392_vm13 = vcmp.gt.f32.partialorder %v7823_v28, 0.0  ;;  %v2769_v56 = vmul.f32 0.999, %v8515_v4 }
 0x391   :  { %v8620_v39 = vpop.eup %4849  ;;  %v3073_v8 = vsub.f32 1.0, %v3835_v25  ;;  %v3840_v7 = vclamps-f32 %v8633_v9, 0.99999  ;;  %v10016_v44 = vclamps-f32 %v8548_v17, 0.99999  ;;  %v3790_v3 = vclamps-f32 %v2164_v52, 15.0 }
 0x392   :  { %v8642_v21 = vpop.eup %4851  ;;  %v3440_v41 = vmul.f32 %v3344_v0, %v8236_v5  ;;  %vm2647_vm14 = vcmp.gt.f32.partialorder %v8627_v32, 0.999  ;;  %v1637_v51 = vmul.f32 %v8620_v39, %v8442_v42  ;;  %v8662_v17 = vsel %vm2625_vm8, 1.001001, %v8515_v4 }
 0x393   :  { %v3009_v23 = vadd.f32 1.0, %v10016_v44  ;;  %v4854_v61 = vpop.eup %4853  ;;  %4863 = vrcp.f32 %v3073_v8  ;;  %v3078_v10 = vsub.f32 1.0, %v3840_v7  ;;  %v8653_v9 = vsel %vm2647_vm14, 0.999, %v8627_v32  ;;  %v10017_v44 = vld [vmem:[#allocation21_spill] sm:$0xff] }
 0x394   :  { %v8655_v18 = vpop.eup %4855  ;;  %v3488_v5 = vsel %vm3392_vm13, %v3440_v41, 0.0  ;;  %v2817_v31 = vsel %vm2625_vm8, %v2769_v56, 1.0  ;;  %v3841_v52 = vclamps-f32 %v8653_v9, 0.99999  ;;  %v10018_v28 = vclamps-f32 %v8576_v48, 0.99999 }
 0x395   :  { %v3119_v0 = vmul.f32 %v4854_v61, %v3009_v23  ;;  %v3536_v11 = vmul.f32 %v3488_v5, %v10017_v44  ;;  %4865 = vrcp.f32 %v3078_v10  ;;  %v4858_v55 = vpop.eup %4857  ;;  %v10019_v24 = vmax.f32 %v8533_v26, 1e-10  ;;  %v10020_v61 = vld [vmem:[#allocation89_spill] sm:$0xff]  ;;  %v10022_v26 = vld [vmem:[#allocation119_spill] sm:$0xff] }
 0x396   :  { %v3024_v41 = vadd.f32 1.0, %v10018_v28  ;;  %v1685_v23 = vmul.f32 %v10020_v61, %v1637_v51  ;;  %v2784_v46 = vmul.f32 0.999, %v8542_v60  ;;  %v3079_v56 = vsub.f32 1.0, %v3841_v52  ;;  %v10023_v44 = vld [vmem:[#allocation91_spill] sm:$0xff] }
 0x397   :  { %4867 = vlog2.f32 %v3119_v0  ;;  %v8674_v4 = vmul.f32 %v8655_v18, %v10019_v24  ;;  %3584 = vst [vmem:[#allocation7 + $0x60] sm:$0xff] %v3536_v11  ;;  %v8679_v10 = vmul.f32 %v4858_v55, %v8482_v59  ;;  %v1644_v24 = vmul.f32 %v8642_v21, %v8480_v40 }
 0x398   :  { %v4860_v8 = vpop.eup %4859  ;;  %4869 = vtanh.f32 %v3790_v3  ;;  %v2165_v5 = vmul.f32 %v10022_v26, %v1685_v23  ;;  %v2736_v11 = vsel %vm2640_vm9, 1.001001, %v8542_v60  ;;  %v2785_v51 = vmul.f32 0.999, %v8580_v34 }
 0x399   :  { %10021 = vst [vmem:[#allocation93_spill] sm:$0xff] %v8679_v10  ;;  %v8681_v9 = vpop.eup %4861  ;;  %v3149_v48 = vmul.f32 %v4860_v8, %v3024_v41  ;;  %vm2654_vm15 = vcmp.gt.f32.partialorder %v8674_v4, 0.999  ;;  %4871 = vrcp.f32 %v3079_v56  ;;  %v2790_v3 = vmul.f32 0.999, %v8600_v1 }
 0x39a   :  { %v2702_v55 = vsel %vm2654_vm15, 0.999, %v8674_v4  ;;  %v2415_v0 = vmul.f32 %v8679_v10, %v8679_v10  ;;  %v3791_v8 = vclamps-f32 %v2165_v5, 15.0  ;;  %v1692_v28 = vmul.f32 %v10023_v44, %v1644_v24  ;;  %v10026_v24 = vld [vmem:[#allocation124_spill] sm:$0xff]  ;;  %v10027_v44 = vld [vmem:[#allocation90_spill] sm:$0xff]  ;;  %v10036_v4 = vld [vmem:[#allocation23_spill] sm:$0xff] }
 0x39b   :  { %4873 = vlog2.f32 %v3149_v48  ;;  %v3848_v59 = vclamps-f32 %v2702_v55, 0.99999  ;;  %v1645_v60 = vmul.f32 %v8681_v9, %v8513_v22  ;;  %v10024_v41 = vmax.f32 %v8528_v12, 1e-30 }
 0x39c   :  { %v3025_v61 = vadd.f32 1.0, %v3835_v25  ;;  %v8703_v56 = vmul.f32 %v2415_v0, %v8390_v43  ;;  %v10025_v48 = vmax.f32 %v8559_v19, 1e-30  ;;  %v2832_v5 = vsel %vm2640_vm9, %v2784_v46, 1.0  ;;  %v10028_v46 = vld [vmem:[#allocation72_spill] sm:$0xff] }
 0x39d   :  { %4875 = vrsqrt.f32 %v10024_v41  ;;  %v3086_v23 = vsub.f32 1.0, %v3848_v59  ;;  %v4864_v26 = vpop.eup %4863  ;;  %v2172_v55 = vmul.f32 %v10026_v24, %v1692_v28  ;;  %v1693_v10 = vmul.f32 %v10027_v44, %v1645_v60 }
 0x39e   :  { %4877 = vrsqrt.f32 %v10025_v48  ;;  %v3151_v35 = vmul.f32 %v4864_v26, %v3025_v61  ;;  %v3030_v50 = vadd.f32 1.0, %v3840_v7  ;;  %v2511_v25 = vmax.f32 %v8703_v56, 1e-10 }
 0x39f   :  { %4879 = vtanh.f32 %v3791_v8  ;;  %v4866_v41 = vpop.eup %4865  ;;  %v2737_v0 = vsel %vm2641_vm11, 1.001001, %v8580_v34  ;;  %v2833_v48 = vsel %vm2641_vm11, %v2785_v51, 1.0  ;;  %v3798_v14 = vclamps-f32 %v2172_v55, 15.0 }
 0x3a0   :  { %4881 = vrcp.f32 %v3086_v23  ;;  %v2173_v8 = vmul.f32 %v10028_v46, %v1693_v10  ;;  %vm3393_vm0 = vcmp.gt.f32.partialorder %v7864_v27, 0.0  ;;  %v2742_v7 = vsel %vm2646_vm12, 1.001001, %v8600_v1 }
 0x3a1   :  { %v4868_v43 = vpop.eup %4867  ;;  %4883 = vlog2.f32 %v3151_v35  ;;  %v2838_v28 = vsel %vm2646_vm12, %v2790_v3, 1.0  ;;  %v3161_v60 = vmul.f32 %v4866_v41, %v3030_v50  ;;  %v2791_v16 = vmul.f32 0.999, %v8604_v62 }
 0x3a2   :  { %v4870_v61 = vpop.eup %4869  ;;  %v3215_v34 = vmul.f32 0.6931472, %v4868_v43  ;;  %4885 = vrsqrt.f32 %v2511_v25  ;;  %v3799_v10 = vclamps-f32 %v2173_v8, 15.0  ;;  %v2865_v51 = vmul.f32 %v2817_v31, %v8662_v17 }
 0x3a3   :  { %4887 = vlog2.f32 %v3161_v60  ;;  %v3031_v35 = vadd.f32 1.0, %v3841_v52  ;;  %v8729_v23 = vmul.f32 %v4870_v61, %v8535_v6  ;;  %v4872_v1 = vpop.eup %4871  ;;  %v2880_v63 = vmul.f32 %v2832_v5, %v2736_v11 }
 0x3a4   :  { %v3297_v26 = vmul.f32 0.5, %v3215_v34  ;;  %v2881_v3 = vmul.f32 %v2833_v48, %v2737_v0  ;;  %4889 = vtanh.f32 %v3798_v14  ;;  %vm3408_vm1 = vcmp.gt.f32.partialorder %v7866_v36, 0.0 }
 0x3a5   :  { %v4874_v50 = vpop.eup %4873  ;;  %v8732_v43 = vmul.f32 %v2838_v28, %v2742_v7  ;;  %v2743_v24 = vsel %vm2647_vm14, 1.001001, %v8604_v62  ;;  %v3163_v31 = vmul.f32 %v4872_v1, %v3031_v35  ;;  %v2404_v17 = vmul.f32 %v8729_v23, %v8729_v23  ;;  %v10030_v28 = vld [vmem:[#allocation28_spill] sm:$0xff]  ;;  %v10033_v1 = vld [vmem:[#allocation13_spill] sm:$0xff] }
 0x3a6   :  { %v3345_v52 = vmul.f32 %v3297_v26, %v2865_v51  ;;  %v3245_v55 = vmul.f32 0.6931472, %v4874_v50  ;;  %v2839_v11 = vsel %vm2647_vm14, %v2791_v16, 1.0  ;;  %4891 = vtanh.f32 %v3799_v10  ;;  %v10032_v10 = vld [vmem:[#allocation118_spill] sm:$0xff] }
 0x3a7   :  { %v8739_v6 = vpop.eup %4875  ;;  %4893 = vlog2.f32 %v3163_v31  ;;  %v3038_v44 = vadd.f32 1.0, %v3848_v59  ;;  %v8746_v41 = vmul.f32 %v2404_v17, %v8425_v58  ;;  %v10029_v32 = vmax.f32 %v8569_v30, 1e-30 }
 0x3a8   :  { %v8743_v5 = vpop.eup %4877  ;;  %v1642_v62 = vmul.f32 %v8739_v6, %v8528_v12  ;;  %v3441_v48 = vmul.f32 %v3345_v52, %v8412_v33  ;;  %v3312_v14 = vmul.f32 0.5, %v3245_v55  ;;  %v10031_v61 = vmax.f32 %v8598_v2, 1e-30 }
 0x3a9   :  { %v4880_v0 = vpop.eup %4879  ;;  %v1643_v46 = vmul.f32 %v8743_v5, %v8559_v19  ;;  %4895 = vrsqrt.f32 %v10029_v32  ;;  %v2500_v7 = vmax.f32 %v8746_v41, 1e-10  ;;  %vm3409_vm2 = vcmp.gt.f32.partialorder %v7906_v45, 0.0 }
 0x3aa   :  { %v4882_v8 = vpop.eup %4881  ;;  %v8757_v59 = vmul.f32 %v4880_v0, %v8620_v39  ;;  %v1690_v60 = vmul.f32 %v10030_v28, %v1642_v62  ;;  %4897 = vrsqrt.f32 %v10031_v61  ;;  %v3489_v33 = vsel %vm3393_vm0, %v3441_v48, 0.0 }
 0x3ab   :  { %v3360_v34 = vmul.f32 %v3312_v14, %v2880_v63  ;;  %v3177_v16 = vmul.f32 %v4882_v8, %v3038_v44  ;;  %v1691_v51 = vmul.f32 %v10032_v10, %v1643_v46  ;;  %v4884_v35 = vpop.eup %4883  ;;  %v3537_v26 = vmul.f32 %v3489_v33, %v10033_v1  ;;  %v10035_v14 = vld [vmem:[#allocation38_spill] sm:$0xff] }
 0x3ac   :  { %v2887_v50 = vmul.f32 %v2839_v11, %v2743_v24  ;;  %4899 = vrsqrt.f32 %v2500_v7  ;;  %v2405_v39 = vmul.f32 %v8757_v59, %v8757_v59  ;;  %v8771_v31 = vpop.eup %4885  ;;  %v3247_v63 = vmul.f32 0.6931472, %v4884_v35 }
 0x3ad   :  { %v3456_v27 = vmul.f32 %v3360_v34, %v8433_v20  ;;  %4901 = vlog2.f32 %v3177_v16  ;;  %v2170_v17 = vmul.f32 %v8415_v38, %v1690_v60  ;;  %v4888_v52 = vpop.eup %4887  ;;  %3585 = vst [vmem:[#allocation7 + $0x68] sm:$0xff] %v3537_v26  ;;  %vm3414_vm3 = vcmp.gt.f32.partialorder %v7908_v15, 0.0 }
 0x3ae   :  { %v2798_v24 = vmul.f32 0.999, %v8655_v18  ;;  %v8780_v55 = vmul.f32 %v8771_v31, %v2511_v25  ;;  %v8783_v11 = vmul.f32 %v2405_v39, %v8442_v42  ;;  %v10034_v20 = vmax.f32 %v8613_v57, 1e-30  ;;  %v4890_v44 = vpop.eup %4889 }
 0x3af   :  { %v3504_v38 = vsel %vm3408_vm1, %v3456_v27, 0.0  ;;  %v3313_v62 = vmul.f32 0.5, %v3247_v63  ;;  %v3257_v0 = vmul.f32 0.6931472, %v4888_v52  ;;  %v2171_v48 = vmul.f32 %v8376_v47, %v1691_v51 }
 0x3b0   :  { %4903 = vrsqrt.f32 %v10034_v20  ;;  %v3552_v46 = vmul.f32 %v3504_v38, %v10035_v14  ;;  %vm2655_vm4 = vcmp.gt.f32.partialorder %v8780_v55, 0.999  ;;  %v2501_v56 = vmax.f32 %v8783_v11, 1e-10  ;;  %v4892_v32 = vpop.eup %4891 }
 0x3b1   :  { %v8794_v25 = vmul.f32 %v4890_v44, %v8642_v21  ;;  %v3361_v8 = vmul.f32 %v3313_v62, %v2881_v3  ;;  %v3318_v28 = vmul.f32 0.5, %v3257_v0  ;;  %v8799_v36 = vsel %vm2655_vm4, 0.999, %v8780_v55  ;;  %v4894_v61 = vpop.eup %4893  ;;  %v10038_v62 = vld [vmem:[#allocation96_spill] sm:$0xff] }
 0x3b2   :  { %v3796_v60 = vclamps-f32 %v2170_v17, 15.0  ;;  %3600 = vst [vmem:[#allocation7 + $0xe0] sm:$0xff] %v3552_v46  ;;  %v2750_v47 = vsel %vm2654_vm15, 1.001001, %v8655_v18  ;;  %v3849_v33 = vclamps-f32 %v8799_v36, 0.99999  ;;  %4905 = vrsqrt.f32 %v2501_v56 }
 0x3b3   :  { %v2412_v21 = vmul.f32 %v8794_v25, %v8794_v25  ;;  %v8809_v3 = vpop.eup %4895  ;;  %v3457_v34 = vmul.f32 %v3361_v8, %v8463_v49  ;;  %v3366_v16 = vmul.f32 %v3318_v28, %v8732_v43  ;;  %v3259_v10 = vmul.f32 0.6931472, %v4894_v61  ;;  %v10040_v61 = vld [vmem:[#allocation99_spill] sm:$0xff] }
 0x3b4   :  { %v2846_v51 = vsel %vm2654_vm15, %v2798_v24, 1.0  ;;  %v8815_v35 = vpop.eup %4897  ;;  %v3087_v18 = vsub.f32 1.0, %v3849_v33  ;;  %v8821_v26 = vmul.f32 %v4892_v32, %v8681_v9  ;;  %v3797_v39 = vclamps-f32 %v2171_v48, 15.0  ;;  %v10039_v32 = vld [vmem:[#allocation16_spill] sm:$0xff] }
 0x3b5   :  { %v8818_v1 = vmul.f32 %v2412_v21, %v8480_v40  ;;  %v3505_v27 = vsel %vm3409_vm2, %v3457_v34, 0.0  ;;  %v3462_v49 = vmul.f32 %v3366_v16, %v8472_v13  ;;  %v3319_v43 = vmul.f32 0.5, %v3259_v10  ;;  %v10041_v16 = vld [vmem:[#allocation95_spill] sm:$0xff]  ;;  %v10042_v10 = vld [vmem:[#allocation126_spill] sm:$0xff] }
 0x3b6   :  { %4907 = vtanh.f32 %v3796_v60  ;;  %v8826_v63 = vpop.eup %4899  ;;  %v3553_v17 = vmul.f32 %v3505_v27, %v10036_v4  ;;  %v2413_v24 = vmul.f32 %v8821_v26, %v8821_v26  ;;  %v10037_v44 = vmax.f32 %v8640_v53, 1e-30  ;;  %v10046_v4 = vld [vmem:[#allocation71_spill] sm:$0xff] }
 0x3b7   :  { %4909 = vrcp.f32 %v3087_v18  ;;  %v2508_v52 = vmax.f32 %v8818_v1, 1e-10  ;;  %v4902_v9 = vpop.eup %4901  ;;  %v3510_v20 = vsel %vm3414_vm3, %v3462_v49, 0.0  ;;  %v3367_v45 = vmul.f32 %v3319_v43, %v2887_v50  ;;  %v10045_v49 = vld [vmem:[#allocation65_spill] sm:$0xff] }
 0x3b8   :  { %v8837_v13 = vmul.f32 %v8826_v63, %v2500_v7  ;;  %4911 = vrsqrt.f32 %v10037_v44  ;;  %3601 = vst [vmem:[#allocation7 + $0xe8] sm:$0xff] %v3553_v17  ;;  %v3558_v0 = vmul.f32 %v10038_v62, %v3510_v20  ;;  %v3273_v48 = vmul.f32 0.6931472, %v4902_v9 }
 0x3b9   :  { %4913 = vrsqrt.f32 %v2508_v52  ;;  %v8847_v15 = vmul.f32 %v2413_v24, %v8513_v22  ;;  %v3463_v41 = vmul.f32 %v3367_v45, %v8478_v54  ;;  %v1640_v7 = vmul.f32 %v8809_v3, %v8569_v30  ;;  %v10047_v24 = vld [vmem:[#allocation36_spill] sm:$0xff] }
 0x3ba   :  { %v8841_v38 = vpop.eup %4903  ;;  %vm2644_vm5 = vcmp.gt.f32.partialorder %v8837_v13, 0.999  ;;  %4915 = vtanh.f32 %v3797_v39  ;;  %3606 = vst [vmem:[#allocation7 + $0x110] sm:$0xff] %v3558_v0  ;;  %vm3415_vm6 = vcmp.gt.f32.partialorder %v9961_v29, 0.0  ;;  %v2894_v50 = vmul.f32 %v2846_v51, %v2750_v47  ;;  %v10043_v51 = vld [vmem:[#allocation56_spill] sm:$0xff]  ;;  %v10044_v39 = vld [vmem:[#allocation37_spill] sm:$0xff] }
 0x3bb   :  { %v3326_v14 = vmul.f32 0.5, %v3273_v48  ;;  %v2692_v46 = vsel %vm2644_vm5, 0.999, %v8837_v13  ;;  %v1985_v8 = vmul.f32 %v10039_v32, %v8396_v37  ;;  %v3511_v28 = vsel %vm3415_vm6, %v3463_v41, 0.0  ;;  %v10048_v0 = vld [vmem:[#allocation70_spill] sm:$0xff]  ;;  %v8886_v41 = vpop.xlane.xlu0 %1504 }
 0x3bc   :  { %v3838_v54 = vclamps-f32 %v2692_v46, 0.99999  ;;  %v2509_v36 = vmax.f32 %v8847_v15, 1e-10  ;;  %v8860_v60 = vpop.eup %4905  ;;  %v3559_v21 = vmul.f32 %v10040_v61, %v3511_v28  ;;  %v1688_v29 = vmul.f32 %v10041_v16, %v1640_v7  ;;  %v10050_v61 = vld [vmem:[#allocation92_spill] sm:$0xff]  ;;  %v10056_v13 = vld [vmem:[#allocation46_spill] sm:$0xff] }
 0x3bd   :  { %v3374_v34 = vmul.f32 %v3326_v14, %v2894_v50  ;;  %v1641_v47 = vmul.f32 %v8815_v35, %v8598_v2  ;;  %v1987_v18 = vmul.f32 %v10043_v51, %v10042_v10  ;;  %vm3422_vm7 = vcmp.gt.f32.partialorder %v10044_v39, 0.0 }
 0x3be   :  { %v3076_v37 = vsub.f32 1.0, %v3838_v54  ;;  %v8872_v27 = vmul.f32 %v8860_v60, %v2501_v56  ;;  %3607 = vst [vmem:[#allocation7 + $0x118] sm:$0xff] %v3559_v21  ;;  %4917 = vrsqrt.f32 %v2509_v36  ;;  %v2168_v17 = vmul.f32 %v10046_v4, %v1688_v29 }
 0x3bf   :  { %v3470_v43 = vmul.f32 %v3374_v34, %v10045_v49  ;;  %v1689_v9 = vmul.f32 %v10047_v24, %v1641_v47  ;;  %v3039_v45 = vadd.f32 1.0, %v3849_v33  ;;  %v1648_v11 = vmul.f32 %v8841_v38, %v8613_v57  ;;  %v10049_v33 = vld [vmem:[#allocation39_spill] sm:$0xff]  ;;  %v10051_v34 = vld [vmem:[#allocation106_spill] sm:$0xff] }
 0x3c0   :  { %v4908_v20 = vpop.eup %4907  ;;  %4919 = vrcp.f32 %v3076_v37  ;;  %vm2645_vm8 = vcmp.gt.f32.partialorder %v8872_v27, 0.999  ;;  %v2128_v48 = vmul.f32 0.5, %v10048_v0  ;;  %v3794_v28 = vclamps-f32 %v2168_v17, 15.0 }
 0x3c1   :  { %v4910_v56 = vpop.eup %4909  ;;  %4921 = vlog2.f32 %v1985_v8  ;;  %v3518_v44 = vsel %vm3422_vm7, %v3470_v43, 0.0  ;;  %v2693_v62 = vsel %vm2645_vm8, 0.999, %v8872_v27  ;;  %v8894_v8 = vmul.f32 %v4908_v20, %v8739_v6  ;;  %v10052_v43 = vld [vmem:[#allocation40_spill] sm:$0xff] }
 0x3c2   :  { %v8888_v7 = vpop.eup %4911  ;;  %4923 = vlog2.f32 %v1987_v18  ;;  %v3566_v50 = vmul.f32 %v10049_v33, %v3518_v44  ;;  %v3179_v14 = vmul.f32 %v4910_v56, %v3039_v45  ;;  %v3839_v46 = vclamps-f32 %v2693_v62, 0.99999 }
 0x3c3   :  { %v8891_v32 = vpop.eup %4913  ;;  %v2169_v21 = vmul.f32 %v10050_v61, %v1689_v9  ;;  %v1696_v16 = vmul.f32 %v10051_v34, %v1648_v11  ;;  %v1554_v51 = vmax.f32 %v8886_v41, 1e-30  ;;  %v2410_v6 = vmul.f32 %v8894_v8, %v8894_v8  ;;  %v10053_v11 = vld [vmem:[#allocation103_spill] sm:$0xff] }
 0x3c4   :  { %v4916_v29 = vpop.eup %4915  ;;  %3614 = vst [vmem:[#allocation7 + $0x150] sm:$0xff] %v3566_v50  ;;  %4925 = vlog2.f32 %v3179_v14  ;;  %v3077_v47 = vsub.f32 1.0, %v3839_v46  ;;  %v8901_v10 = vmul.f32 %v8891_v32, %v2508_v52  ;;  %v1649_v39 = vmul.f32 %v8888_v7, %v8640_v53 }
 0x3c5   :  { %v8907_v18 = vmul.f32 %v4916_v29, %v8743_v5  ;;  %4927 = vtanh.f32 %v3794_v28  ;;  %v3795_v37 = vclamps-f32 %v2169_v21, 15.0  ;;  %v2176_v1 = vmul.f32 %v2128_v48, %v1696_v16 }
 0x3c6   :  { %4929 = vrcp.f32 %v3077_v47  ;;  %vm2652_vm9 = vcmp.gt.f32.partialorder %v8901_v10, 0.999  ;;  %v8918_v49 = vmul.f32 %v2410_v6, %v8528_v12  ;;  %v2129_v5 = vmul.f32 0.5, %v10052_v43 }
 0x3c7   :  { %v8915_v52 = vsel %vm2652_vm9, 0.999, %v8901_v10  ;;  %v2799_v4 = vmul.f32 0.999, %v8771_v31  ;;  %v2411_v24 = vmul.f32 %v8907_v18, %v8907_v18  ;;  %4931 = vtanh.f32 %v3795_v37 }
 0x3c8   :  { %v3846_v17 = vclamps-f32 %v8915_v52, 0.99999  ;;  %v8925_v9 = vpop.eup %4917  ;;  %v3028_v20 = vadd.f32 1.0, %v3838_v54  ;;  %v2506_v45 = vmax.f32 %v8918_v49, 1e-10  ;;  %v1697_v56 = vmul.f32 %v10053_v11, %v1649_v39  ;;  %v8950_v39 = vpop.xlane.xlu1 %1506 }
 0x3c9   :  { %4933 = vrsqrt.f32 %v1554_v51  ;;  %v8932_v0 = vmul.f32 %v8925_v9, %v2509_v36  ;;  %v3802_v48 = vclamps-f32 %v2176_v1, 15.0  ;;  %v8935_v14 = vmul.f32 %v2411_v24, %v8559_v19 }
 0x3ca   :  { %v4920_v44 = vpop.eup %4919  ;;  %v3084_v62 = vsub.f32 1.0, %v3846_v17  ;;  %4935 = vrsqrt.f32 %v2506_v45  ;;  %v2177_v54 = vmul.f32 %v2129_v5, %v1697_v56  ;;  %v2751_v61 = vsel %vm2655_vm4, 1.001001, %v8771_v31 }
 0x3cb   :  { %v4922_v33 = vpop.eup %4921  ;;  %v3157_v50 = vmul.f32 %v4920_v44, %v3028_v20  ;;  %vm2653_vm10 = vcmp.gt.f32.partialorder %v8932_v0, 0.999  ;;  %v2847_v15 = vsel %vm2655_vm4, %v2799_v4, 1.0  ;;  %v2507_v16 = vmax.f32 %v8935_v14, 1e-10 }
 0x3cc   :  { %v4924_v28 = vpop.eup %4923  ;;  %4937 = vrcp.f32 %v3084_v62  ;;  %v8946_v36 = vsel %vm2653_vm10, 0.999, %v8932_v0  ;;  %v2081_v29 = vmul.f32 0.6931472, %v4922_v33  ;;  %v3029_v6 = vadd.f32 1.0, %v3839_v46  ;;  %v10054_v62 = vld [vmem:[#allocation54_spill] sm:$0xff] }
 0x3cd   :  { %4939 = vlog2.f32 %v3157_v50  ;;  %v3847_v34 = vclamps-f32 %v8946_v36, 0.99999  ;;  %v3803_v31 = vclamps-f32 %v2177_v54, 15.0  ;;  %v2895_v37 = vmul.f32 %v2847_v15, %v2751_v61  ;;  %v10055_v61 = vld [vmem:[#allocation93_spill] sm:$0xff] }
 0x3ce   :  { %v4926_v21 = vpop.eup %4925  ;;  %4941 = vtanh.f32 %v3802_v48  ;;  %v2788_v43 = vmul.f32 0.999, %v8826_v63  ;;  %v2130_v24 = vmul.f32 0.5, %v2081_v29  ;;  %v1555_v20 = vmax.f32 %v8950_v39, 1e-30 }
 0x3cf   :  { %v4928_v47 = vpop.eup %4927  ;;  %v3275_v51 = vmul.f32 0.6931472, %v4926_v21  ;;  %v3085_v1 = vsub.f32 1.0, %v3847_v34  ;;  %4943 = vrsqrt.f32 %v2507_v16  ;;  %v8968_v44 = vmul.f32 0.6931472, %v4924_v28 }
 0x3d0   :  { %v4930_v55 = vpop.eup %4929  ;;  %v8957_v52 = vmul.f32 %v4928_v47, %v8809_v3  ;;  %4945 = vtanh.f32 %v3803_v31  ;;  %vm3423_vm11 = vcmp.gt.f32.partialorder %v10054_v62, 0.0  ;;  %v2740_v48 = vsel %vm2644_vm5, 1.001001, %v8826_v63 }
 0x3d1   :  { %v3327_v49 = vmul.f32 0.5, %v3275_v51  ;;  %v3159_v5 = vmul.f32 %v4930_v55, %v3029_v6  ;;  %v4932_v46 = vpop.eup %4931  ;;  %4947 = vrcp.f32 %v3085_v1  ;;  %v3036_v28 = vadd.f32 1.0, %v3846_v17 }
 0x3d2   :  { %v2408_v4 = vmul.f32 %v8957_v52, %v8957_v52  ;;  %v8966_v3 = vmul.f32 %v4932_v46, %v8815_v35  ;;  %v2836_v35 = vsel %vm2644_vm5, %v2788_v43, 1.0  ;;  %v2789_v63 = vmul.f32 0.999, %v8860_v60 }
 0x3d3   :  { %v8963_v11 = vpop.eup %4933  ;;  %v3375_v56 = vmul.f32 %v3327_v49, %v2895_v37  ;;  %4949 = vlog2.f32 %v3159_v5  ;;  %v10057_v49 = vld [vmem:[#allocation110_spill] sm:$0xff]  ;;  %v2741_v46 = vsel %vm2645_vm8, 1.001001, %v8860_v60  ;;  %v3037_v60 = vadd.f32 1.0, %v3847_v34 }
 0x3d4   :  { %v8975_v33 = vmul.f32 %v2408_v4, %v8569_v30  ;;  %v1650_v50 = vmul.f32 %v8963_v11, %v8886_v41  ;;  %v8979_v54 = vpop.eup %4935  ;;  %v2409_v21 = vmul.f32 %v8966_v3, %v8966_v3  ;;  %4951 = vrsqrt.f32 %v1555_v20 }
 0x3d5   :  { %v3471_v15 = vmul.f32 %v3375_v56, %v10055_v61  ;;  %v8988_v47 = vmul.f32 %v8979_v54, %v2506_v45  ;;  %v2884_v45 = vmul.f32 %v2836_v35, %v2740_v48  ;;  %v2837_v62 = vsel %vm2645_vm8, %v2789_v63, 1.0 }
 0x3d6   :  { %v4938_v29 = vpop.eup %4937  ;;  %v2504_v51 = vmax.f32 %v8975_v33, 1e-10  ;;  %v8992_v37 = vmul.f32 %v2409_v21, %v8598_v2  ;;  %v1698_v17 = vmul.f32 %v10056_v13, %v1650_v50  ;;  %v2796_v61 = vmul.f32 0.999, %v8891_v32  ;;  %v10058_v13 = vld [vmem:[#allocation98_spill] sm:$0xff] }
 0x3d7   :  { %v4940_v6 = vpop.eup %4939  ;;  %v3519_v31 = vsel %vm3423_vm11, %v3471_v15, 0.0  ;;  %v3173_v55 = vmul.f32 %v4938_v29, %v3036_v28  ;;  %vm2650_vm12 = vcmp.gt.f32.partialorder %v8988_v47, 0.999  ;;  %vm3412_vm14 = vcmp.gt.f32.partialorder %v8425_v58, 0.0 }
 0x3d8   :  { %v4942_v1 = vpop.eup %4941  ;;  %v3567_v43 = vmul.f32 %v10057_v49, %v3519_v31  ;;  %v3253_v5 = vmul.f32 0.6931472, %v4940_v6  ;;  %4953 = vrsqrt.f32 %v2504_v51  ;;  %v2698_v4 = vsel %vm2650_vm12, 0.999, %v8988_v47 }
 0x3d9   :  { %4955 = vlog2.f32 %v3173_v55  ;;  %v9003_v20 = vpop.eup %4943  ;;  %v3844_v33 = vclamps-f32 %v2698_v4, 0.99999  ;;  %v2505_v50 = vmax.f32 %v8992_v37, 1e-10  ;;  %v9017_v35 = vmul.f32 %v4942_v1, %v8841_v38 }
 0x3da   :  { %3615 = vst [vmem:[#allocation7 + $0x158] sm:$0xff] %v3567_v43  ;;  %v3316_v56 = vmul.f32 0.5, %v3253_v5  ;;  %v4946_v48 = vpop.eup %4945  ;;  %v9014_v15 = vmul.f32 %v9003_v20, %v2507_v16  ;;  %v2178_v29 = vmul.f32 %v2130_v24, %v1698_v17  ;;  %vm3413_vm15 = vcmp.gt.f32.partialorder %v8442_v42, 0.0 }
 0x3db   :  { %v4948_v28 = vpop.eup %4947  ;;  %v3082_v21 = vsub.f32 1.0, %v3844_v33  ;;  %4957 = vrsqrt.f32 %v2505_v50  ;;  %v2416_v36 = vmul.f32 %v9017_v35, %v9017_v35  ;;  %v9023_v14 = vmul.f32 %v4946_v48, %v8888_v7 }
 0x3dc   :  { %v3364_v27 = vmul.f32 %v3316_v56, %v2884_v45  ;;  %v3175_v6 = vmul.f32 %v4948_v28, %v3037_v60  ;;  %vm2651_vm13 = vcmp.gt.f32.partialorder %v9014_v15, 0.999  ;;  %v2885_v55 = vmul.f32 %v2837_v62, %v2741_v46 }
 0x3dd   :  { %v4950_v63 = vpop.eup %4949  ;;  %4959 = vrcp.f32 %v3082_v21  ;;  %v9029_v38 = vsel %vm2651_vm13, 0.999, %v9014_v15  ;;  %v2748_v1 = vsel %vm2652_vm9, 1.001001, %v8891_v32  ;;  %v2417_v49 = vmul.f32 %v9023_v14, %v9023_v14 }
 0x3de   :  { %v3460_v34 = vmul.f32 %v3364_v27, %v8729_v23  ;;  %v3255_v16 = vmul.f32 0.6931472, %v4950_v63  ;;  %4961 = vlog2.f32 %v3175_v6  ;;  %v3845_v24 = vclamps-f32 %v9029_v38, 0.99999  ;;  %v9034_v31 = vpop.eup %4951  ;;  %v10059_v6 = vld [vmem:[#allocation100_spill] sm:$0xff]  ;;  %v10060_v38 = vld [vmem:[#allocation47_spill] sm:$0xff] }
 0x3df   :  { %v9037_v23 = vmul.f32 %v2416_v36, %v8613_v57  ;;  %v2844_v45 = vsel %vm2652_vm9, %v2796_v61, 1.0  ;;  %v3804_v4 = vclamps-f32 %v2178_v29, 15.0  ;;  %v9054_v32 = vmul.f32 %v2417_v49, %v8640_v53 }
 0x3e0   :  { %v3508_v7 = vsel %vm3412_vm14, %v3460_v34, 0.0  ;;  %v3317_v37 = vmul.f32 0.5, %v3255_v16  ;;  %v3083_v58 = vsub.f32 1.0, %v3845_v24  ;;  %v1651_v48 = vmul.f32 %v9034_v31, %v8950_v39 }
 0x3e1   :  { %v3556_v17 = vmul.f32 %v3508_v7, %v10058_v13  ;;  %v2512_v46 = vmax.f32 %v9037_v23, 1e-10  ;;  %v2797_v10 = vmul.f32 0.999, %v8925_v9  ;;  %v2892_v61 = vmul.f32 %v2844_v45, %v2748_v1 }
 0x3e2   :  { %v9045_v43 = vpop.eup %4953  ;;  %v3365_v5 = vmul.f32 %v3317_v37, %v2885_v55  ;;  %4963 = vrcp.f32 %v3083_v58  ;;  %v2513_v27 = vmax.f32 %v9054_v32, 1e-10  ;;  %v3034_v63 = vadd.f32 1.0, %v3844_v33 }
 0x3e3   :  { %v4956_v56 = vpop.eup %4955  ;;  %3604 = vst [vmem:[#allocation7 + $0x100] sm:$0xff] %v3556_v17  ;;  %v9051_v62 = vmul.f32 %v9045_v43, %v2504_v51  ;;  %4965 = vrsqrt.f32 %v2512_v46  ;;  %v1699_v7 = vmul.f32 %v10060_v38, %v1651_v48  ;;  %v2749_v42 = vsel %vm2653_vm10, 1.001001, %v8925_v9  ;;  %v10061_v48 = vld [vmem:[#allocation109_spill] sm:$0xff] }
 0x3e4   :  { %v3461_v60 = vmul.f32 %v3365_v5, %v8757_v59  ;;  %v3269_v28 = vmul.f32 0.6931472, %v4956_v56  ;;  %4967 = vtanh.f32 %v3804_v4  ;;  %v2845_v33 = vsel %vm2653_vm10, %v2797_v10, 1.0 }
 0x3e5   :  { %vm2648_vm0 = vcmp.gt.f32.partialorder %v9051_v62, 0.999  ;;  %v9062_v51 = vpop.eup %4957  ;;  %4969 = vrsqrt.f32 %v2513_v27  ;;  %vm3420_vm2 = vcmp.gt.f32.partialorder %v8480_v40, 0.0  ;;  %v2893_v0 = vmul.f32 %v2845_v33, %v2749_v42 }
 0x3e6   :  { %v3509_v21 = vsel %vm3413_vm15, %v3461_v60, 0.0  ;;  %v3324_v29 = vmul.f32 0.5, %v3269_v28  ;;  %v2696_v59 = vsel %vm2648_vm0, 0.999, %v9051_v62  ;;  %v9071_v16 = vmul.f32 %v9062_v51, %v2505_v50 }
 0x3e7   :  { %v3557_v36 = vmul.f32 %v3509_v21, %v10059_v6  ;;  %v3842_v34 = vclamps-f32 %v2696_v59, 0.99999  ;;  %v4960_v55 = vpop.eup %4959  ;;  %v2131_v50 = vmul.f32 0.5, %v8968_v44  ;;  %v3035_v56 = vadd.f32 1.0, %v3845_v24 }
 0x3e8   :  { %v3372_v37 = vmul.f32 %v3324_v29, %v2892_v61  ;;  %v4962_v23 = vpop.eup %4961  ;;  %v3169_v13 = vmul.f32 %v4960_v55, %v3034_v63  ;;  %vm2649_vm1 = vcmp.gt.f32.partialorder %v9071_v16, 0.999  ;;  %vm3421_vm3 = vcmp.gt.f32.partialorder %v8513_v22, 0.0 }
 0x3e9   :  { %3605 = vst [vmem:[#allocation7 + $0x108] sm:$0xff] %v3557_v36  ;;  %v3080_v17 = vsub.f32 1.0, %v3842_v34  ;;  %v3271_v58 = vmul.f32 0.6931472, %v4962_v23  ;;  %v2697_v9 = vsel %vm2649_vm1, 0.999, %v9071_v16  ;;  %v2179_v5 = vmul.f32 %v2131_v50, %v1699_v7 }
 0x3ea   :  { %v3468_v1 = vmul.f32 %v3372_v37, %v8794_v25  ;;  %4971 = vlog2.f32 %v3169_v13  ;;  %v3843_v49 = vclamps-f32 %v2697_v9, 0.99999  ;;  %v2794_v63 = vmul.f32 0.999, %v8979_v54  ;;  %v10062_v36 = vld [vmem:[#allocation112_spill] sm:$0xff] }
 0x3eb   :  { %v3325_v4 = vmul.f32 0.5, %v3271_v58  ;;  %4973 = vrcp.f32 %v3080_v17  ;;  %v3805_v40 = vclamps-f32 %v2179_v5, 15.0  ;;  %v2746_v22 = vsel %vm2650_vm12, 1.001001, %v8979_v54 }
 0x3ec   :  { %v3516_v45 = vsel %vm3420_vm2, %v3468_v1, 0.0  ;;  %v4964_v32 = vpop.eup %4963  ;;  %v3081_v60 = vsub.f32 1.0, %v3843_v49  ;;  %v2842_v37 = vsel %vm2650_vm12, %v2794_v63, 1.0  ;;  %v3032_v42 = vadd.f32 1.0, %v3842_v34 }
 0x3ed   :  { %v3564_v44 = vmul.f32 %v3516_v45, %v10061_v48  ;;  %v9087_v28 = vpop.eup %4965  ;;  %v3373_v25 = vmul.f32 %v3325_v4, %v2893_v0  ;;  %v3171_v10 = vmul.f32 %v4964_v32, %v3035_v56  ;;  %v2890_v58 = vmul.f32 %v2842_v37, %v2746_v22 }
 0x3ee   :  { %v4968_v61 = vpop.eup %4967  ;;  %4975 = vrcp.f32 %v3081_v60  ;;  %v9090_v21 = vmul.f32 %v9087_v28, %v2512_v46  ;;  %v3033_v9 = vadd.f32 1.0, %v3843_v49  ;;  %v2747_v5 = vsel %vm2651_vm13, 1.001001, %v9003_v20 }
 0x3ef   :  { %3612 = vst [vmem:[#allocation7 + $0x140] sm:$0xff] %v3564_v44  ;;  %v3469_v29 = vmul.f32 %v3373_v25, %v8821_v26  ;;  %4977 = vlog2.f32 %v3171_v10  ;;  %v9094_v24 = vmul.f32 %v4968_v61, %v8963_v11  ;;  %v9099_v59 = vpop.eup %4969  ;;  %vm3418_vm6 = vcmp.gt.f32.partialorder %v8528_v12, 0.0 }
 0x3f0   :  { %vm2656_vm4 = vcmp.gt.f32.partialorder %v9090_v21, 0.999  ;;  %4979 = vtanh.f32 %v3805_v40  ;;  %v9106_v11 = vmul.f32 %v9099_v59, %v2513_v27  ;;  %v2795_v27 = vmul.f32 0.999, %v9003_v20 }
 0x3f1   :  { %v3517_v6 = vsel %vm3421_vm3, %v3469_v29, 0.0  ;;  %v2704_v46 = vsel %vm2656_vm4, 0.999, %v9090_v21  ;;  %v2418_v7 = vmul.f32 %v9094_v24, %v9094_v24  ;;  %v2792_v61 = vmul.f32 0.999, %v9045_v43  ;;  %v10063_v29 = vld [vmem:[#allocation120_spill] sm:$0xff] }
 0x3f2   :  { %v3565_v26 = vmul.f32 %v3517_v6, %v10062_v36  ;;  %v3850_v38 = vclamps-f32 %v2704_v46, 0.99999  ;;  %vm2657_vm5 = vcmp.gt.f32.partialorder %v9106_v11, 0.999  ;;  %v2843_v32 = vsel %vm2651_vm13, %v2795_v27, 1.0 }
 0x3f3   :  { %v2705_v54 = vsel %vm2657_vm5, 0.999, %v9106_v11  ;;  %v2466_v17 = vmul.f32 %v2418_v7, %v8886_v41  ;;  %v2891_v20 = vmul.f32 %v2843_v32, %v2747_v5  ;;  %vm3419_vm7 = vcmp.gt.f32.partialorder %v8559_v19, 0.0  ;;  %v10065_v32 = vld [vmem:[#allocation121_spill] sm:$0xff] }
 0x3f4   :  { %v4972_v55 = vpop.eup %4971  ;;  %3613 = vst [vmem:[#allocation7 + $0x148] sm:$0xff] %v3565_v26  ;;  %v3088_v33 = vsub.f32 1.0, %v3850_v38  ;;  %v3851_v1 = vclamps-f32 %v2705_v54, 0.99999  ;;  %v3040_v46 = vadd.f32 1.0, %v3850_v38  ;;  %v2840_v26 = vsel %vm2648_vm0, %v2792_v61, 1.0 }
 0x3f5   :  { %v4974_v23 = vpop.eup %4973  ;;  %v3265_v13 = vmul.f32 0.6931472, %v4972_v55  ;;  %v2514_v34 = vmax.f32 %v2466_v17, 1e-10  ;;  %v2793_v22 = vmul.f32 0.999, %v9062_v51 }
 0x3f6   :  { %v3165_v50 = vmul.f32 %v4974_v23, %v3032_v42  ;;  %4981 = vrcp.f32 %v3088_v33  ;;  %v3089_v45 = vsub.f32 1.0, %v3851_v1  ;;  %v10064_v33 = vld [vmem:[#allocation122_spill] sm:$0xff]  ;;  %v2745_v17 = vsel %vm2649_vm1, 1.001001, %v9062_v51  ;;  %v10066_v61 = vld [vmem:[#allocation125_spill] sm:$0xff] }
 0x3f7   :  { %v3322_v47 = vmul.f32 0.5, %v3265_v13  ;;  %v2800_v51 = vmul.f32 0.999, %v9087_v28  ;;  %vm3416_vm9 = vcmp.gt.f32.partialorder %v8569_v30, 0.0  ;;  %vm3417_vm10 = vcmp.gt.f32.partialorder %v8598_v2, 0.0 }
 0x3f8   :  { %v4976_v0 = vpop.eup %4975  ;;  %4983 = vlog2.f32 %v3165_v50  ;;  %v2841_v50 = vsel %vm2649_vm1, %v2793_v22, 1.0  ;;  %v2801_v30 = vmul.f32 0.999, %v9099_v59  ;;  %v2753_v2 = vsel %vm2657_vm5, 1.001001, %v9099_v59 }
 0x3f9   :  { %v4978_v4 = vpop.eup %4977  ;;  %v3370_v56 = vmul.f32 %v3322_v47, %v2890_v58  ;;  %v3167_v48 = vmul.f32 %v4976_v0, %v3033_v9  ;;  %4985 = vrsqrt.f32 %v2514_v34  ;;  %vm3424_vm12 = vcmp.gt.f32.partialorder %v8613_v57, 0.0 }
 0x3fa   :  { %v4980_v44 = vpop.eup %4979  ;;  %v3267_v60 = vmul.f32 0.6931472, %v4978_v4  ;;  %4987 = vrcp.f32 %v3089_v45  ;;  %vm3425_vm13 = vcmp.gt.f32.partialorder %v8640_v53, 0.0  ;;  %vm3426_vm14 = vcmp.gt.f32.partialorder %v8886_v41, 0.0 }
 0x3fb   :  { %v3466_v49 = vmul.f32 %v3370_v56, %v8894_v8  ;;  %4989 = vlog2.f32 %v3167_v48  ;;  %v9128_v40 = vmul.f32 %v4980_v44, %v9034_v31  ;;  %v2744_v31 = vsel %vm2648_vm0, 1.001001, %v9045_v43 }
 0x3fc   :  { %v3323_v25 = vmul.f32 0.5, %v3267_v60  ;;  %v2888_v27 = vmul.f32 %v2840_v26, %v2744_v31  ;;  %vm3427_vm15 = vcmp.gt.f32.partialorder %v8950_v39, 0.0 }
 0x3fd   :  { %v3514_v10 = vsel %vm3418_vm6, %v3466_v49, 0.0  ;;  %v2419_v15 = vmul.f32 %v9128_v40, %v9128_v40  ;;  %v2752_v49 = vsel %vm2656_vm4, 1.001001, %v9087_v28  ;;  %v2849_v28 = vsel %vm2657_vm5, %v2801_v30, 1.0 }
 0x3fe   :  { %v3562_v63 = vmul.f32 %v10063_v29, %v3514_v10  ;;  %v3371_v6 = vmul.f32 %v3323_v25, %v2891_v20  ;;  %v2897_v31 = vmul.f32 %v2849_v28, %v2753_v2 }
 0x3ff   :  { %v2467_v8 = vmul.f32 %v2419_v15, %v8950_v39 }
 0x400   :  { %v4982_v36 = vpop.eup %4981  ;;  %3610 = vst [vmem:[#allocation7 + $0x130] sm:$0xff] %v3562_v63  ;;  %v3467_v12 = vmul.f32 %v3371_v6, %v8907_v18  ;;  %v3041_v18 = vadd.f32 1.0, %v3851_v1 }
 0x401   :  { %v3181_v7 = vmul.f32 %v4982_v36, %v3040_v46  ;;  %v2515_v55 = vmax.f32 %v2467_v8, 1e-10 }
 0x402   :  { %v4984_v38 = vpop.eup %4983  ;;  %v3515_v37 = vsel %vm3419_vm7, %v3467_v12, 0.0 }
 0x403   :  { %v9144_v42 = vpop.eup %4985  ;;  %v3563_v23 = vmul.f32 %v10064_v33, %v3515_v37  ;;  %v3261_v19 = vmul.f32 0.6931472, %v4984_v38  ;;  %4991 = vlog2.f32 %v3181_v7  ;;  %v10067_v37 = vld [vmem:[#allocation130_spill] sm:$0xff] }
 0x404   :  { %v4988_v13 = vpop.eup %4987  ;;  %v9148_v43 = vmul.f32 %v9144_v42, %v2514_v34  ;;  %4993 = vrsqrt.f32 %v2515_v55  ;;  %v2889_v34 = vmul.f32 %v2841_v50, %v2745_v17  ;;  %v2802_v57 = vmul.f32 0.999, %v9144_v42 }
 0x405   :  { %v4990_v62 = vpop.eup %4989  ;;  %3611 = vst [vmem:[#allocation7 + $0x138] sm:$0xff] %v3563_v23  ;;  %v3320_v54 = vmul.f32 0.5, %v3261_v19  ;;  %v3183_v58 = vmul.f32 %v4988_v13, %v3041_v18  ;;  %v10068_v19 = vld [vmem:[#allocation132_spill] sm:$0xff] }
 0x406   :  { %v3263_v47 = vmul.f32 0.6931472, %v4990_v62  ;;  %vm2658_vm8 = vcmp.gt.f32.partialorder %v9148_v43, 0.999 }
 0x407   :  { %v3368_v1 = vmul.f32 %v3320_v54, %v2888_v27  ;;  %4995 = vlog2.f32 %v3183_v58  ;;  %v2706_v9 = vsel %vm2658_vm8, 0.999, %v9148_v43  ;;  %v2754_v17 = vsel %vm2658_vm8, 1.001001, %v9144_v42 }
 0x408   :  { %v3321_v0 = vmul.f32 0.5, %v3263_v47  ;;  %v3852_v5 = vclamps-f32 %v2706_v9, 0.99999 }
 0x409   :  { %v3464_v45 = vmul.f32 %v3368_v1, %v8957_v52  ;;  %v2848_v52 = vsel %vm2656_vm4, %v2800_v51, 1.0 }
 0x40a   :  { %v3369_v16 = vmul.f32 %v3321_v0, %v2889_v34  ;;  %v3090_v4 = vsub.f32 1.0, %v3852_v5  ;;  %v2896_v29 = vmul.f32 %v2848_v52, %v2752_v49  ;;  %v3042_v22 = vadd.f32 1.0, %v3852_v5  ;;  %v10069_v0 = vld [vmem:[#allocation44_spill] sm:$0xff] }
 0x40b   :  { %v3512_v56 = vsel %vm3416_vm9, %v3464_v45, 0.0 }
 0x40c   :  { %v3560_v48 = vmul.f32 %v3512_v56, %v10065_v32  ;;  %v3465_v44 = vmul.f32 %v3369_v16, %v8966_v3  ;;  %4997 = vrcp.f32 %v3090_v4 }
 0x40d   :  { %v4992_v60 = vpop.eup %4991 }
 0x40e   :  { %v4994_v20 = vpop.eup %4993  ;;  %3608 = vst [vmem:[#allocation7 + $0x120] sm:$0xff] %v3560_v48  ;;  %v3513_v25 = vsel %vm3417_vm10, %v3465_v44, 0.0  ;;  %v3277_v10 = vmul.f32 0.6931472, %v4992_v60 }
 0x40f   :  { %v3561_v15 = vmul.f32 %v3513_v25, %v10066_v61  ;;  %v2611_v3 = vmul.f32 %v4994_v20, %v2515_v55  ;;  %v2803_v9 = vmul.f32 0.999, %v4994_v20 }
 0x410   :  { %v3328_v63 = vmul.f32 0.5, %v3277_v10 }
 0x411   :  { %v4996_v6 = vpop.eup %4995  ;;  %3609 = vst [vmem:[#allocation7 + $0x128] sm:$0xff] %v3561_v15  ;;  %vm2659_vm11 = vcmp.gt.f32.partialorder %v2611_v3, 0.999 }
 0x412   :  { %v3376_v21 = vmul.f32 %v3328_v63, %v2896_v29  ;;  %v3279_v46 = vmul.f32 0.6931472, %v4996_v6  ;;  %v2707_v8 = vsel %vm2659_vm11, 0.999, %v2611_v3  ;;  %v2755_v51 = vsel %vm2659_vm11, 1.001001, %v4994_v20 }
 0x413   :  { %v3853_v36 = vclamps-f32 %v2707_v8, 0.99999  ;;  %v2851_v42 = vsel %vm2659_vm11, %v2803_v9, 1.0 }
 0x414   :  { %v3472_v12 = vmul.f32 %v3376_v21, %v9017_v35  ;;  %v3329_v26 = vmul.f32 0.5, %v3279_v46  ;;  %v2899_v16 = vmul.f32 %v2851_v42, %v2755_v51 }
 0x415   :  { %v3091_v7 = vsub.f32 1.0, %v3853_v36  ;;  %v3043_v13 = vadd.f32 1.0, %v3853_v36 }
 0x416   :  { %v4998_v55 = vpop.eup %4997  ;;  %v3520_v38 = vsel %vm3424_vm12, %v3472_v12, 0.0  ;;  %v3377_v59 = vmul.f32 %v3329_v26, %v2897_v31 }
 0x417   :  { %v3568_v11 = vmul.f32 %v3520_v38, %v10067_v37  ;;  %v3185_v33 = vmul.f32 %v4998_v55, %v3042_v22  ;;  %4999 = vrcp.f32 %v3091_v7 }
 0x418   :  { %v3473_v23 = vmul.f32 %v3377_v59, %v9023_v14  ;;  %v2850_v14 = vsel %vm2658_vm8, %v2802_v57, 1.0 }
 0x419   :  { %3616 = vst [vmem:[#allocation7 + $0x160] sm:$0xff] %v3568_v11  ;;  %5001 = vlog2.f32 %v3185_v33  ;;  %v2898_v53 = vmul.f32 %v2850_v14, %v2754_v17 }
 0x41a   :  { %v3521_v35 = vsel %vm3425_vm13, %v3473_v23, 0.0 }
 0x41b   :  { %v3569_v18 = vmul.f32 %v3521_v35, %v10068_v19 }
 0x41d   :  { %3617 = vst [vmem:[#allocation7 + $0x168] sm:$0xff] %v3569_v18 }
 0x421   :  { %v5000_v27 = vpop.eup %4999 }
 0x422   :  { %v3187_v62 = vmul.f32 %v5000_v27, %v3043_v13 }
 0x423   :  { %v5002_v54 = vpop.eup %5001 }
 0x424   :  { %v3281_v50 = vmul.f32 0.6931472, %v5002_v54  ;;  %5003 = vlog2.f32 %v3187_v62 }
 0x426   :  { %v3330_v58 = vmul.f32 0.5, %v3281_v50 }
 0x428   :  { %v3378_v47 = vmul.f32 %v3330_v58, %v2898_v53 }
 0x42a   :  { %v3474_v1 = vmul.f32 %v3378_v47, %v9094_v24  ;;  %v10070_v24 = vld [vmem:[#allocation131_spill] sm:$0xff] }
 0x42c   :  { %v3522_v34 = vsel %vm3426_vm14, %v3474_v1, 0.0 }
 0x42d   :  { %v3570_v5 = vmul.f32 %v10069_v0, %v3522_v34 }
 0x42e   :  { %v5004_v45 = vpop.eup %5003 }
 0x42f   :  { %3618 = vst [vmem:[#allocation7 + $0x170] sm:$0xff] %v3570_v5  ;;  %v3283_v43 = vmul.f32 0.6931472, %v5004_v45 }
 0x431   :  { %v3331_v4 = vmul.f32 0.5, %v3283_v43 }
 0x433   :  { %v3379_v56 = vmul.f32 %v3331_v4, %v2899_v16 }
 0x435   :  { %v3475_v32 = vmul.f32 %v3379_v56, %v9128_v40 }
 0x437   :  { %v3523_v41 = vsel %vm3427_vm15, %v3475_v32, 0.0 }
 0x438   :  { %v3571_v48 = vmul.f32 %v10070_v24, %v3523_v41 }
 0x43a   :  { %3619 = vst [vmem:[#allocation7 + $0x178] sm:$0xff] %v3571_v48 }
 0x43b   :  { %5078 = shalt.err (!%p5075_p6)
}
 0x43c   :  { %s5079_s12 = scalar_lea.hbm %s9215_s2, 6144 }
 0x43d   :  { %p5080_p7 = scmp.ne.s32.totalorder %s9215_s2, %s5079_s12  ;;  %p5083_p8 = scmp.lt.u32.totalorder %s5079_s12, %s9215_s2 }
 0x43f   :  { %p5085_p9 = pnand %p5083_p8, %p5080_p7 }
 0x441   :  { %5088 = shalt.err (!%p5085_p9)
}
 0x442   :  { %3631 = dma.vmem_to_hbm [thread:$0]  %s3626_s8, 6144, %s9215_s2, [#allocation4], %s5096_s19, %s5096_s19, %s5097_s20  }
 0x443   :  { %5093 = dma.done.wait [#allocation4], 6144  }
 0x444   :  { %5094 = vsyncadd [#allocation4], 4294961152 }
 0x445   :  { %3635 = vsyncpa [#allocation3], 1 }
 0x446   :  { %3636 = vsyncpa [#allocation6], 1 }
 0x447   :  { %3637 = vsyncpa [#allocation4], 1 }

</bundles_post_ra>
